<compile_context>
chip_gen: v7x
topology: tpu7x:2x2x1
jax: 0.10.0
libtpu: 0.0.40
codegen_flags: <defaults>
</compile_context>

<pallas_src>
import functools

import jax
import jax.numpy as jnp
import numpy as np
from jax.experimental import pallas as pl
from jax.experimental.pallas import tpu as pltpu


# ----------------------------------------------------------------------------
# Kernels
# ----------------------------------------------------------------------------
def pool_att_kernel(x_ref, w1_ref, b1_ref, w2_ref, b2_ref, att_ref,
                    sum_scr, max_scr, *, inv_hw):
    """CBAM pass 1: tiled avg/max pooling over HW + shared MLP + hardsigmoid."""
    t = pl.program_id(1)
    x = x_ref[0]                                            # (C, thw) fp32

    @pl.when(t == 0)
    def _():
        sum_scr[...] = jnp.zeros_like(sum_scr)
        max_scr[...] = jnp.full_like(max_scr, -jnp.inf)

    sum_scr[...] += jnp.sum(x, axis=1, keepdims=True)
    max_scr[...] = jnp.maximum(max_scr[...], jnp.max(x, axis=1, keepdims=True))

    @pl.when(t == pl.num_programs(1) - 1)
    def _():
        C = x_ref.shape[1]
        avg = sum_scr[...] * inv_hw                         # AdaptiveAvgPool2d
        mx = max_scr[...]                                   # AdaptiveMaxPool2d
        # Stack both pooled vectors into one (C, 2) matrix -> single MXU pass
        # through the shared MLP (fc(avg) and fc(max) share the weights).
        col = jax.lax.broadcasted_iota(jnp.int32, (C, 2), 1)
        pooled = jnp.where(col == 0, avg, mx)               # (C, 2)
        h = jnp.maximum(
            jnp.dot(w1_ref[...], pooled, preferred_element_type=jnp.float32)
            + b1_ref[...], 0.0)                             # (Cr, 2)
        a2 = (jnp.dot(w2_ref[...], h, preferred_element_type=jnp.float32)
              + b2_ref[...])                                # (C, 2)
        att = jnp.sum(a2, axis=1, keepdims=True)            # fc(avg) + fc(max)
        att_ref[0] = jnp.clip(att + 3.0, 0.0, 6.0) * (1.0 / 6.0)  # Hardsigmoid


def fused_merge_kernel(x_ref, x1_ref, x2_ref, a0_ref, a1_ref, a2_ref,
                       mw1_ref, mh1_ref, mw2_ref, mh2_ref, o_ref):
    """CBAM pass 2: out = a0*x + resize(a1*x1) + resize(a2*x2), one HBM write.

    Blocks are (1, ct, H, W): channels are the tiled/parallel grid axis and
    the spatial dims stay whole, so the separable bilinear resize needs no
    in-kernel reshapes.  Both resize stages are channel-batched dot_generals
    with bf16 operands and fp32 accumulation.
    """
    ct, Ho, Wo = o_ref.shape[1], o_ref.shape[2], o_ref.shape[3]

    def resize(y, mwT_ref, mh_ref):
        Hi, Wi = y.shape[1], y.shape[2]
        mw_b = jnp.broadcast_to(mwT_ref[...], (ct, Wi, Wo))        # bf16
        z = jax.lax.dot_general(                                   # width pass
            y.astype(jnp.bfloat16), mw_b,
            (((2,), (1,)), ((0,), (0,))),
            preferred_element_type=jnp.float32)                    # (ct,Hi,Wo)
        mh_b = jnp.broadcast_to(mh_ref[...], (ct, Ho, Hi))         # bf16
        return jax.lax.dot_general(                                # height pass
            mh_b, z.astype(jnp.bfloat16),
            (((2,), (1,)), ((0,), (0,))),
            preferred_element_type=jnp.float32)                    # (ct,Ho,Wo)

    out = x_ref[0] * a0_ref[0]                                     # branch 0
    out = out + resize(x1_ref[0] * a1_ref[0], mw1_ref, mh1_ref)    # branch 1
    out = out + resize(x2_ref[0] * a2_ref[0], mw2_ref, mh2_ref)    # branch 2
    o_ref[0] = out


def conv_matmul_kernel(p_ref, w_ref, b_ref, o_ref):
    # W(Cout, Cin*k*k) @ patches^T(Cin*k*k, thw) + bias  (bf16 in, fp32 acc/out)
    o_ref[0] = (
        jnp.dot(w_ref[...], p_ref[0], preferred_element_type=jnp.float32)
        + b_ref[...]
    )


# ----------------------------------------------------------------------------
# Tiling helpers
# ----------------------------------------------------------------------------
def _pick_hw_tile(hw):
    # Prefer large tiles (per-grid-step overhead amortizes around 512-1024 on
    # v6e); only tile when it divides HW exactly so the avg/max reduction
    # never sees padded garbage.
    # TODO(synk): masked tiling for large HW that is not a multiple of 128.
    for t in (2048, 1024, 512, 256, 128):
        if hw % t == 0:
            return t
    return hw


def _pick_c_tile(C, per_channel_bytes, budget=4 << 20):
    # Channel tiling bounds per-block VMEM on the fused merge kernel (v7x has
    # only 64 MiB physical / 32 MiB default scoped VMEM).
    ct = C
    while ct > 1 and ct % 2 == 0 and ct * per_channel_bytes > budget:
        ct //= 2
    return ct


# ----------------------------------------------------------------------------
# Wrappers
# ----------------------------------------------------------------------------
def pool_attention(x_flat, p):
    """x_flat: (B, C, HW) fp32 -> hardsigmoid channel attention (B, C, 1, 1)."""
    B, C, HW = x_flat.shape
    Cr = p["fc_w1"].shape[0]
    thw = _pick_hw_tile(HW)
    nt = HW // thw
    kernel = functools.partial(pool_att_kernel, inv_hw=1.0 / HW)
    att = pl.pallas_call(
        kernel,
        out_shape=jax.ShapeDtypeStruct((B, C, 1), jnp.float32),
        grid=(B, nt),
        in_specs=[
            pl.BlockSpec((1, C, thw), lambda b, t: (b, 0, t)),
            pl.BlockSpec((Cr, C), lambda b, t: (0, 0)),
            pl.BlockSpec((Cr, 1), lambda b, t: (0, 0)),
            pl.BlockSpec((C, Cr), lambda b, t: (0, 0)),
            pl.BlockSpec((C, 1), lambda b, t: (0, 0)),
        ],
        out_specs=pl.BlockSpec((1, C, 1), lambda b, t: (b, 0, 0)),
        scratch_shapes=[pltpu.VMEM((C, 1), jnp.float32),   # running sum
                        pltpu.VMEM((C, 1), jnp.float32)],  # running max
        compiler_params=pltpu.CompilerParams(
            dimension_semantics=("parallel", "arbitrary")),
    )(x_flat, p["fc_w1"], p["fc_b1"].reshape(Cr, 1),
      p["fc_w2"], p["fc_b2"].reshape(C, 1))
    return att.reshape(B, C, 1, 1)


def fused_apply_resize_sum(x, x1, x2, a0, a1, a2, mw1, mh1, mw2, mh2):
    """out = a0*x + bilinear(a1*x1) + bilinear(a2*x2), all in one pallas_call."""
    B, C, Ho, Wo = x.shape
    H1, W1 = x1.shape[2], x1.shape[3]
    H2, W2 = x2.shape[2], x2.shape[3]
    per_ch = 4 * (3 * Ho * Wo + H1 * W1 + H2 * W2 + (H1 + H2) * Wo)
    ct = _pick_c_tile(C, per_ch)
    return pl.pallas_call(
        fused_merge_kernel,
        out_shape=jax.ShapeDtypeStruct((B, C, Ho, Wo), jnp.float32),
        grid=(B, C // ct),
        in_specs=[
            pl.BlockSpec((1, ct, Ho, Wo), lambda b, c: (b, c, 0, 0)),
            pl.BlockSpec((1, ct, H1, W1), lambda b, c: (b, c, 0, 0)),
            pl.BlockSpec((1, ct, H2, W2), lambda b, c: (b, c, 0, 0)),
            pl.BlockSpec((1, ct, 1, 1), lambda b, c: (b, c, 0, 0)),
            pl.BlockSpec((1, ct, 1, 1), lambda b, c: (b, c, 0, 0)),
            pl.BlockSpec((1, ct, 1, 1), lambda b, c: (b, c, 0, 0)),
            pl.BlockSpec((W1, Wo), lambda b, c: (0, 0)),
            pl.BlockSpec((Ho, H1), lambda b, c: (0, 0)),
            pl.BlockSpec((W2, Wo), lambda b, c: (0, 0)),
            pl.BlockSpec((Ho, H2), lambda b, c: (0, 0)),
        ],
        out_specs=pl.BlockSpec((1, ct, Ho, Wo), lambda b, c: (b, c, 0, 0)),
        compiler_params=pltpu.CompilerParams(
            dimension_semantics=("parallel", "parallel")),
    )(x, x1, x2, a0, a1, a2, mw1, mh1, mw2, mh2)


def conv2d(x, w, b, stride, pad):
    """NCHW conv. Returns ((B, Cout, Ho*Wo) fp32, Ho, Wo) — spatial on lanes."""
    B, Cin, H, W = x.shape
    Cout, _, k, _ = w.shape
    Ho = (H + 2 * pad - k) // stride + 1
    Wo = (W + 2 * pad - k) // stride + 1
    HW, CKK = Ho * Wo, Cin * k * k

    # im2col^T: reshape-only glue, layout (B, Cin*k*k, Ho*Wo).  bf16 cast is
    # fused by XLA into this gather fusion (half the HBM bytes of fp32).
    # TODO(synk): stream the k*k taps through the matmul K axis in-kernel to
    # avoid materializing the 9x patches tensor at large resolutions.
    xp = jnp.pad(x, ((0, 0), (0, 0), (pad, pad), (pad, pad)))
    taps = []
    for i in range(k):
        for j in range(k):
            taps.append(xp[:, :, i:i + stride * (Ho - 1) + 1:stride,
                                 j:j + stride * (Wo - 1) + 1:stride])
    patches_t = jnp.stack(taps, axis=2).reshape(B, CKK, HW).astype(jnp.bfloat16)
    wmat = w.reshape(Cout, CKK).astype(jnp.bfloat16)
    bias = b.reshape(Cout, 1).astype(jnp.float32)

    thw = _pick_hw_tile(HW)
    out = pl.pallas_call(
        conv_matmul_kernel,
        out_shape=jax.ShapeDtypeStruct((B, Cout, HW), jnp.float32),
        grid=(B, HW // thw),
        in_specs=[
            pl.BlockSpec((1, CKK, thw), lambda bi, ji: (bi, 0, ji)),
            pl.BlockSpec((Cout, CKK), lambda bi, ji: (0, 0)),
            pl.BlockSpec((Cout, 1), lambda bi, ji: (0, 0)),
        ],
        out_specs=pl.BlockSpec((1, Cout, thw), lambda bi, ji: (bi, 0, ji)),
        compiler_params=pltpu.CompilerParams(
            dimension_semantics=("parallel", "parallel")),
    )(patches_t, wmat, bias)
    return out, Ho, Wo


# ----------------------------------------------------------------------------
# Host-side (numpy) bilinear interpolation constants (separable, bf16)
# ----------------------------------------------------------------------------
def _interp_matrix_np(out_size, in_size):
    """Row-interpolation matrix for bilinear, align_corners=True."""
    M = np.zeros((out_size, in_size), np.float32)
    for o in range(out_size):
        src = o * (in_size - 1) / (out_size - 1) if out_size > 1 else 0.0
        i0 = min(max(int(np.floor(src)), 0), in_size - 1)
        i1 = min(i0 + 1, in_size - 1)
        frac = src - i0
        M[o, i0] += 1.0 - frac
        M[o, i1] += frac
    return M


def resize_mats(hi, wi, ho, wo):
    """Separable bilinear weights: (Mw^T (wi, wo), Mh (ho, hi)) in bf16."""
    mw_t = _interp_matrix_np(wo, wi).T
    mh = _interp_matrix_np(ho, hi)
    return (jnp.asarray(mw_t, dtype=jnp.bfloat16),
            jnp.asarray(mh, dtype=jnp.bfloat16))


# ----------------------------------------------------------------------------
# Forward pass (matches the PyTorch `sent` module)
# ----------------------------------------------------------------------------
def sent_forward(x, p, size):
    B, C, H, W = x.shape
    Ho, Wo = size
    if (H, W) != (Ho, Wo):
        raise ValueError(
            "sent: the final residual add requires input spatial size == `size` "
            f"(got input {(H, W)}, size {(Ho, Wo)}).")

    # conv branches: lane-dense (B, C, HW) outputs
    x1_flat, H1, W1 = conv2d(x, p["conv1_w"], p["conv1_b"], stride=2, pad=1)
    x2a_flat, H2a, W2a = conv2d(x, p["conv2a_w"], p["conv2a_b"], stride=2, pad=1)
    x2_flat, H2, W2 = conv2d(x2a_flat.reshape(B, C, H2a, W2a),
                             p["conv2b_w"], p["conv2b_b"], stride=2, pad=0)

    # CBAM pass 1: channel attentions (tiled HW reduction)
    a0 = pool_attention(x.reshape(B, C, H * W), p)
    a1 = pool_attention(x1_flat, p)
    a2 = pool_attention(x2_flat, p)

    # CBAM pass 2 + separable bilinear upsample + residual sum, fully fused
    mw1, mh1 = resize_mats(H1, W1, Ho, Wo)
    mw2, mh2 = resize_mats(H2, W2, Ho, Wo)
    return fused_apply_resize_sum(
        x,
        x1_flat.reshape(B, C, H1, W1),
        x2_flat.reshape(B, C, H2, W2),
        a0, a1, a2, mw1, mh1, mw2, mh2)


# ----------------------------------------------------------------------------
# Pure-JAX fp32 reference (correctness check of the Pallas path)
# ----------------------------------------------------------------------------
def conv_ref(x, w, b, stride, pad):
    y = jax.lax.conv_general_dilated(
        x, w, (stride, stride), [(pad, pad), (pad, pad)],
        dimension_numbers=("NCHW", "OIHW", "NCHW"))
    return y + b[None, :, None, None]


def cbam_ref(inp, p):
    avg = inp.mean(axis=(2, 3))                            # (B, C)
    mx = inp.max(axis=(2, 3))                              # (B, C)

    def fc(v):
        h = jnp.maximum(v @ p["fc_w1"].T + p["fc_b1"], 0.0)
        return h @ p["fc_w2"].T + p["fc_b2"]

    a = fc(avg) + fc(mx)
    a = jnp.clip(a + 3.0, 0.0, 6.0) / 6.0
    return inp * a[:, :, None, None]


def interp_ref(img, size):
    Mh = jnp.asarray(_interp_matrix_np(size[0], img.shape[2]))
    Mw = jnp.asarray(_interp_matrix_np(size[1], img.shape[3]))
    return jnp.einsum("oh,bchw,pw->bcop", Mh, img, Mw)


def sent_reference(x, p, size):
    c0 = cbam_ref(x, p)
    x1 = conv_ref(x, p["conv1_w"], p["conv1_b"], 2, 1)
    c1 = interp_ref(cbam_ref(x1, p), size)
    x2 = conv_ref(x, p["conv2a_w"], p["conv2a_b"], 2, 1)
    x2 = conv_ref(x2, p["conv2b_w"], p["conv2b_b"], 2, 0)
    c2 = interp_ref(cbam_ref(x2, p), size)
    return c0 + c1 + c2


# ----------------------------------------------------------------------------
if __name__ == "__main__":
    B, C, H, W = 2, 16, 16, 16
    reduction = 4
    Cr = C // reduction
    size = (H, W)  # input spatial must equal `size` for the final residual sum

    key = jax.random.PRNGKey(0)
    ks = jax.random.split(key, 11)
    params = {
        "conv1_w": jax.random.normal(ks[0], (C, C, 3, 3), jnp.float32) * 0.05,
        "conv1_b": jax.random.normal(ks[1], (C,), jnp.float32) * 0.05,
        "conv2a_w": jax.random.normal(ks[2], (C, C, 3, 3), jnp.float32) * 0.05,
        "conv2a_b": jax.random.normal(ks[3], (C,), jnp.float32) * 0.05,
        "conv2b_w": jax.random.normal(ks[4], (C, C, 3, 3), jnp.float32) * 0.05,
        "conv2b_b": jax.random.normal(ks[5], (C,), jnp.float32) * 0.05,
        # fc = Conv2d(C->Cr,1x1) -> ReLU -> Conv2d(Cr->C,1x1), PyTorch (out,in)
        "fc_w1": jax.random.normal(ks[6], (Cr, C), jnp.float32) * 0.1,
        "fc_b1": jax.random.normal(ks[7], (Cr,), jnp.float32) * 0.05,
        "fc_w2": jax.random.normal(ks[8], (C, Cr), jnp.float32) * 0.1,
        "fc_b2": jax.random.normal(ks[9], (C,), jnp.float32) * 0.05,
    }
    x = jax.random.normal(ks[10], (B, C, H, W), jnp.float32)

    fwd = jax.jit(functools.partial(sent_forward, size=size))
    out = jax.block_until_ready(fwd(x, params))
    assert out.shape == (B, C, H, W)

    ref = jax.block_until_ready(sent_reference(x, params, size))
    # Conv / resize matmuls use bf16 MXU inputs (fp32 accumulation) -> looser
    # tolerance vs. the pure-fp32 reference.
    np.testing.assert_allclose(np.asarray(out), np.asarray(ref), rtol=2e-2, atol=2e-2)

    print("KERNEL_OK")
</pallas_src>

<mosaic_0001>
module attributes {stable_mosaic.version = 11 : i64} {
  func.func @conv_matmul_kernel(%arg0: i32, %arg1: i32, %arg2: memref<1x144x64xbf16, #tpu.memory_space<vmem>>, %arg3: memref<16x144xbf16, #tpu.memory_space<vmem>>, %arg4: memref<16x1xf32, #tpu.memory_space<vmem>>, %arg5: memref<1x16x64xf32, #tpu.memory_space<vmem>>) attributes {dimension_semantics = [#tpu.dimension_semantics<parallel>, #tpu.dimension_semantics<parallel>], iteration_bounds = array<i64: 2, 1>, scalar_prefetch = 0 : i64, scratch_operands = 0 : i64, tpu.core_type = #tpu.core_type<tc>, window_params = [{transform_indices = @transform_0, window_bounds = array<i64: 1, 144, 64>}, {pipeline_mode = #tpu.pipeline_mode<synchronous>, transform_indices = @transform_1, window_bounds = array<i64: 16, 144>}, {pipeline_mode = #tpu.pipeline_mode<synchronous>, transform_indices = @transform_2, window_bounds = array<i64: 16, 1>}, {transform_indices = @transform_3, window_bounds = array<i64: 1, 16, 64>}]} {
    %c0 = arith.constant 0 : index
    %c0_0 = arith.constant 0 : index
    %0 = vector.load %arg3[%c0, %c0_0] : memref<16x144xbf16, #tpu.memory_space<vmem>>, vector<16x144xbf16>
    %c0_1 = arith.constant 0 : index
    %c0_2 = arith.constant 0 : index
    %c0_3 = arith.constant 0 : index
    %1 = vector.load %arg2[%c0_1, %c0_2, %c0_3] : memref<1x144x64xbf16, #tpu.memory_space<vmem>>, vector<1x144x64xbf16>
    %2 = vector.shape_cast %1 : vector<1x144x64xbf16> to vector<144x64xbf16>
    %cst = arith.constant dense<0.000000e+00> : vector<16x64xf32>
    %3 = tpu.matmul %0, %2, %cst {dimension_numbers = #tpu.dot_dimension_numbers<[1], [0], [0], [1], [0, 0, 1, 1], [], []>} : vector<16x144xbf16>, vector<144x64xbf16>, vector<16x64xf32> -> vector<16x64xf32>
    %c0_4 = arith.constant 0 : index
    %c0_5 = arith.constant 0 : index
    %4 = vector.load %arg4[%c0_4, %c0_5] : memref<16x1xf32, #tpu.memory_space<vmem>>, vector<16x1xf32>
    %5 = vector.broadcast %4 : vector<16x1xf32> to vector<16x64xf32>
    %6 = arith.addf %3, %5 : vector<16x64xf32>
    %c0_6 = arith.constant 0 : index
    %c0_7 = arith.constant 0 : index
    %c0_8 = arith.constant 0 : index
    %7 = vector.load %arg5[%c0_6, %c0_7, %c0_8] : memref<1x16x64xf32, #tpu.memory_space<vmem>>, vector<1x16x64xf32>
    %8 = vector.shape_cast %7 : vector<1x16x64xf32> to vector<16x64xf32>
    %9 = vector.shape_cast %6 : vector<16x64xf32> to vector<1x16x64xf32>
    tpu.vector_store %arg5[%c0_6, %c0_7, %c0_8], %9 {strides = array<i32>} : memref<1x16x64xf32, #tpu.memory_space<vmem>>, vector<1x16x64xf32>,
    return
  }
  func.func @transform_0(%arg0: i32, %arg1: i32) -> (i32, i32, i32) {
    %c0_i32 = arith.constant 0 : i32
    %c0_i32_0 = arith.constant 0 : i32
    return %arg0, %c0_i32, %arg1 : i32, i32, i32
  }
  func.func @transform_1(%arg0: i32, %arg1: i32) -> (i32, i32) {
    %c0_i32 = arith.constant 0 : i32
    %c0_i32_0 = arith.constant 0 : i32
    %c0_i32_1 = arith.constant 0 : i32
    return %c0_i32, %c0_i32_0 : i32, i32
  }
  func.func @transform_2(%arg0: i32, %arg1: i32) -> (i32, i32) {
    %c0_i32 = arith.constant 0 : i32
    %c0_i32_0 = arith.constant 0 : i32
    %c0_i32_1 = arith.constant 0 : i32
    return %c0_i32, %c0_i32_0 : i32, i32
  }
  func.func @transform_3(%arg0: i32, %arg1: i32) -> (i32, i32, i32) {
    %c0_i32 = arith.constant 0 : i32
    %c0_i32_0 = arith.constant 0 : i32
    return %arg0, %c0_i32, %arg1 : i32, i32, i32
  }
}

module attributes {stable_mosaic.version = 11 : i64} {
  func.func @conv_matmul_kernel(%arg0: i32, %arg1: i32, %arg2: memref<1x144x9xbf16, #tpu.memory_space<vmem>>, %arg3: memref<16x144xbf16, #tpu.memory_space<vmem>>, %arg4: memref<16x1xf32, #tpu.memory_space<vmem>>, %arg5: memref<1x16x9xf32, #tpu.memory_space<vmem>>) attributes {dimension_semantics = [#tpu.dimension_semantics<parallel>, #tpu.dimension_semantics<parallel>], iteration_bounds = array<i64: 2, 1>, scalar_prefetch = 0 : i64, scratch_operands = 0 : i64, tpu.core_type = #tpu.core_type<tc>, window_params = [{transform_indices = @transform_0, window_bounds = array<i64: 1, 144, 9>}, {pipeline_mode = #tpu.pipeline_mode<synchronous>, transform_indices = @transform_1, window_bounds = array<i64: 16, 144>}, {pipeline_mode = #tpu.pipeline_mode<synchronous>, transform_indices = @transform_2, window_bounds = array<i64: 16, 1>}, {transform_indices = @transform_3, window_bounds = array<i64: 1, 16, 9>}]} {
    %c0 = arith.constant 0 : index
    %c0_0 = arith.constant 0 : index
    %0 = vector.load %arg3[%c0, %c0_0] : memref<16x144xbf16, #tpu.memory_space<vmem>>, vector<16x144xbf16>
    %c0_1 = arith.constant 0 : index
    %c0_2 = arith.constant 0 : index
    %c0_3 = arith.constant 0 : index
    %1 = vector.load %arg2[%c0_1, %c0_2, %c0_3] : memref<1x144x9xbf16, #tpu.memory_space<vmem>>, vector<1x144x9xbf16>
    %2 = vector.shape_cast %1 : vector<1x144x9xbf16> to vector<144x9xbf16>
    %cst = arith.constant dense<0.000000e+00> : vector<16x9xf32>
    %3 = tpu.matmul %0, %2, %cst {dimension_numbers = #tpu.dot_dimension_numbers<[1], [0], [0], [1], [0, 0, 1, 1], [], []>} : vector<16x144xbf16>, vector<144x9xbf16>, vector<16x9xf32> -> vector<16x9xf32>
    %c0_4 = arith.constant 0 : index
    %c0_5 = arith.constant 0 : index
    %4 = vector.load %arg4[%c0_4, %c0_5] : memref<16x1xf32, #tpu.memory_space<vmem>>, vector<16x1xf32>
    %5 = vector.broadcast %4 : vector<16x1xf32> to vector<16x9xf32>
    %6 = arith.addf %3, %5 : vector<16x9xf32>
    %c0_6 = arith.constant 0 : index
    %c0_7 = arith.constant 0 : index
    %c0_8 = arith.constant 0 : index
    %7 = vector.load %arg5[%c0_6, %c0_7, %c0_8] : memref<1x16x9xf32, #tpu.memory_space<vmem>>, vector<1x16x9xf32>
    %8 = vector.shape_cast %7 : vector<1x16x9xf32> to vector<16x9xf32>
    %9 = vector.shape_cast %6 : vector<16x9xf32> to vector<1x16x9xf32>
    tpu.vector_store %arg5[%c0_6, %c0_7, %c0_8], %9 {strides = array<i32>} : memref<1x16x9xf32, #tpu.memory_space<vmem>>, vector<1x16x9xf32>,
    return
  }
  func.func @transform_0(%arg0: i32, %arg1: i32) -> (i32, i32, i32) {
    %c0_i32 = arith.constant 0 : i32
    %c0_i32_0 = arith.constant 0 : i32
    return %arg0, %c0_i32, %arg1 : i32, i32, i32
  }
  func.func @transform_1(%arg0: i32, %arg1: i32) -> (i32, i32) {
    %c0_i32 = arith.constant 0 : i32
    %c0_i32_0 = arith.constant 0 : i32
    %c0_i32_1 = arith.constant 0 : i32
    return %c0_i32, %c0_i32_0 : i32, i32
  }
  func.func @transform_2(%arg0: i32, %arg1: i32) -> (i32, i32) {
    %c0_i32 = arith.constant 0 : i32
    %c0_i32_0 = arith.constant 0 : i32
    %c0_i32_1 = arith.constant 0 : i32
    return %c0_i32, %c0_i32_0 : i32, i32
  }
  func.func @transform_3(%arg0: i32, %arg1: i32) -> (i32, i32, i32) {
    %c0_i32 = arith.constant 0 : i32
    %c0_i32_0 = arith.constant 0 : i32
    return %arg0, %c0_i32, %arg1 : i32, i32, i32
  }
}

module attributes {stable_mosaic.version = 11 : i64} {
  func.func @pool_att_kernel(%arg0: i32, %arg1: i32, %arg2: memref<1x16x9xf32, #tpu.memory_space<vmem>>, %arg3: memref<4x16xf32, #tpu.memory_space<vmem>>, %arg4: memref<4x1xf32, #tpu.memory_space<vmem>>, %arg5: memref<16x4xf32, #tpu.memory_space<vmem>>, %arg6: memref<16x1xf32, #tpu.memory_space<vmem>>, %arg7: memref<1x16x1xf32, #tpu.memory_space<vmem>>, %arg8: memref<16x1xf32, #tpu.memory_space<vmem>>, %arg9: memref<16x1xf32, #tpu.memory_space<vmem>>) attributes {dimension_semantics = [#tpu.dimension_semantics<parallel>, #tpu.dimension_semantics<arbitrary>], iteration_bounds = array<i64: 2, 1>, scalar_prefetch = 0 : i64, scratch_operands = 2 : i64, tpu.core_type = #tpu.core_type<tc>, window_params = [{transform_indices = @transform_0, window_bounds = array<i64: 1, 16, 9>}, {pipeline_mode = #tpu.pipeline_mode<synchronous>, transform_indices = @transform_1, window_bounds = array<i64: 4, 16>}, {pipeline_mode = #tpu.pipeline_mode<synchronous>, transform_indices = @transform_2, window_bounds = array<i64: 4, 1>}, {pipeline_mode = #tpu.pipeline_mode<synchronous>, transform_indices = @transform_3, window_bounds = array<i64: 16, 4>}, {pipeline_mode = #tpu.pipeline_mode<synchronous>, transform_indices = @transform_4, window_bounds = array<i64: 16, 1>}, {transform_indices = @transform_5, window_bounds = array<i64: 1, 16, 1>}]} {
    %c0 = arith.constant 0 : index
    %c0_0 = arith.constant 0 : index
    %c0_1 = arith.constant 0 : index
    %0 = vector.load %arg2[%c0, %c0_0, %c0_1] : memref<1x16x9xf32, #tpu.memory_space<vmem>>, vector<1x16x9xf32>
    %1 = vector.shape_cast %0 : vector<1x16x9xf32> to vector<16x9xf32>
    %c0_i32 = arith.constant 0 : i32
    %2 = arith.cmpi eq, %arg1, %c0_i32 : i32
    %3 = arith.extui %2 : i1 to i32
    %c0_i32_2 = arith.constant 0 : i32
    %4 = arith.cmpi ne, %3, %c0_i32_2 : i32
    scf.if %4 {
      %cst_14 = arith.constant 0.000000e+00 : f32
      %18 = vector.broadcast %cst_14 : f32 to vector<16x1xf32>
      %c0_15 = arith.constant 0 : index
      %c0_16 = arith.constant 0 : index
      %19 = vector.load %arg8[%c0_15, %c0_16] : memref<16x1xf32, #tpu.memory_space<vmem>>, vector<16x1xf32>
      tpu.vector_store %arg8[%c0_15, %c0_16], %18 {strides = array<i32>} : memref<16x1xf32, #tpu.memory_space<vmem>>, vector<16x1xf32>,
      %cst_17 = arith.constant 0xFF800000 : f32
      %20 = vector.broadcast %cst_17 : f32 to vector<16x1xf32>
      %c0_18 = arith.constant 0 : index
      %c0_19 = arith.constant 0 : index
      %21 = vector.load %arg9[%c0_18, %c0_19] : memref<16x1xf32, #tpu.memory_space<vmem>>, vector<16x1xf32>
      tpu.vector_store %arg9[%c0_18, %c0_19], %20 {strides = array<i32>} : memref<16x1xf32, #tpu.memory_space<vmem>>, vector<16x1xf32>,
    } else {
    }
    %c0_3 = arith.constant 0 : index
    %c0_4 = arith.constant 0 : index
    %5 = vector.load %arg8[%c0_3, %c0_4] : memref<16x1xf32, #tpu.memory_space<vmem>>, vector<16x1xf32>
    %cst = arith.constant dense<0.000000e+00> : vector<16xf32>
    %6 = vector.multi_reduction <add>, %1, %cst [1] : vector<16x9xf32> to vector<16xf32>
    %7 = vector.shape_cast %6 : vector<16xf32> to vector<16x1xf32>
    %8 = arith.addf %5, %7 : vector<16x1xf32>
    %c0_5 = arith.constant 0 : index
    %c0_6 = arith.constant 0 : index
    %9 = vector.load %arg8[%c0_5, %c0_6] : memref<16x1xf32, #tpu.memory_space<vmem>>, vector<16x1xf32>
    tpu.vector_store %arg8[%c0_5, %c0_6], %8 {strides = array<i32>} : memref<16x1xf32, #tpu.memory_space<vmem>>, vector<16x1xf32>,
    %c0_7 = arith.constant 0 : index
    %c0_8 = arith.constant 0 : index
    %10 = vector.load %arg9[%c0_7, %c0_8] : memref<16x1xf32, #tpu.memory_space<vmem>>, vector<16x1xf32>
    %cst_9 = arith.constant dense<0xFF800000> : vector<16xf32>
    %11 = vector.multi_reduction <maximumf>, %1, %cst_9 [1] : vector<16x9xf32> to vector<16xf32>
    %12 = vector.shape_cast %11 : vector<16xf32> to vector<16x1xf32>
    %13 = arith.maximumf %10, %12 : vector<16x1xf32>
    %c0_10 = arith.constant 0 : index
    %c0_11 = arith.constant 0 : index
    %14 = vector.load %arg9[%c0_10, %c0_11] : memref<16x1xf32, #tpu.memory_space<vmem>>, vector<16x1xf32>
    tpu.vector_store %arg9[%c0_10, %c0_11], %13 {strides = array<i32>} : memref<16x1xf32, #tpu.memory_space<vmem>>, vector<16x1xf32>,
    %c0_i32_12 = arith.constant 0 : i32
    %15 = arith.cmpi eq, %arg1, %c0_i32_12 : i32
    %16 = arith.extui %15 : i1 to i32
    %c0_i32_13 = arith.constant 0 : i32
    %17 = arith.cmpi ne, %16, %c0_i32_13 : i32
    scf.if %17 {
      %c0_14 = arith.constant 0 : index
      %c0_15 = arith.constant 0 : index
      %18 = vector.load %arg8[%c0_14, %c0_15] : memref<16x1xf32, #tpu.memory_space<vmem>>, vector<16x1xf32>
      %cst_16 = arith.constant 0.111111112 : f32
      %19 = vector.broadcast %cst_16 : f32 to vector<16x1xf32>
      %20 = arith.mulf %18, %19 : vector<16x1xf32>
      %c0_17 = arith.constant 0 : index
      %c0_18 = arith.constant 0 : index
      %21 = vector.load %arg9[%c0_17, %c0_18] : memref<16x1xf32, #tpu.memory_space<vmem>>, vector<16x1xf32>
      %22 = tpu.iota {dimensions = array<i32: 1>} : vector<16x2xi32>
      %c0_i32_19 = arith.constant 0 : i32
      %23 = vector.broadcast %c0_i32_19 : i32 to vector<16x2xi32>
      %24 = arith.cmpi eq, %22, %23 : vector<16x2xi32>
      %25 = vector.shape_cast %20 : vector<16x1xf32> to vector<16x1xf32>
      %26 = vector.broadcast %25 : vector<16x1xf32> to vector<16x2xf32>
      %27 = vector.shape_cast %21 : vector<16x1xf32> to vector<16x1xf32>
      %28 = vector.broadcast %27 : vector<16x1xf32> to vector<16x2xf32>
      %29 = arith.select %24, %26, %28 : vector<16x2xi1>, vector<16x2xf32>
      %c0_20 = arith.constant 0 : index
      %c0_21 = arith.constant 0 : index
      %30 = vector.load %arg3[%c0_20, %c0_21] : memref<4x16xf32, #tpu.memory_space<vmem>>, vector<4x16xf32>
      %cst_22 = arith.constant dense<0.000000e+00> : vector<4x2xf32>
      %31 = tpu.matmul %30, %29, %cst_22 {dimension_numbers = #tpu.dot_dimension_numbers<[1], [0], [0], [1], [0, 0, 1, 1], [], []>} : vector<4x16xf32>, vector<16x2xf32>, vector<4x2xf32> -> vector<4x2xf32>
      %c0_23 = arith.constant 0 : index
      %c0_24 = arith.constant 0 : index
      %32 = vector.load %arg4[%c0_23, %c0_24] : memref<4x1xf32, #tpu.memory_space<vmem>>, vector<4x1xf32>
      %33 = vector.broadcast %32 : vector<4x1xf32> to vector<4x2xf32>
      %34 = arith.addf %31, %33 : vector<4x2xf32>
      %cst_25 = arith.constant 0.000000e+00 : f32
      %35 = vector.broadcast %cst_25 : f32 to vector<4x2xf32>
      %36 = arith.maximumf %34, %35 : vector<4x2xf32>
      %c0_26 = arith.constant 0 : index
      %c0_27 = arith.constant 0 : index
      %37 = vector.load %arg5[%c0_26, %c0_27] : memref<16x4xf32, #tpu.memory_space<vmem>>, vector<16x4xf32>
      %cst_28 = arith.constant dense<0.000000e+00> : vector<16x2xf32>
      %38 = tpu.matmul %37, %36, %cst_28 {dimension_numbers = #tpu.dot_dimension_numbers<[1], [0], [0], [1], [0, 0, 1, 1], [], []>} : vector<16x4xf32>, vector<4x2xf32>, vector<16x2xf32> -> vector<16x2xf32>
      %c0_29 = arith.constant 0 : index
      %c0_30 = arith.constant 0 : index
      %39 = vector.load %arg6[%c0_29, %c0_30] : memref<16x1xf32, #tpu.memory_space<vmem>>, vector<16x1xf32>
      %40 = vector.broadcast %39 : vector<16x1xf32> to vector<16x2xf32>
      %41 = arith.addf %38, %40 : vector<16x2xf32>
      %cst_31 = arith.constant dense<0.000000e+00> : vector<16xf32>
      %42 = vector.multi_reduction <add>, %41, %cst_31 [1] : vector<16x2xf32> to vector<16xf32>
      %43 = vector.shape_cast %42 : vector<16xf32> to vector<16x1xf32>
      %cst_32 = arith.constant 3.000000e+00 : f32
      %44 = vector.broadcast %cst_32 : f32 to vector<16x1xf32>
      %45 = arith.addf %43, %44 : vector<16x1xf32>
      %cst_33 = arith.constant 0.000000e+00 : f32
      %cst_34 = arith.constant 6.000000e+00 : f32
      %46 = vector.broadcast %cst_33 : f32 to vector<16x1xf32>
      %47 = arith.maximumf %46, %45 : vector<16x1xf32>
      %48 = vector.broadcast %cst_34 : f32 to vector<16x1xf32>
      %49 = arith.minimumf %48, %47 : vector<16x1xf32>
      %cst_35 = arith.constant 0.166666672 : f32
      %50 = vector.broadcast %cst_35 : f32 to vector<16x1xf32>
      %51 = arith.mulf %49, %50 : vector<16x1xf32>
      %c0_36 = arith.constant 0 : index
      %c0_37 = arith.constant 0 : index
      %c0_38 = arith.constant 0 : index
      %52 = vector.load %arg7[%c0_36, %c0_37, %c0_38] : memref<1x16x1xf32, #tpu.memory_space<vmem>>, vector<1x16x1xf32>
      %53 = vector.shape_cast %52 : vector<1x16x1xf32> to vector<16x1xf32>
      %54 = vector.shape_cast %51 : vector<16x1xf32> to vector<1x16x1xf32>
      tpu.vector_store %arg7[%c0_36, %c0_37, %c0_38], %54 {strides = array<i32>} : memref<1x16x1xf32, #tpu.memory_space<vmem>>, vector<1x16x1xf32>,
    } else {
    }
    return
  }
  func.func @transform_0(%arg0: i32, %arg1: i32) -> (i32, i32, i32) {
    %c0_i32 = arith.constant 0 : i32
    %c0_i32_0 = arith.constant 0 : i32
    return %arg0, %c0_i32, %arg1 : i32, i32, i32
  }
  func.func @transform_1(%arg0: i32, %arg1: i32) -> (i32, i32) {
    %c0_i32 = arith.constant 0 : i32
    %c0_i32_0 = arith.constant 0 : i32
    %c0_i32_1 = arith.constant 0 : i32
    return %c0_i32, %c0_i32_0 : i32, i32
  }
  func.func @transform_2(%arg0: i32, %arg1: i32) -> (i32, i32) {
    %c0_i32 = arith.constant 0 : i32
    %c0_i32_0 = arith.constant 0 : i32
    %c0_i32_1 = arith.constant 0 : i32
    return %c0_i32, %c0_i32_0 : i32, i32
  }
  func.func @transform_3(%arg0: i32, %arg1: i32) -> (i32, i32) {
    %c0_i32 = arith.constant 0 : i32
    %c0_i32_0 = arith.constant 0 : i32
    %c0_i32_1 = arith.constant 0 : i32
    return %c0_i32, %c0_i32_0 : i32, i32
  }
  func.func @transform_4(%arg0: i32, %arg1: i32) -> (i32, i32) {
    %c0_i32 = arith.constant 0 : i32
    %c0_i32_0 = arith.constant 0 : i32
    %c0_i32_1 = arith.constant 0 : i32
    return %c0_i32, %c0_i32_0 : i32, i32
  }
  func.func @transform_5(%arg0: i32, %arg1: i32) -> (i32, i32, i32) {
    %c0_i32 = arith.constant 0 : i32
    %c0_i32_0 = arith.constant 0 : i32
    %c0_i32_1 = arith.constant 0 : i32
    return %arg0, %c0_i32, %c0_i32_0 : i32, i32, i32
  }
}

module attributes {stable_mosaic.version = 11 : i64} {
  func.func @pool_att_kernel(%arg0: i32, %arg1: i32, %arg2: memref<1x16x64xf32, #tpu.memory_space<vmem>>, %arg3: memref<4x16xf32, #tpu.memory_space<vmem>>, %arg4: memref<4x1xf32, #tpu.memory_space<vmem>>, %arg5: memref<16x4xf32, #tpu.memory_space<vmem>>, %arg6: memref<16x1xf32, #tpu.memory_space<vmem>>, %arg7: memref<1x16x1xf32, #tpu.memory_space<vmem>>, %arg8: memref<16x1xf32, #tpu.memory_space<vmem>>, %arg9: memref<16x1xf32, #tpu.memory_space<vmem>>) attributes {dimension_semantics = [#tpu.dimension_semantics<parallel>, #tpu.dimension_semantics<arbitrary>], iteration_bounds = array<i64: 2, 1>, scalar_prefetch = 0 : i64, scratch_operands = 2 : i64, tpu.core_type = #tpu.core_type<tc>, window_params = [{transform_indices = @transform_0, window_bounds = array<i64: 1, 16, 64>}, {pipeline_mode = #tpu.pipeline_mode<synchronous>, transform_indices = @transform_1, window_bounds = array<i64: 4, 16>}, {pipeline_mode = #tpu.pipeline_mode<synchronous>, transform_indices = @transform_2, window_bounds = array<i64: 4, 1>}, {pipeline_mode = #tpu.pipeline_mode<synchronous>, transform_indices = @transform_3, window_bounds = array<i64: 16, 4>}, {pipeline_mode = #tpu.pipeline_mode<synchronous>, transform_indices = @transform_4, window_bounds = array<i64: 16, 1>}, {transform_indices = @transform_5, window_bounds = array<i64: 1, 16, 1>}]} {
    %c0 = arith.constant 0 : index
    %c0_0 = arith.constant 0 : index
    %c0_1 = arith.constant 0 : index
    %0 = vector.load %arg2[%c0, %c0_0, %c0_1] : memref<1x16x64xf32, #tpu.memory_space<vmem>>, vector<1x16x64xf32>
    %1 = vector.shape_cast %0 : vector<1x16x64xf32> to vector<16x64xf32>
    %c0_i32 = arith.constant 0 : i32
    %2 = arith.cmpi eq, %arg1, %c0_i32 : i32
    %3 = arith.extui %2 : i1 to i32
    %c0_i32_2 = arith.constant 0 : i32
    %4 = arith.cmpi ne, %3, %c0_i32_2 : i32
    scf.if %4 {
      %cst_14 = arith.constant 0.000000e+00 : f32
      %18 = vector.broadcast %cst_14 : f32 to vector<16x1xf32>
      %c0_15 = arith.constant 0 : index
      %c0_16 = arith.constant 0 : index
      %19 = vector.load %arg8[%c0_15, %c0_16] : memref<16x1xf32, #tpu.memory_space<vmem>>, vector<16x1xf32>
      tpu.vector_store %arg8[%c0_15, %c0_16], %18 {strides = array<i32>} : memref<16x1xf32, #tpu.memory_space<vmem>>, vector<16x1xf32>,
      %cst_17 = arith.constant 0xFF800000 : f32
      %20 = vector.broadcast %cst_17 : f32 to vector<16x1xf32>
      %c0_18 = arith.constant 0 : index
      %c0_19 = arith.constant 0 : index
      %21 = vector.load %arg9[%c0_18, %c0_19] : memref<16x1xf32, #tpu.memory_space<vmem>>, vector<16x1xf32>
      tpu.vector_store %arg9[%c0_18, %c0_19], %20 {strides = array<i32>} : memref<16x1xf32, #tpu.memory_space<vmem>>, vector<16x1xf32>,
    } else {
    }
    %c0_3 = arith.constant 0 : index
    %c0_4 = arith.constant 0 : index
    %5 = vector.load %arg8[%c0_3, %c0_4] : memref<16x1xf32, #tpu.memory_space<vmem>>, vector<16x1xf32>
    %cst = arith.constant dense<0.000000e+00> : vector<16xf32>
    %6 = vector.multi_reduction <add>, %1, %cst [1] : vector<16x64xf32> to vector<16xf32>
    %7 = vector.shape_cast %6 : vector<16xf32> to vector<16x1xf32>
    %8 = arith.addf %5, %7 : vector<16x1xf32>
    %c0_5 = arith.constant 0 : index
    %c0_6 = arith.constant 0 : index
    %9 = vector.load %arg8[%c0_5, %c0_6] : memref<16x1xf32, #tpu.memory_space<vmem>>, vector<16x1xf32>
    tpu.vector_store %arg8[%c0_5, %c0_6], %8 {strides = array<i32>} : memref<16x1xf32, #tpu.memory_space<vmem>>, vector<16x1xf32>,
    %c0_7 = arith.constant 0 : index
    %c0_8 = arith.constant 0 : index
    %10 = vector.load %arg9[%c0_7, %c0_8] : memref<16x1xf32, #tpu.memory_space<vmem>>, vector<16x1xf32>
    %cst_9 = arith.constant dense<0xFF800000> : vector<16xf32>
    %11 = vector.multi_reduction <maximumf>, %1, %cst_9 [1] : vector<16x64xf32> to vector<16xf32>
    %12 = vector.shape_cast %11 : vector<16xf32> to vector<16x1xf32>
    %13 = arith.maximumf %10, %12 : vector<16x1xf32>
    %c0_10 = arith.constant 0 : index
    %c0_11 = arith.constant 0 : index
    %14 = vector.load %arg9[%c0_10, %c0_11] : memref<16x1xf32, #tpu.memory_space<vmem>>, vector<16x1xf32>
    tpu.vector_store %arg9[%c0_10, %c0_11], %13 {strides = array<i32>} : memref<16x1xf32, #tpu.memory_space<vmem>>, vector<16x1xf32>,
    %c0_i32_12 = arith.constant 0 : i32
    %15 = arith.cmpi eq, %arg1, %c0_i32_12 : i32
    %16 = arith.extui %15 : i1 to i32
    %c0_i32_13 = arith.constant 0 : i32
    %17 = arith.cmpi ne, %16, %c0_i32_13 : i32
    scf.if %17 {
      %c0_14 = arith.constant 0 : index
      %c0_15 = arith.constant 0 : index
      %18 = vector.load %arg8[%c0_14, %c0_15] : memref<16x1xf32, #tpu.memory_space<vmem>>, vector<16x1xf32>
      %cst_16 = arith.constant 1.562500e-02 : f32
      %19 = vector.broadcast %cst_16 : f32 to vector<16x1xf32>
      %20 = arith.mulf %18, %19 : vector<16x1xf32>
      %c0_17 = arith.constant 0 : index
      %c0_18 = arith.constant 0 : index
      %21 = vector.load %arg9[%c0_17, %c0_18] : memref<16x1xf32, #tpu.memory_space<vmem>>, vector<16x1xf32>
      %22 = tpu.iota {dimensions = array<i32: 1>} : vector<16x2xi32>
      %c0_i32_19 = arith.constant 0 : i32
      %23 = vector.broadcast %c0_i32_19 : i32 to vector<16x2xi32>
      %24 = arith.cmpi eq, %22, %23 : vector<16x2xi32>
      %25 = vector.shape_cast %20 : vector<16x1xf32> to vector<16x1xf32>
      %26 = vector.broadcast %25 : vector<16x1xf32> to vector<16x2xf32>
      %27 = vector.shape_cast %21 : vector<16x1xf32> to vector<16x1xf32>
      %28 = vector.broadcast %27 : vector<16x1xf32> to vector<16x2xf32>
      %29 = arith.select %24, %26, %28 : vector<16x2xi1>, vector<16x2xf32>
      %c0_20 = arith.constant 0 : index
      %c0_21 = arith.constant 0 : index
      %30 = vector.load %arg3[%c0_20, %c0_21] : memref<4x16xf32, #tpu.memory_space<vmem>>, vector<4x16xf32>
      %cst_22 = arith.constant dense<0.000000e+00> : vector<4x2xf32>
      %31 = tpu.matmul %30, %29, %cst_22 {dimension_numbers = #tpu.dot_dimension_numbers<[1], [0], [0], [1], [0, 0, 1, 1], [], []>} : vector<4x16xf32>, vector<16x2xf32>, vector<4x2xf32> -> vector<4x2xf32>
      %c0_23 = arith.constant 0 : index
      %c0_24 = arith.constant 0 : index
      %32 = vector.load %arg4[%c0_23, %c0_24] : memref<4x1xf32, #tpu.memory_space<vmem>>, vector<4x1xf32>
      %33 = vector.broadcast %32 : vector<4x1xf32> to vector<4x2xf32>
      %34 = arith.addf %31, %33 : vector<4x2xf32>
      %cst_25 = arith.constant 0.000000e+00 : f32
      %35 = vector.broadcast %cst_25 : f32 to vector<4x2xf32>
      %36 = arith.maximumf %34, %35 : vector<4x2xf32>
      %c0_26 = arith.constant 0 : index
      %c0_27 = arith.constant 0 : index
      %37 = vector.load %arg5[%c0_26, %c0_27] : memref<16x4xf32, #tpu.memory_space<vmem>>, vector<16x4xf32>
      %cst_28 = arith.constant dense<0.000000e+00> : vector<16x2xf32>
      %38 = tpu.matmul %37, %36, %cst_28 {dimension_numbers = #tpu.dot_dimension_numbers<[1], [0], [0], [1], [0, 0, 1, 1], [], []>} : vector<16x4xf32>, vector<4x2xf32>, vector<16x2xf32> -> vector<16x2xf32>
      %c0_29 = arith.constant 0 : index
      %c0_30 = arith.constant 0 : index
      %39 = vector.load %arg6[%c0_29, %c0_30] : memref<16x1xf32, #tpu.memory_space<vmem>>, vector<16x1xf32>
      %40 = vector.broadcast %39 : vector<16x1xf32> to vector<16x2xf32>
      %41 = arith.addf %38, %40 : vector<16x2xf32>
      %cst_31 = arith.constant dense<0.000000e+00> : vector<16xf32>
      %42 = vector.multi_reduction <add>, %41, %cst_31 [1] : vector<16x2xf32> to vector<16xf32>
      %43 = vector.shape_cast %42 : vector<16xf32> to vector<16x1xf32>
      %cst_32 = arith.constant 3.000000e+00 : f32
      %44 = vector.broadcast %cst_32 : f32 to vector<16x1xf32>
      %45 = arith.addf %43, %44 : vector<16x1xf32>
      %cst_33 = arith.constant 0.000000e+00 : f32
      %cst_34 = arith.constant 6.000000e+00 : f32
      %46 = vector.broadcast %cst_33 : f32 to vector<16x1xf32>
      %47 = arith.maximumf %46, %45 : vector<16x1xf32>
      %48 = vector.broadcast %cst_34 : f32 to vector<16x1xf32>
      %49 = arith.minimumf %48, %47 : vector<16x1xf32>
      %cst_35 = arith.constant 0.166666672 : f32
      %50 = vector.broadcast %cst_35 : f32 to vector<16x1xf32>
      %51 = arith.mulf %49, %50 : vector<16x1xf32>
      %c0_36 = arith.constant 0 : index
      %c0_37 = arith.constant 0 : index
      %c0_38 = arith.constant 0 : index
      %52 = vector.load %arg7[%c0_36, %c0_37, %c0_38] : memref<1x16x1xf32, #tpu.memory_space<vmem>>, vector<1x16x1xf32>
      %53 = vector.shape_cast %52 : vector<1x16x1xf32> to vector<16x1xf32>
      %54 = vector.shape_cast %51 : vector<16x1xf32> to vector<1x16x1xf32>
      tpu.vector_store %arg7[%c0_36, %c0_37, %c0_38], %54 {strides = array<i32>} : memref<1x16x1xf32, #tpu.memory_space<vmem>>, vector<1x16x1xf32>,
    } else {
    }
    return
  }
  func.func @transform_0(%arg0: i32, %arg1: i32) -> (i32, i32, i32) {
    %c0_i32 = arith.constant 0 : i32
    %c0_i32_0 = arith.constant 0 : i32
    return %arg0, %c0_i32, %arg1 : i32, i32, i32
  }
  func.func @transform_1(%arg0: i32, %arg1: i32) -> (i32, i32) {
    %c0_i32 = arith.constant 0 : i32
    %c0_i32_0 = arith.constant 0 : i32
    %c0_i32_1 = arith.constant 0 : i32
    return %c0_i32, %c0_i32_0 : i32, i32
  }
  func.func @transform_2(%arg0: i32, %arg1: i32) -> (i32, i32) {
    %c0_i32 = arith.constant 0 : i32
    %c0_i32_0 = arith.constant 0 : i32
    %c0_i32_1 = arith.constant 0 : i32
    return %c0_i32, %c0_i32_0 : i32, i32
  }
  func.func @transform_3(%arg0: i32, %arg1: i32) -> (i32, i32) {
    %c0_i32 = arith.constant 0 : i32
    %c0_i32_0 = arith.constant 0 : i32
    %c0_i32_1 = arith.constant 0 : i32
    return %c0_i32, %c0_i32_0 : i32, i32
  }
  func.func @transform_4(%arg0: i32, %arg1: i32) -> (i32, i32) {
    %c0_i32 = arith.constant 0 : i32
    %c0_i32_0 = arith.constant 0 : i32
    %c0_i32_1 = arith.constant 0 : i32
    return %c0_i32, %c0_i32_0 : i32, i32
  }
  func.func @transform_5(%arg0: i32, %arg1: i32) -> (i32, i32, i32) {
    %c0_i32 = arith.constant 0 : i32
    %c0_i32_0 = arith.constant 0 : i32
    %c0_i32_1 = arith.constant 0 : i32
    return %arg0, %c0_i32, %c0_i32_0 : i32, i32, i32
  }
}

module attributes {stable_mosaic.version = 11 : i64} {
  func.func @pool_att_kernel(%arg0: i32, %arg1: i32, %arg2: memref<1x16x256xf32, #tpu.memory_space<vmem>>, %arg3: memref<4x16xf32, #tpu.memory_space<vmem>>, %arg4: memref<4x1xf32, #tpu.memory_space<vmem>>, %arg5: memref<16x4xf32, #tpu.memory_space<vmem>>, %arg6: memref<16x1xf32, #tpu.memory_space<vmem>>, %arg7: memref<1x16x1xf32, #tpu.memory_space<vmem>>, %arg8: memref<16x1xf32, #tpu.memory_space<vmem>>, %arg9: memref<16x1xf32, #tpu.memory_space<vmem>>) attributes {dimension_semantics = [#tpu.dimension_semantics<parallel>, #tpu.dimension_semantics<arbitrary>], iteration_bounds = array<i64: 2, 1>, scalar_prefetch = 0 : i64, scratch_operands = 2 : i64, tpu.core_type = #tpu.core_type<tc>, window_params = [{transform_indices = @transform_0, window_bounds = array<i64: 1, 16, 256>}, {pipeline_mode = #tpu.pipeline_mode<synchronous>, transform_indices = @transform_1, window_bounds = array<i64: 4, 16>}, {pipeline_mode = #tpu.pipeline_mode<synchronous>, transform_indices = @transform_2, window_bounds = array<i64: 4, 1>}, {pipeline_mode = #tpu.pipeline_mode<synchronous>, transform_indices = @transform_3, window_bounds = array<i64: 16, 4>}, {pipeline_mode = #tpu.pipeline_mode<synchronous>, transform_indices = @transform_4, window_bounds = array<i64: 16, 1>}, {transform_indices = @transform_5, window_bounds = array<i64: 1, 16, 1>}]} {
    %c0 = arith.constant 0 : index
    %c0_0 = arith.constant 0 : index
    %c0_1 = arith.constant 0 : index
    %0 = vector.load %arg2[%c0, %c0_0, %c0_1] : memref<1x16x256xf32, #tpu.memory_space<vmem>>, vector<1x16x256xf32>
    %1 = vector.shape_cast %0 : vector<1x16x256xf32> to vector<16x256xf32>
    %c0_i32 = arith.constant 0 : i32
    %2 = arith.cmpi eq, %arg1, %c0_i32 : i32
    %3 = arith.extui %2 : i1 to i32
    %c0_i32_2 = arith.constant 0 : i32
    %4 = arith.cmpi ne, %3, %c0_i32_2 : i32
    scf.if %4 {
      %cst_14 = arith.constant 0.000000e+00 : f32
      %18 = vector.broadcast %cst_14 : f32 to vector<16x1xf32>
      %c0_15 = arith.constant 0 : index
      %c0_16 = arith.constant 0 : index
      %19 = vector.load %arg8[%c0_15, %c0_16] : memref<16x1xf32, #tpu.memory_space<vmem>>, vector<16x1xf32>
      tpu.vector_store %arg8[%c0_15, %c0_16], %18 {strides = array<i32>} : memref<16x1xf32, #tpu.memory_space<vmem>>, vector<16x1xf32>,
      %cst_17 = arith.constant 0xFF800000 : f32
      %20 = vector.broadcast %cst_17 : f32 to vector<16x1xf32>
      %c0_18 = arith.constant 0 : index
      %c0_19 = arith.constant 0 : index
      %21 = vector.load %arg9[%c0_18, %c0_19] : memref<16x1xf32, #tpu.memory_space<vmem>>, vector<16x1xf32>
      tpu.vector_store %arg9[%c0_18, %c0_19], %20 {strides = array<i32>} : memref<16x1xf32, #tpu.memory_space<vmem>>, vector<16x1xf32>,
    } else {
    }
    %c0_3 = arith.constant 0 : index
    %c0_4 = arith.constant 0 : index
    %5 = vector.load %arg8[%c0_3, %c0_4] : memref<16x1xf32, #tpu.memory_space<vmem>>, vector<16x1xf32>
    %cst = arith.constant dense<0.000000e+00> : vector<16xf32>
    %6 = vector.multi_reduction <add>, %1, %cst [1] : vector<16x256xf32> to vector<16xf32>
    %7 = vector.shape_cast %6 : vector<16xf32> to vector<16x1xf32>
    %8 = arith.addf %5, %7 : vector<16x1xf32>
    %c0_5 = arith.constant 0 : index
    %c0_6 = arith.constant 0 : index
    %9 = vector.load %arg8[%c0_5, %c0_6] : memref<16x1xf32, #tpu.memory_space<vmem>>, vector<16x1xf32>
    tpu.vector_store %arg8[%c0_5, %c0_6], %8 {strides = array<i32>} : memref<16x1xf32, #tpu.memory_space<vmem>>, vector<16x1xf32>,
    %c0_7 = arith.constant 0 : index
    %c0_8 = arith.constant 0 : index
    %10 = vector.load %arg9[%c0_7, %c0_8] : memref<16x1xf32, #tpu.memory_space<vmem>>, vector<16x1xf32>
    %cst_9 = arith.constant dense<0xFF800000> : vector<16xf32>
    %11 = vector.multi_reduction <maximumf>, %1, %cst_9 [1] : vector<16x256xf32> to vector<16xf32>
    %12 = vector.shape_cast %11 : vector<16xf32> to vector<16x1xf32>
    %13 = arith.maximumf %10, %12 : vector<16x1xf32>
    %c0_10 = arith.constant 0 : index
    %c0_11 = arith.constant 0 : index
    %14 = vector.load %arg9[%c0_10, %c0_11] : memref<16x1xf32, #tpu.memory_space<vmem>>, vector<16x1xf32>
    tpu.vector_store %arg9[%c0_10, %c0_11], %13 {strides = array<i32>} : memref<16x1xf32, #tpu.memory_space<vmem>>, vector<16x1xf32>,
    %c0_i32_12 = arith.constant 0 : i32
    %15 = arith.cmpi eq, %arg1, %c0_i32_12 : i32
    %16 = arith.extui %15 : i1 to i32
    %c0_i32_13 = arith.constant 0 : i32
    %17 = arith.cmpi ne, %16, %c0_i32_13 : i32
    scf.if %17 {
      %c0_14 = arith.constant 0 : index
      %c0_15 = arith.constant 0 : index
      %18 = vector.load %arg8[%c0_14, %c0_15] : memref<16x1xf32, #tpu.memory_space<vmem>>, vector<16x1xf32>
      %cst_16 = arith.constant 3.906250e-03 : f32
      %19 = vector.broadcast %cst_16 : f32 to vector<16x1xf32>
      %20 = arith.mulf %18, %19 : vector<16x1xf32>
      %c0_17 = arith.constant 0 : index
      %c0_18 = arith.constant 0 : index
      %21 = vector.load %arg9[%c0_17, %c0_18] : memref<16x1xf32, #tpu.memory_space<vmem>>, vector<16x1xf32>
      %22 = tpu.iota {dimensions = array<i32: 1>} : vector<16x2xi32>
      %c0_i32_19 = arith.constant 0 : i32
      %23 = vector.broadcast %c0_i32_19 : i32 to vector<16x2xi32>
      %24 = arith.cmpi eq, %22, %23 : vector<16x2xi32>
      %25 = vector.shape_cast %20 : vector<16x1xf32> to vector<16x1xf32>
      %26 = vector.broadcast %25 : vector<16x1xf32> to vector<16x2xf32>
      %27 = vector.shape_cast %21 : vector<16x1xf32> to vector<16x1xf32>
      %28 = vector.broadcast %27 : vector<16x1xf32> to vector<16x2xf32>
      %29 = arith.select %24, %26, %28 : vector<16x2xi1>, vector<16x2xf32>
      %c0_20 = arith.constant 0 : index
      %c0_21 = arith.constant 0 : index
      %30 = vector.load %arg3[%c0_20, %c0_21] : memref<4x16xf32, #tpu.memory_space<vmem>>, vector<4x16xf32>
      %cst_22 = arith.constant dense<0.000000e+00> : vector<4x2xf32>
      %31 = tpu.matmul %30, %29, %cst_22 {dimension_numbers = #tpu.dot_dimension_numbers<[1], [0], [0], [1], [0, 0, 1, 1], [], []>} : vector<4x16xf32>, vector<16x2xf32>, vector<4x2xf32> -> vector<4x2xf32>
      %c0_23 = arith.constant 0 : index
      %c0_24 = arith.constant 0 : index
      %32 = vector.load %arg4[%c0_23, %c0_24] : memref<4x1xf32, #tpu.memory_space<vmem>>, vector<4x1xf32>
      %33 = vector.broadcast %32 : vector<4x1xf32> to vector<4x2xf32>
      %34 = arith.addf %31, %33 : vector<4x2xf32>
      %cst_25 = arith.constant 0.000000e+00 : f32
      %35 = vector.broadcast %cst_25 : f32 to vector<4x2xf32>
      %36 = arith.maximumf %34, %35 : vector<4x2xf32>
      %c0_26 = arith.constant 0 : index
      %c0_27 = arith.constant 0 : index
      %37 = vector.load %arg5[%c0_26, %c0_27] : memref<16x4xf32, #tpu.memory_space<vmem>>, vector<16x4xf32>
      %cst_28 = arith.constant dense<0.000000e+00> : vector<16x2xf32>
      %38 = tpu.matmul %37, %36, %cst_28 {dimension_numbers = #tpu.dot_dimension_numbers<[1], [0], [0], [1], [0, 0, 1, 1], [], []>} : vector<16x4xf32>, vector<4x2xf32>, vector<16x2xf32> -> vector<16x2xf32>
      %c0_29 = arith.constant 0 : index
      %c0_30 = arith.constant 0 : index
      %39 = vector.load %arg6[%c0_29, %c0_30] : memref<16x1xf32, #tpu.memory_space<vmem>>, vector<16x1xf32>
      %40 = vector.broadcast %39 : vector<16x1xf32> to vector<16x2xf32>
      %41 = arith.addf %38, %40 : vector<16x2xf32>
      %cst_31 = arith.constant dense<0.000000e+00> : vector<16xf32>
      %42 = vector.multi_reduction <add>, %41, %cst_31 [1] : vector<16x2xf32> to vector<16xf32>
      %43 = vector.shape_cast %42 : vector<16xf32> to vector<16x1xf32>
      %cst_32 = arith.constant 3.000000e+00 : f32
      %44 = vector.broadcast %cst_32 : f32 to vector<16x1xf32>
      %45 = arith.addf %43, %44 : vector<16x1xf32>
      %cst_33 = arith.constant 0.000000e+00 : f32
      %cst_34 = arith.constant 6.000000e+00 : f32
      %46 = vector.broadcast %cst_33 : f32 to vector<16x1xf32>
      %47 = arith.maximumf %46, %45 : vector<16x1xf32>
      %48 = vector.broadcast %cst_34 : f32 to vector<16x1xf32>
      %49 = arith.minimumf %48, %47 : vector<16x1xf32>
      %cst_35 = arith.constant 0.166666672 : f32
      %50 = vector.broadcast %cst_35 : f32 to vector<16x1xf32>
      %51 = arith.mulf %49, %50 : vector<16x1xf32>
      %c0_36 = arith.constant 0 : index
      %c0_37 = arith.constant 0 : index
      %c0_38 = arith.constant 0 : index
      %52 = vector.load %arg7[%c0_36, %c0_37, %c0_38] : memref<1x16x1xf32, #tpu.memory_space<vmem>>, vector<1x16x1xf32>
      %53 = vector.shape_cast %52 : vector<1x16x1xf32> to vector<16x1xf32>
      %54 = vector.shape_cast %51 : vector<16x1xf32> to vector<1x16x1xf32>
      tpu.vector_store %arg7[%c0_36, %c0_37, %c0_38], %54 {strides = array<i32>} : memref<1x16x1xf32, #tpu.memory_space<vmem>>, vector<1x16x1xf32>,
    } else {
    }
    return
  }
  func.func @transform_0(%arg0: i32, %arg1: i32) -> (i32, i32, i32) {
    %c0_i32 = arith.constant 0 : i32
    %c0_i32_0 = arith.constant 0 : i32
    return %arg0, %c0_i32, %arg1 : i32, i32, i32
  }
  func.func @transform_1(%arg0: i32, %arg1: i32) -> (i32, i32) {
    %c0_i32 = arith.constant 0 : i32
    %c0_i32_0 = arith.constant 0 : i32
    %c0_i32_1 = arith.constant 0 : i32
    return %c0_i32, %c0_i32_0 : i32, i32
  }
  func.func @transform_2(%arg0: i32, %arg1: i32) -> (i32, i32) {
    %c0_i32 = arith.constant 0 : i32
    %c0_i32_0 = arith.constant 0 : i32
    %c0_i32_1 = arith.constant 0 : i32
    return %c0_i32, %c0_i32_0 : i32, i32
  }
  func.func @transform_3(%arg0: i32, %arg1: i32) -> (i32, i32) {
    %c0_i32 = arith.constant 0 : i32
    %c0_i32_0 = arith.constant 0 : i32
    %c0_i32_1 = arith.constant 0 : i32
    return %c0_i32, %c0_i32_0 : i32, i32
  }
  func.func @transform_4(%arg0: i32, %arg1: i32) -> (i32, i32) {
    %c0_i32 = arith.constant 0 : i32
    %c0_i32_0 = arith.constant 0 : i32
    %c0_i32_1 = arith.constant 0 : i32
    return %c0_i32, %c0_i32_0 : i32, i32
  }
  func.func @transform_5(%arg0: i32, %arg1: i32) -> (i32, i32, i32) {
    %c0_i32 = arith.constant 0 : i32
    %c0_i32_0 = arith.constant 0 : i32
    %c0_i32_1 = arith.constant 0 : i32
    return %arg0, %c0_i32, %c0_i32_0 : i32, i32, i32
  }
}

module attributes {stable_mosaic.version = 11 : i64} {
  func.func @fused_merge_kernel(%arg0: i32, %arg1: i32, %arg2: memref<1x16x16x16xf32, #tpu.memory_space<vmem>>, %arg3: memref<1x16x8x8xf32, #tpu.memory_space<vmem>>, %arg4: memref<1x16x3x3xf32, #tpu.memory_space<vmem>>, %arg5: memref<1x16x1x1xf32, #tpu.memory_space<vmem>>, %arg6: memref<1x16x1x1xf32, #tpu.memory_space<vmem>>, %arg7: memref<1x16x1x1xf32, #tpu.memory_space<vmem>>, %arg8: memref<8x16xbf16, #tpu.memory_space<vmem>>, %arg9: memref<16x8xbf16, #tpu.memory_space<vmem>>, %arg10: memref<3x16xbf16, #tpu.memory_space<vmem>>, %arg11: memref<16x3xbf16, #tpu.memory_space<vmem>>, %arg12: memref<1x16x16x16xf32, #tpu.memory_space<vmem>>) attributes {dimension_semantics = [#tpu.dimension_semantics<parallel>, #tpu.dimension_semantics<parallel>], iteration_bounds = array<i64: 2, 1>, scalar_prefetch = 0 : i64, scratch_operands = 0 : i64, tpu.core_type = #tpu.core_type<tc>, window_params = [{transform_indices = @transform_0, window_bounds = array<i64: 1, 16, 16, 16>}, {transform_indices = @transform_1, window_bounds = array<i64: 1, 16, 8, 8>}, {transform_indices = @transform_2, window_bounds = array<i64: 1, 16, 3, 3>}, {transform_indices = @transform_3, window_bounds = array<i64: 1, 16, 1, 1>}, {transform_indices = @transform_4, window_bounds = array<i64: 1, 16, 1, 1>}, {transform_indices = @transform_5, window_bounds = array<i64: 1, 16, 1, 1>}, {pipeline_mode = #tpu.pipeline_mode<synchronous>, transform_indices = @transform_6, window_bounds = array<i64: 8, 16>}, {pipeline_mode = #tpu.pipeline_mode<synchronous>, transform_indices = @transform_7, window_bounds = array<i64: 16, 8>}, {pipeline_mode = #tpu.pipeline_mode<synchronous>, transform_indices = @transform_8, window_bounds = array<i64: 3, 16>}, {pipeline_mode = #tpu.pipeline_mode<synchronous>, transform_indices = @transform_9, window_bounds = array<i64: 16, 3>}, {transform_indices = @transform_10, window_bounds = array<i64: 1, 16, 16, 16>}]} {
    %c0 = arith.constant 0 : index
    %c0_0 = arith.constant 0 : index
    %c0_1 = arith.constant 0 : index
    %c0_2 = arith.constant 0 : index
    %0 = vector.load %arg2[%c0, %c0_0, %c0_1, %c0_2] : memref<1x16x16x16xf32, #tpu.memory_space<vmem>>, vector<1x16x16x16xf32>
    %1 = vector.shape_cast %0 : vector<1x16x16x16xf32> to vector<16x16x16xf32>
    %c0_3 = arith.constant 0 : index
    %c0_4 = arith.constant 0 : index
    %c0_5 = arith.constant 0 : index
    %c0_6 = arith.constant 0 : index
    %2 = vector.load %arg5[%c0_3, %c0_4, %c0_5, %c0_6] : memref<1x16x1x1xf32, #tpu.memory_space<vmem>>, vector<1x16x1x1xf32>
    %3 = vector.shape_cast %2 : vector<1x16x1x1xf32> to vector<16x1x1xf32>
    %4 = vector.broadcast %3 : vector<16x1x1xf32> to vector<16x16x16xf32>
    %5 = arith.mulf %1, %4 : vector<16x16x16xf32>
    %c0_7 = arith.constant 0 : index
    %c0_8 = arith.constant 0 : index
    %c0_9 = arith.constant 0 : index
    %c0_10 = arith.constant 0 : index
    %6 = vector.load %arg3[%c0_7, %c0_8, %c0_9, %c0_10] : memref<1x16x8x8xf32, #tpu.memory_space<vmem>>, vector<1x16x8x8xf32>
    %7 = vector.shape_cast %6 : vector<1x16x8x8xf32> to vector<16x8x8xf32>
    %c0_11 = arith.constant 0 : index
    %c0_12 = arith.constant 0 : index
    %c0_13 = arith.constant 0 : index
    %c0_14 = arith.constant 0 : index
    %8 = vector.load %arg6[%c0_11, %c0_12, %c0_13, %c0_14] : memref<1x16x1x1xf32, #tpu.memory_space<vmem>>, vector<1x16x1x1xf32>
    %9 = vector.shape_cast %8 : vector<1x16x1x1xf32> to vector<16x1x1xf32>
    %10 = vector.broadcast %9 : vector<16x1x1xf32> to vector<16x8x8xf32>
    %11 = arith.mulf %7, %10 : vector<16x8x8xf32>
    %c0_15 = arith.constant 0 : index
    %c0_16 = arith.constant 0 : index
    %12 = vector.load %arg8[%c0_15, %c0_16] : memref<8x16xbf16, #tpu.memory_space<vmem>>, vector<8x16xbf16>
    %13 = vector.shape_cast %12 : vector<8x16xbf16> to vector<1x8x16xbf16>
    %14 = vector.broadcast %13 : vector<1x8x16xbf16> to vector<16x8x16xbf16>
    %15 = arith.truncf %11 : vector<16x8x8xf32> to vector<16x8x8xbf16>
    %cst = arith.constant dense<0.000000e+00> : vector<16x8x16xf32>
    %16 = tpu.matmul %15, %14, %cst {dimension_numbers = #tpu.dot_dimension_numbers<[2], [1], [1], [2], [0, 0, 0, 1, 1, 2], [0], [0]>} : vector<16x8x8xbf16>, vector<16x8x16xbf16>, vector<16x8x16xf32> -> vector<16x8x16xf32>
    %c0_17 = arith.constant 0 : index
    %c0_18 = arith.constant 0 : index
    %17 = vector.load %arg9[%c0_17, %c0_18] : memref<16x8xbf16, #tpu.memory_space<vmem>>, vector<16x8xbf16>
    %18 = vector.shape_cast %17 : vector<16x8xbf16> to vector<1x16x8xbf16>
    %19 = vector.broadcast %18 : vector<1x16x8xbf16> to vector<16x16x8xbf16>
    %20 = arith.truncf %16 : vector<16x8x16xf32> to vector<16x8x16xbf16>
    %cst_19 = arith.constant dense<0.000000e+00> : vector<16x16x16xf32>
    %21 = tpu.matmul %19, %20, %cst_19 {dimension_numbers = #tpu.dot_dimension_numbers<[2], [1], [1], [2], [0, 0, 0, 1, 1, 2], [0], [0]>} : vector<16x16x8xbf16>, vector<16x8x16xbf16>, vector<16x16x16xf32> -> vector<16x16x16xf32>
    %22 = arith.addf %5, %21 : vector<16x16x16xf32>
    %c0_20 = arith.constant 0 : index
    %c0_21 = arith.constant 0 : index
    %c0_22 = arith.constant 0 : index
    %c0_23 = arith.constant 0 : index
    %23 = vector.load %arg4[%c0_20, %c0_21, %c0_22, %c0_23] : memref<1x16x3x3xf32, #tpu.memory_space<vmem>>, vector<1x16x3x3xf32>
    %24 = vector.shape_cast %23 : vector<1x16x3x3xf32> to vector<16x3x3xf32>
    %c0_24 = arith.constant 0 : index
    %c0_25 = arith.constant 0 : index
    %c0_26 = arith.constant 0 : index
    %c0_27 = arith.constant 0 : index
    %25 = vector.load %arg7[%c0_24, %c0_25, %c0_26, %c0_27] : memref<1x16x1x1xf32, #tpu.memory_space<vmem>>, vector<1x16x1x1xf32>
    %26 = vector.shape_cast %25 : vector<1x16x1x1xf32> to vector<16x1x1xf32>
    %27 = vector.broadcast %26 : vector<16x1x1xf32> to vector<16x3x3xf32>
    %28 = arith.mulf %24, %27 : vector<16x3x3xf32>
    %c0_28 = arith.constant 0 : index
    %c0_29 = arith.constant 0 : index
    %29 = vector.load %arg10[%c0_28, %c0_29] : memref<3x16xbf16, #tpu.memory_space<vmem>>, vector<3x16xbf16>
    %30 = vector.shape_cast %29 : vector<3x16xbf16> to vector<1x3x16xbf16>
    %31 = vector.broadcast %30 : vector<1x3x16xbf16> to vector<16x3x16xbf16>
    %32 = arith.truncf %28 : vector<16x3x3xf32> to vector<16x3x3xbf16>
    %cst_30 = arith.constant dense<0.000000e+00> : vector<16x3x16xf32>
    %33 = tpu.matmul %32, %31, %cst_30 {dimension_numbers = #tpu.dot_dimension_numbers<[2], [1], [1], [2], [0, 0, 0, 1, 1, 2], [0], [0]>} : vector<16x3x3xbf16>, vector<16x3x16xbf16>, vector<16x3x16xf32> -> vector<16x3x16xf32>
    %c0_31 = arith.constant 0 : index
    %c0_32 = arith.constant 0 : index
    %34 = vector.load %arg11[%c0_31, %c0_32] : memref<16x3xbf16, #tpu.memory_space<vmem>>, vector<16x3xbf16>
    %35 = vector.shape_cast %34 : vector<16x3xbf16> to vector<1x16x3xbf16>
    %36 = vector.broadcast %35 : vector<1x16x3xbf16> to vector<16x16x3xbf16>
    %37 = arith.truncf %33 : vector<16x3x16xf32> to vector<16x3x16xbf16>
    %cst_33 = arith.constant dense<0.000000e+00> : vector<16x16x16xf32>
    %38 = tpu.matmul %36, %37, %cst_33 {dimension_numbers = #tpu.dot_dimension_numbers<[2], [1], [1], [2], [0, 0, 0, 1, 1, 2], [0], [0]>} : vector<16x16x3xbf16>, vector<16x3x16xbf16>, vector<16x16x16xf32> -> vector<16x16x16xf32>
    %39 = arith.addf %22, %38 : vector<16x16x16xf32>
    %c0_34 = arith.constant 0 : index
    %c0_35 = arith.constant 0 : index
    %c0_36 = arith.constant 0 : index
    %c0_37 = arith.constant 0 : index
    %40 = vector.load %arg12[%c0_34, %c0_35, %c0_36, %c0_37] : memref<1x16x16x16xf32, #tpu.memory_space<vmem>>, vector<1x16x16x16xf32>
    %41 = vector.shape_cast %40 : vector<1x16x16x16xf32> to vector<16x16x16xf32>
    %42 = vector.shape_cast %39 : vector<16x16x16xf32> to vector<1x16x16x16xf32>
    tpu.vector_store %arg12[%c0_34, %c0_35, %c0_36, %c0_37], %42 {strides = array<i32>} : memref<1x16x16x16xf32, #tpu.memory_space<vmem>>, vector<1x16x16x16xf32>,
    return
  }
  func.func @transform_0(%arg0: i32, %arg1: i32) -> (i32, i32, i32, i32) {
    %c0_i32 = arith.constant 0 : i32
    %c0_i32_0 = arith.constant 0 : i32
    %c0_i32_1 = arith.constant 0 : i32
    return %arg0, %arg1, %c0_i32, %c0_i32_0 : i32, i32, i32, i32
  }
  func.func @transform_1(%arg0: i32, %arg1: i32) -> (i32, i32, i32, i32) {
    %c0_i32 = arith.constant 0 : i32
    %c0_i32_0 = arith.constant 0 : i32
    %c0_i32_1 = arith.constant 0 : i32
    return %arg0, %arg1, %c0_i32, %c0_i32_0 : i32, i32, i32, i32
  }
  func.func @transform_2(%arg0: i32, %arg1: i32) -> (i32, i32, i32, i32) {
    %c0_i32 = arith.constant 0 : i32
    %c0_i32_0 = arith.constant 0 : i32
    %c0_i32_1 = arith.constant 0 : i32
    return %arg0, %arg1, %c0_i32, %c0_i32_0 : i32, i32, i32, i32
  }
  func.func @transform_3(%arg0: i32, %arg1: i32) -> (i32, i32, i32, i32) {
    %c0_i32 = arith.constant 0 : i32
    %c0_i32_0 = arith.constant 0 : i32
    %c0_i32_1 = arith.constant 0 : i32
    return %arg0, %arg1, %c0_i32, %c0_i32_0 : i32, i32, i32, i32
  }
  func.func @transform_4(%arg0: i32, %arg1: i32) -> (i32, i32, i32, i32) {
    %c0_i32 = arith.constant 0 : i32
    %c0_i32_0 = arith.constant 0 : i32
    %c0_i32_1 = arith.constant 0 : i32
    return %arg0, %arg1, %c0_i32, %c0_i32_0 : i32, i32, i32, i32
  }
  func.func @transform_5(%arg0: i32, %arg1: i32) -> (i32, i32, i32, i32) {
    %c0_i32 = arith.constant 0 : i32
    %c0_i32_0 = arith.constant 0 : i32
    %c0_i32_1 = arith.constant 0 : i32
    return %arg0, %arg1, %c0_i32, %c0_i32_0 : i32, i32, i32, i32
  }
  func.func @transform_6(%arg0: i32, %arg1: i32) -> (i32, i32) {
    %c0_i32 = arith.constant 0 : i32
    %c0_i32_0 = arith.constant 0 : i32
    %c0_i32_1 = arith.constant 0 : i32
    return %c0_i32, %c0_i32_0 : i32, i32
  }
  func.func @transform_7(%arg0: i32, %arg1: i32) -> (i32, i32) {
    %c0_i32 = arith.constant 0 : i32
    %c0_i32_0 = arith.constant 0 : i32
    %c0_i32_1 = arith.constant 0 : i32
    return %c0_i32, %c0_i32_0 : i32, i32
  }
  func.func @transform_8(%arg0: i32, %arg1: i32) -> (i32, i32) {
    %c0_i32 = arith.constant 0 : i32
    %c0_i32_0 = arith.constant 0 : i32
    %c0_i32_1 = arith.constant 0 : i32
    return %c0_i32, %c0_i32_0 : i32, i32
  }
  func.func @transform_9(%arg0: i32, %arg1: i32) -> (i32, i32) {
    %c0_i32 = arith.constant 0 : i32
    %c0_i32_0 = arith.constant 0 : i32
    %c0_i32_1 = arith.constant 0 : i32
    return %c0_i32, %c0_i32_0 : i32, i32
  }
  func.func @transform_10(%arg0: i32, %arg1: i32) -> (i32, i32, i32, i32) {
    %c0_i32 = arith.constant 0 : i32
    %c0_i32_0 = arith.constant 0 : i32
    %c0_i32_1 = arith.constant 0 : i32
    return %arg0, %arg1, %c0_i32, %c0_i32_0 : i32, i32, i32, i32
  }
}

</mosaic_0001>

<bundles_post_ra>
// kernel: sent_forward.8
= control target key start
LH: loop header
LB: loop body
LE: loop exit
PB: predicated region body
PF: predicated region fallthrough
CT: control target
= control target key end

     0   :  { %s536_s12 = smov 0   ;;  %s538_s13 = smov 0   ;;  %s585_s0 = inlined_call_operand.vmem [shape: bf16[2,144,64], index: 0, kind: input, shape index: {}]   ;;  %s586_s1 = inlined_call_operand.vmem [shape: bf16[16,144], index: 1, kind: input, shape index: {}]   ;;  %s587_s2 = inlined_call_operand.vmem [shape: f32[16,1], index: 2, kind: input, shape index: {}]   ;;  %s588_s3 = inlined_call_operand.vmem [shape: f32[2,16,64], index: 3, kind: output, shape index: {}]  }
   0x1   :  { %s540_s14 = smov 0  }
   0x2 LB: > { %s25_s15 = sadd.s32 1, %s509_s13  ;;  %p433_p0 = scmp.ge.s32.totalorder %s513_s14, 1  ;;  %s513_s14 = sphi %s540_s14, %s13_s14   ;;  %s509_s13 = sphi %s538_s13, %s590_s13   ;;  %s505_s12 = sphi %s536_s12, %s589_s12  }
   0x3   : > { %p27_p1 = scmp.ge.s32.totalorder %s25_s15, 2  ;;  %p156_p2 = scmp.lt.s32.totalorder %s513_s14, 3 }
   0x5   : > { %s592_s15 = smov (%p27_p1, %s25_s15), 0  ;;  %p157_p3 = pnand %p433_p0, %p156_p2 }
   0x6   : > { %p186_p4 = scmp.lt.s32.totalorder (!%p157_p3), %s505_s12, 1  ;;  %v515_v0 = vmov (!%p157_p3), 0   ;;  %v490_v1 = vld [vmem:[%s586_s1 + $0x4] ss:$8 sps:$4 sm:$0xff] (!%p157_p3)   ;;  %vm298_vm0 = vcmask (!%p157_p3), 130048   ;;  %vm343_vm1 = vcmask (!%p157_p3), 523264  }
   0x7   : > { %160 = sbr.rel (%p157_p3) target bundleno = 271 (0x10f), region = 32  ;;  %302 = vmatprep.subr.bf16.mxu0 (!%p157_p3), %v515_v0  ;;  %478 = vset.pattern.permute.xlu0 (!%p157_p3), %v515_v0  ;;  %v223_v2 = vld [vmem:[%s587_s2] sm:$0xff] (!%p157_p3)  ;;  %v224_v3 = vld [vmem:[%s587_s2 + $0x8] sm:$0xff] (!%p157_p3) }
   0x8   : > { %227 = vperm.xlu0 (!%p157_p3), %478, %v223_v2   ;;  %448 = vmatprep.mubr.msk.bf16.mxu0 (!%p157_p3), %vm298_vm0, %v490_v1  ;;  %v488_v13 = vld [vmem:[%s586_s1] ss:$8 sps:$4 sm:$0xff] (!%p157_p3)  }
   0xc   : > { %232 = vperm.xlu0 (!%p157_p3), %478, %v224_v3  }
   0xe   : > { %s594_s12 = smov (!%p186_p4, %s505_s12), 1 }
   0xf   : > { %s452_s22 = smul.u32 72, %s594_s12  ;;  %s451_s28 = sshll.u32 %s594_s12, 4 }
  0x10   : > { %s201_s4 = scalar_lea.vmem %s588_s3, %s451_s28 }
  0x11   : > { %s193_s25 = scalar_lea.vmem %s585_s0, %s452_s22 }
  0x12   : > { %v479_v4 = vld [vmem:[%s193_s25] sm:$0xff]   ;;  %v480_v5 = vld [vmem:[%s193_s25 + $0x8] sm:$0xff]   ;;  %v481_v6 = vld [vmem:[%s193_s25 + $0x10] sm:$0xff]  }
  0x13   : > { %303 = vmatpush1.bf16.msra.mxu0 %v479_v4  ;;  %v482_v7 = vld [vmem:[%s193_s25 + $0x18] sm:$0xff]   ;;  %v483_v8 = vld [vmem:[%s193_s25 + $0x20] sm:$0xff]   ;;  %v484_v9 = vld [vmem:[%s193_s25 + $0x28] sm:$0xff]  }
  0x14   : > { %304 = vmatprep.subr.bf16.mxu0 %v515_v0  ;;  %v485_v10 = vld [vmem:[%s193_s25 + $0x30] sm:$0xff]   ;;  %v486_v11 = vld [vmem:[%s193_s25 + $0x38] sm:$0xff]   ;;  %v487_v12 = vld [vmem:[%s193_s25 + $0x40] sm:$0xff]  }
  0x17   : > { %305 = vmatpush1.bf16.msra.mxu0 %v480_v5 }
  0x18   : > { %306 = vmatprep.subr.bf16.mxu0 %v515_v0 }
  0x1b   : > { %307 = vmatpush1.bf16.msra.mxu0 %v481_v6 }
  0x1c   : > { %308 = vmatprep.subr.bf16.mxu0 %v515_v0 }
  0x1f   : > { %309 = vmatpush1.bf16.msra.mxu0 %v482_v7 }
  0x20   : > { %310 = vmatprep.subr.bf16.mxu0 %v515_v0 }
  0x23   : > { %311 = vmatpush1.bf16.msra.mxu0 %v483_v8 }
  0x24   : > { %312 = vmatprep.subr.bf16.mxu0 %v515_v0 }
  0x27   : > { %313 = vmatpush1.bf16.msra.mxu0 %v484_v9 }
  0x28   : > { %314 = vmatprep.subr.bf16.mxu0 %v515_v0 }
  0x2b   : > { %315 = vmatpush1.bf16.msra.mxu0 %v485_v10 }
  0x2c   : > { %316 = vmatprep.subr.bf16.mxu0 %v515_v0 }
  0x2f   : > { %317 = vmatpush1.bf16.msra.mxu0 %v486_v11 }
  0x30   : > { %318 = vmatprep.subr.bf16.mxu0 %v515_v0 }
  0x33   : > { %319 = vmatpush1.bf16.msra.mxu0 %v487_v12 }
  0x36   : > { %335 = vmatmul.mubr.bf16.vlgmr.msra.gmra.mrb[0].mxu0 %v488_v13 }
  0x87   : > { %v228_v14 = vpop.permute.xlu0 %227 }
  0x8b   : > { %v233_v18 = vpop.permute.xlu0 %232 }
 0x109   : > { %v336_v15 = vpop.f32.mrb[0].mxu0 }
 0x10a   : > { %v337_v16 = vadd.f32 %v336_v15, %v228_v14  ;;  %v338_v17 = vpop.f32.mrb[1].mxu0 }
 0x10b   : > { %v339_v19 = vpop.f32.mrb[2].mxu0 }
 0x10c   : > { %344 = vst.msk [vmem:[%s201_s4] sm:$0xff] %vm343_vm1, %v337_v16  ;;  %v340_v20 = vadd.f32 %v339_v19, %v233_v18  ;;  %v341_v21 = vpop.f32.mrb[3].mxu0 }
 0x10e   : > { %345 = vst.msk [vmem:[%s201_s4 + $0x8] sm:$0xff] %vm343_vm1, %v340_v20 }
 0x10f PF: > { %s13_s14 = sadd.s32 1, %s513_s14   ;;  %s589_s12 = smov %s509_s13 }
 0x110   : > { %p10_p5 = scmp.ge.s32.totalorder %s13_s14, 4   ;;  %s590_s13 = smov %s592_s15 }
 0x112   :  { %12 = sbr.rel (!%p10_p5) target bundleno = 2 (0x2), region = 62 }

// kernel: sent_forward.9
= control target key start
LH: loop header
LB: loop body
LE: loop exit
PB: predicated region body
PF: predicated region fallthrough
CT: control target
= control target key end

     0   :  { %s536_s12 = smov 0   ;;  %s538_s13 = smov 0   ;;  %s585_s0 = inlined_call_operand.vmem [shape: bf16[2,144,9], index: 0, kind: input, shape index: {}]   ;;  %s586_s1 = inlined_call_operand.vmem [shape: bf16[16,144], index: 1, kind: input, shape index: {}]   ;;  %s587_s2 = inlined_call_operand.vmem [shape: f32[16,1], index: 2, kind: input, shape index: {}]   ;;  %s588_s3 = inlined_call_operand.vmem [shape: f32[2,16,9], index: 3, kind: output, shape index: {}]  }
   0x1   :  { %s540_s14 = smov 0  }
   0x2 LB: > { %s25_s15 = sadd.s32 1, %s509_s13  ;;  %p433_p0 = scmp.ge.s32.totalorder %s513_s14, 1  ;;  %s513_s14 = sphi %s540_s14, %s13_s14   ;;  %s509_s13 = sphi %s538_s13, %s590_s13   ;;  %s505_s12 = sphi %s536_s12, %s589_s12  }
   0x3   : > { %p27_p1 = scmp.ge.s32.totalorder %s25_s15, 2  ;;  %p156_p2 = scmp.lt.s32.totalorder %s513_s14, 3 }
   0x5   : > { %s592_s15 = smov (%p27_p1, %s25_s15), 0  ;;  %p157_p3 = pnand %p433_p0, %p156_p2 }
   0x6   : > { %p186_p4 = scmp.lt.s32.totalorder (!%p157_p3), %s505_s12, 1  ;;  %v515_v0 = vmov (!%p157_p3), 0   ;;  %v490_v1 = vld [vmem:[%s586_s1 + $0x4] ss:$8 sps:$4 sm:$0xff] (!%p157_p3)   ;;  %vm298_vm0 = vcmask (!%p157_p3), 130048   ;;  %vm343_vm1 = vcmask (!%p157_p3), 72704  }
   0x7   : > { %160 = sbr.rel (%p157_p3) target bundleno = 271 (0x10f), region = 32  ;;  %302 = vmatprep.subr.bf16.mxu0 (!%p157_p3), %v515_v0  ;;  %478 = vset.pattern.permute.xlu0 (!%p157_p3), %v515_v0  ;;  %v223_v2 = vld [vmem:[%s587_s2] sm:$0xff] (!%p157_p3)  ;;  %v224_v3 = vld [vmem:[%s587_s2 + $0x8] sm:$0xff] (!%p157_p3) }
   0x8   : > { %227 = vperm.xlu0 (!%p157_p3), %478, %v223_v2   ;;  %448 = vmatprep.mubr.msk.bf16.mxu0 (!%p157_p3), %vm298_vm0, %v490_v1  ;;  %v488_v13 = vld [vmem:[%s586_s1] ss:$8 sps:$4 sm:$0xff] (!%p157_p3)  }
   0xc   : > { %232 = vperm.xlu0 (!%p157_p3), %478, %v224_v3  }
   0xe   : > { %s594_s12 = smov (!%p186_p4, %s505_s12), 1 }
   0xf   : > { %s452_s22 = smul.u32 72, %s594_s12  ;;  %s451_s28 = sshll.u32 %s594_s12, 4 }
  0x10   : > { %s201_s4 = scalar_lea.vmem %s588_s3, %s451_s28 }
  0x11   : > { %s193_s25 = scalar_lea.vmem %s585_s0, %s452_s22 }
  0x12   : > { %v479_v4 = vld [vmem:[%s193_s25] sm:$0xff]   ;;  %v480_v5 = vld [vmem:[%s193_s25 + $0x8] sm:$0xff]   ;;  %v481_v6 = vld [vmem:[%s193_s25 + $0x10] sm:$0xff]  }
  0x13   : > { %303 = vmatpush1.bf16.msra.mxu0 %v479_v4  ;;  %v482_v7 = vld [vmem:[%s193_s25 + $0x18] sm:$0xff]   ;;  %v483_v8 = vld [vmem:[%s193_s25 + $0x20] sm:$0xff]   ;;  %v484_v9 = vld [vmem:[%s193_s25 + $0x28] sm:$0xff]  }
  0x14   : > { %304 = vmatprep.subr.bf16.mxu0 %v515_v0  ;;  %v485_v10 = vld [vmem:[%s193_s25 + $0x30] sm:$0xff]   ;;  %v486_v11 = vld [vmem:[%s193_s25 + $0x38] sm:$0xff]   ;;  %v487_v12 = vld [vmem:[%s193_s25 + $0x40] sm:$0xff]  }
  0x17   : > { %305 = vmatpush1.bf16.msra.mxu0 %v480_v5 }
  0x18   : > { %306 = vmatprep.subr.bf16.mxu0 %v515_v0 }
  0x1b   : > { %307 = vmatpush1.bf16.msra.mxu0 %v481_v6 }
  0x1c   : > { %308 = vmatprep.subr.bf16.mxu0 %v515_v0 }
  0x1f   : > { %309 = vmatpush1.bf16.msra.mxu0 %v482_v7 }
  0x20   : > { %310 = vmatprep.subr.bf16.mxu0 %v515_v0 }
  0x23   : > { %311 = vmatpush1.bf16.msra.mxu0 %v483_v8 }
  0x24   : > { %312 = vmatprep.subr.bf16.mxu0 %v515_v0 }
  0x27   : > { %313 = vmatpush1.bf16.msra.mxu0 %v484_v9 }
  0x28   : > { %314 = vmatprep.subr.bf16.mxu0 %v515_v0 }
  0x2b   : > { %315 = vmatpush1.bf16.msra.mxu0 %v485_v10 }
  0x2c   : > { %316 = vmatprep.subr.bf16.mxu0 %v515_v0 }
  0x2f   : > { %317 = vmatpush1.bf16.msra.mxu0 %v486_v11 }
  0x30   : > { %318 = vmatprep.subr.bf16.mxu0 %v515_v0 }
  0x33   : > { %319 = vmatpush1.bf16.msra.mxu0 %v487_v12 }
  0x36   : > { %335 = vmatmul.mubr.bf16.vlgmr.msra.gmra.mrb[0].mxu0 %v488_v13 }
  0x87   : > { %v228_v14 = vpop.permute.xlu0 %227 }
  0x8b   : > { %v233_v18 = vpop.permute.xlu0 %232 }
 0x109   : > { %v336_v15 = vpop.f32.mrb[0].mxu0 }
 0x10a   : > { %v337_v16 = vadd.f32 %v336_v15, %v228_v14  ;;  %v338_v17 = vpop.f32.mrb[1].mxu0 }
 0x10b   : > { %v339_v19 = vpop.f32.mrb[2].mxu0 }
 0x10c   : > { %344 = vst.msk [vmem:[%s201_s4] sm:$0xff] %vm343_vm1, %v337_v16  ;;  %v340_v20 = vadd.f32 %v339_v19, %v233_v18  ;;  %v341_v21 = vpop.f32.mrb[3].mxu0 }
 0x10e   : > { %345 = vst.msk [vmem:[%s201_s4 + $0x8] sm:$0xff] %vm343_vm1, %v340_v20 }
 0x10f PF: > { %s13_s14 = sadd.s32 1, %s513_s14   ;;  %s589_s12 = smov %s509_s13 }
 0x110   : > { %p10_p5 = scmp.ge.s32.totalorder %s13_s14, 4   ;;  %s590_s13 = smov %s592_s15 }
 0x112   :  { %12 = sbr.rel (!%p10_p5) target bundleno = 2 (0x2), region = 62 }

// kernel: sent_forward.12
= control target key start
LH: loop header
LB: loop body
LE: loop exit
PB: predicated region body
PF: predicated region fallthrough
CT: control target
= control target key end

     0   :  { %s725_s18 = smov 0   ;;  %s727_s19 = smov 0   ;;  %s793_s0 = inlined_call_operand.vmem [shape: f32[2,16,9], index: 0, kind: input, shape index: {}]   ;;  %s794_s1 = inlined_call_operand.vmem [shape: f32[4,16], index: 1, kind: input, shape index: {}]   ;;  %s795_s2 = inlined_call_operand.vmem [shape: f32[4,1], index: 2, kind: input, shape index: {}]   ;;  %s796_s3 = inlined_call_operand.vmem [shape: f32[16,4], index: 3, kind: input, shape index: {}]   ;;  %s797_s4 = inlined_call_operand.vmem [shape: f32[16,1], index: 4, kind: input, shape index: {}]   ;;  %s798_s5 = inlined_call_operand.vmem [shape: f32[2,16,1], index: 5, kind: output, shape index: {}]  }
   0x1   :  { %s729_s20 = smov 0  }
   0x2 LB: > { %s27_s21 = sadd.s32 1, %s684_s19  ;;  %p591_p0 = scmp.ge.s32.totalorder %s688_s20, 1  ;;  %s688_s20 = sphi %s729_s20, %s15_s20   ;;  %s684_s19 = sphi %s727_s19, %s800_s19   ;;  %s680_s18 = sphi %s725_s18, %s799_s18  }
   0x3   : > { %p29_p1 = scmp.ge.s32.totalorder %s27_s21, 2  ;;  %p204_p2 = scmp.lt.s32.totalorder %s688_s20, 3 }
   0x5   : > { %s802_s21 = smov (%p29_p1, %s27_s21), 0  ;;  %p205_p3 = pnand %p591_p0, %p204_p2 }
   0x6   : > { %p235_p4 = scmp.lt.s32.totalorder (!%p205_p3), %s680_s18, 1  ;;  %vm254_vm0 = vcmask (!%p205_p3), 7168   ;;  %v690_v0 = vmov (!%p205_p3), -inf   ;;  %vm261_vm1 = vcmask (!%p205_p3), 72704   ;;  %v691_v7 = vmov (!%p205_p3), 0.0   ;;  %v403_v31 = vld [vmem:[%s797_s4] sm:$0xff] (!%p205_p3) }
   0x7   : > { %208 = sbr.rel (%p205_p3) target bundleno = 900 (0x384), region = 40  ;;  %257 = vst.msk [vmem:[#allocation3] sm:$0xff] (!%p205_p3), %vm254_vm0, %v690_v0  ;;  %258 = vst.msk [vmem:[#allocation3 + $0x8] sm:$0xff] (!%p205_p3), %vm254_vm0, %v690_v0  ;;  %v692_v8 = vmov (!%p205_p3), 0   ;;  %v320_v29 = vld [vmem:[%s795_s2] sm:$0xf] (!%p205_p3)  ;;  %v294_v33 = vlaneseq (!%p205_p3) }
   0x8   : > { %255 = vst.msk [vmem:[#allocation2] sm:$0xff] (!%p205_p3), %vm254_vm0, %v691_v7  ;;  %256 = vst.msk [vmem:[#allocation2 + $0x8] sm:$0xff] (!%p205_p3), %vm254_vm0, %v691_v7  ;;  %660 = vset.pattern.permute.xlu1 (!%p205_p3), %v692_v8  ;;  %654 = vset.pattern.permute.xlu0 (!%p205_p3), %v692_v8  ;;  %v693_v30 = vmov (!%p205_p3), 0.0|0.0   ;;  %vm694_vm2 = vmmov (!%p205_p3), 0   ;;  %v404_v32 = vld [vmem:[%s797_s4 + $0x8] sm:$0xff] (!%p205_p3)  ;;  %vm326_vm4 = vcmask (!%p205_p3), 130048  }
   0x9   : > { %622 = vmatprep.subr.bf16.mxu0 (!%p205_p3), %v693_v30  ;;  %614 = vmatprep.mubr.msk.f32.mxu0 (!%p205_p3), %vm694_vm2, %v691_v7  ;;  %v295_v34 = vand.u32 (!%p205_p3), 127, %v294_v33  ;;  %v319_v44 = vld [vmem:[%s794_s1] sm:$0xf] (!%p205_p3)  ;;  %vm415_vm5 = vcmask (!%p205_p3), 31744   ;;  %vm422_vm6 = vcmask (!%p205_p3), 1043456   ;;  %v402_v51 = vld [vmem:[%s796_s3 + $0x8] sm:$0xff] (!%p205_p3) }
   0xa   : > { %v401_v45 = vld [vmem:[%s796_s3] sm:$0xff] (!%p205_p3)  ;;  %vm501_vm7 = vcmask (!%p205_p3), 15360  }
   0xb   : > { %vm296_vm3 = vcmp.eq.s32.totalorder (!%p205_p3), %v295_v34, 0  ;;  %619 = vmatprep.mubr.msk.f32.mxu1 (!%p205_p3), %vm415_vm5, %v401_v45 }
   0xe   : > { %s804_s18 = smov (!%p235_p4, %s680_s18), 1  ;;  %v273_v9 = vld [vmem:[#allocation3] sm:$0xff]  ;;  %v274_v15 = vld [vmem:[#allocation3 + $0x8] sm:$0xff] }
   0xf   : > { %s602_s22 = sshll.u32 %s804_s18, 4  ;;  %v259_v10 = vld [vmem:[#allocation2] sm:$0xff]  ;;  %v260_v16 = vld [vmem:[#allocation2 + $0x8] sm:$0xff] }
  0x10   : > { %s242_s25 = scalar_lea.vmem %s793_s0, %s602_s22  ;;  %s247_s15 = scalar_lea.vmem %s798_s5, %s602_s22 }
  0x11   : > { %v248_v1 = vld [vmem:[%s242_s25] sm:$0xff]  ;;  %v249_v2 = vld [vmem:[%s242_s25 + $0x8] sm:$0xff] }
  0x12   : > { %v275_v3 = vsel %vm261_vm1, %v248_v1, -inf  ;;  %v262_v4 = vsel %vm261_vm1, %v248_v1, 0.0  ;;  %v278_v5 = vsel %vm261_vm1, %v249_v2, -inf  ;;  %v265_v6 = vsel %vm261_vm1, %v249_v2, 0.0 }
  0x13   : > { %276 = vmax.xlane.f32.xlu1 %v275_v3  ;;  %263 = vadd.xlane.f32.xlu0 %v262_v4 }
  0x17   : > { %279 = vmax.xlane.f32.xlu1 %v278_v5  ;;  %266 = vadd.xlane.f32.xlu0 %v265_v6 }
  0xa0   : > { %v277_v11 = vpop.xlane.xlu1 %276  ;;  %v264_v12 = vpop.xlane.xlu0 %263 }
  0xa1   : > { %v281_v13 = vmax.f32 %v273_v9, %v277_v11  ;;  %v268_v14 = vadd.f32 %v264_v12, %v259_v10 }
  0xa3   : > { %283 = vst.msk [vmem:[#allocation3] sm:$0xff] %vm254_vm0, %v281_v13  ;;  %271 = vst.msk [vmem:[#allocation2] sm:$0xff] %vm254_vm0, %v268_v14 }
  0xa4   : > { %v280_v17 = vpop.xlane.xlu1 %279  ;;  %v267_v18 = vpop.xlane.xlu0 %266 }
  0xa5   : > { %v282_v19 = vmax.f32 %v274_v15, %v280_v17  ;;  %v269_v20 = vadd.f32 %v267_v18, %v260_v16 }
  0xa7   : > { %284 = vst.msk [vmem:[#allocation3 + $0x8] sm:$0xff] %vm254_vm0, %v282_v19  ;;  %272 = vst.msk [vmem:[#allocation2 + $0x8] sm:$0xff] %vm254_vm0, %v269_v20 }
  0xaa   : > { %v288_v21 = vld [vmem:[#allocation2] sm:$0xff]  ;;  %v292_v22 = vld [vmem:[#allocation3] sm:$0xff] }
  0xab   : > { %v290_v26 = vmul.f32 0.11111111, %v288_v21 }
  0xae   : > { %v293_v23 = vld [vmem:[#allocation3 + $0x8] sm:$0xff]  ;;  %v289_v24 = vld [vmem:[#allocation2 + $0x8] sm:$0xff] }
  0xaf   : > { %v661_v25 = vpack.i.bf16 %v293_v23, %v292_v22  ;;  %v291_v27 = vmul.f32 0.11111111, %v289_v24 }
  0xb1   : > { %662 = vperm.xlu1 %660, %v661_v25   ;;  %v655_v28 = vpack.i.bf16 %v291_v27, %v290_v26 }
  0xb3   : > { %656 = vperm.xlu0 %654, %v655_v28  }
  0xb5   : > { %323 = vperm.xlu1 %660, %v320_v29  }
  0xb9   : > { %407 = vperm.xlu1 %660, %v403_v31  }
  0xbd   : > { %412 = vperm.xlu1 %660, %v404_v32  }
 0x130   : > { %v663_v35 = vpop.permute.xlu1 %662 }
 0x131   : > { %v665_v37 = vunpack.i.h.bf16 %v663_v35  ;;  %v664_v38 = vunpack.i.l.bf16 %v663_v35 }
 0x132   : > { %v657_v36 = vpop.permute.xlu0 %656 }
 0x133   : > { %v659_v39 = vunpack.i.h.bf16 %v657_v36  ;;  %v658_v40 = vunpack.i.l.bf16 %v657_v36 }
 0x134   : > { %v324_v46 = vpop.permute.xlu1 %323 }
 0x135   : > { %v317_v41 = vsel %vm296_vm3, %v658_v40, %v664_v38  ;;  %v318_v42 = vsel %vm296_vm3, %v659_v39, %v665_v37 }
 0x136   : > { %v623_v43 = vpack.c.bf16 %v318_v42, %v317_v41 }
 0x138   : > { %624 = vmatpush3.bf16.msra.mxu0 %v623_v43  ;;  %v408_v52 = vpop.permute.xlu1 %407 }
 0x13b   : > { %615 = vmatmul.mubr.msk.f32.vlgmr.msra.gmra.mrb[0].mxu0 %vm326_vm4, %v319_v44 }
 0x13c   : > { %v413_v53 = vpop.permute.xlu1 %412 }
 0x20e   : > { %v396_v47 = vpop.f32.mrb[0].mxu0 }
 0x20f   : > { %v397_v48 = vadd.f32 %v396_v47, %v324_v46  ;;  %v616_v49 = vpop.f32.mrb[1].mxu0 }
 0x211   : > { %v400_v50 = vmax.f32 %v397_v48, 0.0 }
 0x213   : > { %617 = vmatprep.subr.msk.mxu1 %vm422_vm6, %v400_v50 }
 0x214   : > { %618 = vmatpush3.msk.msra.mxu1 %vm422_vm6, %v400_v50 }
 0x215   : > { %620 = vmatmul.mubr.msk.f32.vlgmr.msra.gmra.mrb[0].mxu1 %vm415_vm5, %v402_v51 }
 0x2e8   : > { %v621_v54 = vpop.f32.mrb[0].mxu1 }
 0x2e9   : > { %v498_v55 = vadd.f32 %v621_v54, %v413_v53  ;;  %v492_v56 = vpop.f32.mrb[1].mxu1 }
 0x2ea   : > { %v493_v57 = vadd.f32 %v492_v56, %v408_v52 }
 0x2eb   : > { %v505_v58 = vsel %vm501_vm7, %v498_v55, 0.0 }
 0x2ec   : > { %506 = vadd.xlane.f32.xlu0 %v505_v58  ;;  %v502_v59 = vsel %vm501_vm7, %v493_v57, 0.0 }
 0x2ed   : > { %503 = vadd.xlane.f32.xlu1 %v502_v59 }
 0x379   : > { %v507_v60 = vpop.xlane.xlu0 %506 }
 0x37a   : > { %v509_v61 = vadd.f32 3.0, %v507_v60  ;;  %v504_v62 = vpop.xlane.xlu1 %503 }
 0x37b   : > { %v508_v63 = vadd.f32 3.0, %v504_v62 }
 0x37c   : > { %v511_v0 = vmax.f32 %v509_v61, 0.0 }
 0x37d   : > { %v510_v1 = vmax.f32 %v508_v63, 0.0 }
 0x37e   : > { %v513_v2 = vmin.f32 %v511_v0, 6.0 }
 0x37f   : > { %v512_v3 = vmin.f32 %v510_v1, 6.0 }
 0x380   : > { %v515_v4 = vmul.f32 0.16666667, %v513_v2 }
 0x381   : > { %v514_v5 = vmul.f32 0.16666667, %v512_v3 }
 0x382   : > { %517 = vst.msk [vmem:[%s247_s15 + $0x8] sm:$0xff] %vm254_vm0, %v515_v4 }
 0x383   : > { %516 = vst.msk [vmem:[%s247_s15] sm:$0xff] %vm254_vm0, %v514_v5 }
 0x384 PF: > { %s15_s20 = sadd.s32 1, %s688_s20   ;;  %s799_s18 = smov %s684_s19 }
 0x385   : > { %p12_p5 = scmp.ge.s32.totalorder %s15_s20, 4   ;;  %s800_s19 = smov %s802_s21 }
 0x387   :  { %14 = sbr.rel (!%p12_p5) target bundleno = 2 (0x2), region = 78 }

// kernel: sent_forward.11
= control target key start
LH: loop header
LB: loop body
LE: loop exit
PB: predicated region body
PF: predicated region fallthrough
CT: control target
= control target key end

     0   :  { %s725_s18 = smov 0   ;;  %s727_s19 = smov 0   ;;  %s793_s0 = inlined_call_operand.vmem [shape: f32[2,16,64], index: 0, kind: input, shape index: {}]   ;;  %s794_s1 = inlined_call_operand.vmem [shape: f32[4,16], index: 1, kind: input, shape index: {}]   ;;  %s795_s2 = inlined_call_operand.vmem [shape: f32[4,1], index: 2, kind: input, shape index: {}]   ;;  %s796_s3 = inlined_call_operand.vmem [shape: f32[16,4], index: 3, kind: input, shape index: {}]   ;;  %s797_s4 = inlined_call_operand.vmem [shape: f32[16,1], index: 4, kind: input, shape index: {}]   ;;  %s798_s5 = inlined_call_operand.vmem [shape: f32[2,16,1], index: 5, kind: output, shape index: {}]  }
   0x1   :  { %s729_s20 = smov 0  }
   0x2 LB: > { %s27_s21 = sadd.s32 1, %s684_s19  ;;  %p591_p0 = scmp.ge.s32.totalorder %s688_s20, 1  ;;  %s688_s20 = sphi %s729_s20, %s15_s20   ;;  %s684_s19 = sphi %s727_s19, %s800_s19   ;;  %s680_s18 = sphi %s725_s18, %s799_s18  }
   0x3   : > { %p29_p1 = scmp.ge.s32.totalorder %s27_s21, 2  ;;  %p204_p2 = scmp.lt.s32.totalorder %s688_s20, 3 }
   0x5   : > { %s802_s21 = smov (%p29_p1, %s27_s21), 0  ;;  %p205_p3 = pnand %p591_p0, %p204_p2 }
   0x6   : > { %p235_p4 = scmp.lt.s32.totalorder (!%p205_p3), %s680_s18, 1  ;;  %vm254_vm0 = vcmask (!%p205_p3), 7168   ;;  %v690_v0 = vmov (!%p205_p3), -inf   ;;  %vm261_vm1 = vcmask (!%p205_p3), 523264   ;;  %v691_v7 = vmov (!%p205_p3), 0.0   ;;  %v403_v31 = vld [vmem:[%s797_s4] sm:$0xff] (!%p205_p3) }
   0x7   : > { %208 = sbr.rel (%p205_p3) target bundleno = 900 (0x384), region = 40  ;;  %257 = vst.msk [vmem:[#allocation3] sm:$0xff] (!%p205_p3), %vm254_vm0, %v690_v0  ;;  %258 = vst.msk [vmem:[#allocation3 + $0x8] sm:$0xff] (!%p205_p3), %vm254_vm0, %v690_v0  ;;  %v692_v8 = vmov (!%p205_p3), 0   ;;  %v320_v29 = vld [vmem:[%s795_s2] sm:$0xf] (!%p205_p3)  ;;  %v294_v33 = vlaneseq (!%p205_p3) }
   0x8   : > { %255 = vst.msk [vmem:[#allocation2] sm:$0xff] (!%p205_p3), %vm254_vm0, %v691_v7  ;;  %256 = vst.msk [vmem:[#allocation2 + $0x8] sm:$0xff] (!%p205_p3), %vm254_vm0, %v691_v7  ;;  %660 = vset.pattern.permute.xlu1 (!%p205_p3), %v692_v8  ;;  %654 = vset.pattern.permute.xlu0 (!%p205_p3), %v692_v8  ;;  %v693_v30 = vmov (!%p205_p3), 0.0|0.0   ;;  %vm694_vm2 = vmmov (!%p205_p3), 0   ;;  %v404_v32 = vld [vmem:[%s797_s4 + $0x8] sm:$0xff] (!%p205_p3)  ;;  %vm326_vm4 = vcmask (!%p205_p3), 130048  }
   0x9   : > { %622 = vmatprep.subr.bf16.mxu0 (!%p205_p3), %v693_v30  ;;  %614 = vmatprep.mubr.msk.f32.mxu0 (!%p205_p3), %vm694_vm2, %v691_v7  ;;  %v295_v34 = vand.u32 (!%p205_p3), 127, %v294_v33  ;;  %v319_v44 = vld [vmem:[%s794_s1] sm:$0xf] (!%p205_p3)  ;;  %vm415_vm5 = vcmask (!%p205_p3), 31744   ;;  %vm422_vm6 = vcmask (!%p205_p3), 1043456   ;;  %v402_v51 = vld [vmem:[%s796_s3 + $0x8] sm:$0xff] (!%p205_p3) }
   0xa   : > { %v401_v45 = vld [vmem:[%s796_s3] sm:$0xff] (!%p205_p3)  ;;  %vm501_vm7 = vcmask (!%p205_p3), 15360  }
   0xb   : > { %vm296_vm3 = vcmp.eq.s32.totalorder (!%p205_p3), %v295_v34, 0  ;;  %619 = vmatprep.mubr.msk.f32.mxu1 (!%p205_p3), %vm415_vm5, %v401_v45 }
   0xe   : > { %s804_s18 = smov (!%p235_p4, %s680_s18), 1  ;;  %v273_v9 = vld [vmem:[#allocation3] sm:$0xff]  ;;  %v274_v15 = vld [vmem:[#allocation3 + $0x8] sm:$0xff] }
   0xf   : > { %s602_s22 = sshll.u32 %s804_s18, 4  ;;  %v259_v10 = vld [vmem:[#allocation2] sm:$0xff]  ;;  %v260_v16 = vld [vmem:[#allocation2 + $0x8] sm:$0xff] }
  0x10   : > { %s242_s25 = scalar_lea.vmem %s793_s0, %s602_s22  ;;  %s247_s15 = scalar_lea.vmem %s798_s5, %s602_s22 }
  0x11   : > { %v248_v1 = vld [vmem:[%s242_s25] sm:$0xff]  ;;  %v249_v2 = vld [vmem:[%s242_s25 + $0x8] sm:$0xff] }
  0x12   : > { %v275_v3 = vsel %vm261_vm1, %v248_v1, -inf  ;;  %v262_v4 = vsel %vm261_vm1, %v248_v1, 0.0  ;;  %v278_v5 = vsel %vm261_vm1, %v249_v2, -inf  ;;  %v265_v6 = vsel %vm261_vm1, %v249_v2, 0.0 }
  0x13   : > { %276 = vmax.xlane.f32.xlu1 %v275_v3  ;;  %263 = vadd.xlane.f32.xlu0 %v262_v4 }
  0x17   : > { %279 = vmax.xlane.f32.xlu1 %v278_v5  ;;  %266 = vadd.xlane.f32.xlu0 %v265_v6 }
  0xa0   : > { %v277_v11 = vpop.xlane.xlu1 %276  ;;  %v264_v12 = vpop.xlane.xlu0 %263 }
  0xa1   : > { %v281_v13 = vmax.f32 %v273_v9, %v277_v11  ;;  %v268_v14 = vadd.f32 %v264_v12, %v259_v10 }
  0xa3   : > { %283 = vst.msk [vmem:[#allocation3] sm:$0xff] %vm254_vm0, %v281_v13  ;;  %271 = vst.msk [vmem:[#allocation2] sm:$0xff] %vm254_vm0, %v268_v14 }
  0xa4   : > { %v280_v17 = vpop.xlane.xlu1 %279  ;;  %v267_v18 = vpop.xlane.xlu0 %266 }
  0xa5   : > { %v282_v19 = vmax.f32 %v274_v15, %v280_v17  ;;  %v269_v20 = vadd.f32 %v267_v18, %v260_v16 }
  0xa7   : > { %284 = vst.msk [vmem:[#allocation3 + $0x8] sm:$0xff] %vm254_vm0, %v282_v19  ;;  %272 = vst.msk [vmem:[#allocation2 + $0x8] sm:$0xff] %vm254_vm0, %v269_v20 }
  0xaa   : > { %v288_v21 = vld [vmem:[#allocation2] sm:$0xff]  ;;  %v292_v22 = vld [vmem:[#allocation3] sm:$0xff] }
  0xab   : > { %v290_v26 = vmul.f32 0.015625, %v288_v21 }
  0xae   : > { %v293_v23 = vld [vmem:[#allocation3 + $0x8] sm:$0xff]  ;;  %v289_v24 = vld [vmem:[#allocation2 + $0x8] sm:$0xff] }
  0xaf   : > { %v661_v25 = vpack.i.bf16 %v293_v23, %v292_v22  ;;  %v291_v27 = vmul.f32 0.015625, %v289_v24 }
  0xb1   : > { %662 = vperm.xlu1 %660, %v661_v25   ;;  %v655_v28 = vpack.i.bf16 %v291_v27, %v290_v26 }
  0xb3   : > { %656 = vperm.xlu0 %654, %v655_v28  }
  0xb5   : > { %323 = vperm.xlu1 %660, %v320_v29  }
  0xb9   : > { %407 = vperm.xlu1 %660, %v403_v31  }
  0xbd   : > { %412 = vperm.xlu1 %660, %v404_v32  }
 0x130   : > { %v663_v35 = vpop.permute.xlu1 %662 }
 0x131   : > { %v665_v37 = vunpack.i.h.bf16 %v663_v35  ;;  %v664_v38 = vunpack.i.l.bf16 %v663_v35 }
 0x132   : > { %v657_v36 = vpop.permute.xlu0 %656 }
 0x133   : > { %v659_v39 = vunpack.i.h.bf16 %v657_v36  ;;  %v658_v40 = vunpack.i.l.bf16 %v657_v36 }
 0x134   : > { %v324_v46 = vpop.permute.xlu1 %323 }
 0x135   : > { %v317_v41 = vsel %vm296_vm3, %v658_v40, %v664_v38  ;;  %v318_v42 = vsel %vm296_vm3, %v659_v39, %v665_v37 }
 0x136   : > { %v623_v43 = vpack.c.bf16 %v318_v42, %v317_v41 }
 0x138   : > { %624 = vmatpush3.bf16.msra.mxu0 %v623_v43  ;;  %v408_v52 = vpop.permute.xlu1 %407 }
 0x13b   : > { %615 = vmatmul.mubr.msk.f32.vlgmr.msra.gmra.mrb[0].mxu0 %vm326_vm4, %v319_v44 }
 0x13c   : > { %v413_v53 = vpop.permute.xlu1 %412 }
 0x20e   : > { %v396_v47 = vpop.f32.mrb[0].mxu0 }
 0x20f   : > { %v397_v48 = vadd.f32 %v396_v47, %v324_v46  ;;  %v616_v49 = vpop.f32.mrb[1].mxu0 }
 0x211   : > { %v400_v50 = vmax.f32 %v397_v48, 0.0 }
 0x213   : > { %617 = vmatprep.subr.msk.mxu1 %vm422_vm6, %v400_v50 }
 0x214   : > { %618 = vmatpush3.msk.msra.mxu1 %vm422_vm6, %v400_v50 }
 0x215   : > { %620 = vmatmul.mubr.msk.f32.vlgmr.msra.gmra.mrb[0].mxu1 %vm415_vm5, %v402_v51 }
 0x2e8   : > { %v621_v54 = vpop.f32.mrb[0].mxu1 }
 0x2e9   : > { %v498_v55 = vadd.f32 %v621_v54, %v413_v53  ;;  %v492_v56 = vpop.f32.mrb[1].mxu1 }
 0x2ea   : > { %v493_v57 = vadd.f32 %v492_v56, %v408_v52 }
 0x2eb   : > { %v505_v58 = vsel %vm501_vm7, %v498_v55, 0.0 }
 0x2ec   : > { %506 = vadd.xlane.f32.xlu0 %v505_v58  ;;  %v502_v59 = vsel %vm501_vm7, %v493_v57, 0.0 }
 0x2ed   : > { %503 = vadd.xlane.f32.xlu1 %v502_v59 }
 0x379   : > { %v507_v60 = vpop.xlane.xlu0 %506 }
 0x37a   : > { %v509_v61 = vadd.f32 3.0, %v507_v60  ;;  %v504_v62 = vpop.xlane.xlu1 %503 }
 0x37b   : > { %v508_v63 = vadd.f32 3.0, %v504_v62 }
 0x37c   : > { %v511_v0 = vmax.f32 %v509_v61, 0.0 }
 0x37d   : > { %v510_v1 = vmax.f32 %v508_v63, 0.0 }
 0x37e   : > { %v513_v2 = vmin.f32 %v511_v0, 6.0 }
 0x37f   : > { %v512_v3 = vmin.f32 %v510_v1, 6.0 }
 0x380   : > { %v515_v4 = vmul.f32 0.16666667, %v513_v2 }
 0x381   : > { %v514_v5 = vmul.f32 0.16666667, %v512_v3 }
 0x382   : > { %517 = vst.msk [vmem:[%s247_s15 + $0x8] sm:$0xff] %vm254_vm0, %v515_v4 }
 0x383   : > { %516 = vst.msk [vmem:[%s247_s15] sm:$0xff] %vm254_vm0, %v514_v5 }
 0x384 PF: > { %s15_s20 = sadd.s32 1, %s688_s20   ;;  %s799_s18 = smov %s684_s19 }
 0x385   : > { %p12_p5 = scmp.ge.s32.totalorder %s15_s20, 4   ;;  %s800_s19 = smov %s802_s21 }
 0x387   :  { %14 = sbr.rel (!%p12_p5) target bundleno = 2 (0x2), region = 78 }

// kernel: sent_forward.10
= control target key start
LH: loop header
LB: loop body
LE: loop exit
PB: predicated region body
PF: predicated region fallthrough
CT: control target
= control target key end

     0   :  { %s731_s18 = smov 0   ;;  %s733_s19 = smov 0   ;;  %s796_s0 = inlined_call_operand.vmem [shape: f32[2,16,256], index: 0, kind: input, shape index: {}]   ;;  %s797_s1 = inlined_call_operand.vmem [shape: f32[4,16], index: 1, kind: input, shape index: {}]   ;;  %s798_s2 = inlined_call_operand.vmem [shape: f32[4,1], index: 2, kind: input, shape index: {}]   ;;  %s799_s3 = inlined_call_operand.vmem [shape: f32[16,4], index: 3, kind: input, shape index: {}]   ;;  %s800_s4 = inlined_call_operand.vmem [shape: f32[16,1], index: 4, kind: input, shape index: {}]   ;;  %s801_s5 = inlined_call_operand.vmem [shape: f32[2,16,1], index: 5, kind: output, shape index: {}]  }
   0x1   :  { %s735_s20 = smov 0  }
   0x2 LB: > { %s27_s21 = sadd.s32 1, %s690_s19  ;;  %p597_p0 = scmp.ge.s32.totalorder %s694_s20, 1  ;;  %s694_s20 = sphi %s735_s20, %s15_s20   ;;  %s690_s19 = sphi %s733_s19, %s803_s19   ;;  %s686_s18 = sphi %s731_s18, %s802_s18  }
   0x3   : > { %p29_p1 = scmp.ge.s32.totalorder %s27_s21, 2  ;;  %p206_p2 = scmp.lt.s32.totalorder %s694_s20, 3 }
   0x5   : > { %s805_s21 = smov (%p29_p1, %s27_s21), 0  ;;  %p207_p3 = pnand %p597_p0, %p206_p2 }
   0x6   : > { %p239_p4 = scmp.lt.s32.totalorder (!%p207_p3), %s686_s18, 1  ;;  %vm261_vm0 = vcmask (!%p207_p3), 7168   ;;  %v696_v0 = vmov (!%p207_p3), -inf   ;;  %v697_v9 = vmov (!%p207_p3), 0.0   ;;  %v698_v10 = vmov (!%p207_p3), 0   ;;  %v409_v33 = vld [vmem:[%s800_s4] sm:$0xff] (!%p207_p3) }
   0x7   : > { %210 = sbr.rel (%p207_p3) target bundleno = 901 (0x385), region = 40  ;;  %264 = vst.msk [vmem:[#allocation3] sm:$0xff] (!%p207_p3), %vm261_vm0, %v696_v0  ;;  %265 = vst.msk [vmem:[#allocation3 + $0x8] sm:$0xff] (!%p207_p3), %vm261_vm0, %v696_v0  ;;  %666 = vset.pattern.permute.xlu1 (!%p207_p3), %v698_v10  ;;  %660 = vset.pattern.permute.xlu0 (!%p207_p3), %v698_v10  ;;  %v326_v31 = vld [vmem:[%s798_s2] sm:$0xf] (!%p207_p3)  ;;  %v699_v32 = vmov (!%p207_p3), 0.0|0.0   ;;  %v300_v35 = vlaneseq (!%p207_p3) }
   0x8   : > { %262 = vst.msk [vmem:[#allocation2] sm:$0xff] (!%p207_p3), %vm261_vm0, %v697_v9  ;;  %263 = vst.msk [vmem:[#allocation2 + $0x8] sm:$0xff] (!%p207_p3), %vm261_vm0, %v697_v9  ;;  %628 = vmatprep.subr.bf16.mxu0 (!%p207_p3), %v699_v32  ;;  %vm700_vm1 = vmmov (!%p207_p3), 0   ;;  %v410_v34 = vld [vmem:[%s800_s4 + $0x8] sm:$0xff] (!%p207_p3)  ;;  %v325_v46 = vld [vmem:[%s797_s1] sm:$0xf] (!%p207_p3) }
   0x9   : > { %620 = vmatprep.mubr.msk.f32.mxu0 (!%p207_p3), %vm700_vm1, %v697_v9  ;;  %v301_v36 = vand.u32 (!%p207_p3), 127, %v300_v35  ;;  %vm332_vm3 = vcmask (!%p207_p3), 130048   ;;  %v407_v47 = vld [vmem:[%s799_s3] sm:$0xff] (!%p207_p3)  ;;  %vm421_vm4 = vcmask (!%p207_p3), 31744   ;;  %vm428_vm5 = vcmask (!%p207_p3), 1043456   ;;  %v408_v53 = vld [vmem:[%s799_s3 + $0x8] sm:$0xff] (!%p207_p3) }
   0xa   : > { %625 = vmatprep.mubr.msk.f32.mxu1 (!%p207_p3), %vm421_vm4, %v407_v47  ;;  %vm507_vm6 = vcmask (!%p207_p3), 15360  }
   0xb   : > { %vm302_vm2 = vcmp.eq.s32.totalorder (!%p207_p3), %v301_v36, 0 }
   0xe   : > { %s807_s18 = smov (!%p239_p4, %s686_s18), 1  ;;  %v279_v11 = vld [vmem:[#allocation3] sm:$0xff]  ;;  %v280_v17 = vld [vmem:[#allocation3 + $0x8] sm:$0xff] }
   0xf   : > { %s608_s22 = sshll.u32 %s807_s18, 5  ;;  %v266_v12 = vld [vmem:[#allocation2] sm:$0xff]  ;;  %v267_v18 = vld [vmem:[#allocation2 + $0x8] sm:$0xff]  ;;  %s609_s13 = sshll.u32 %s807_s18, 4 }
  0x10   : > { %s246_s25 = scalar_lea.vmem %s796_s0, %s608_s22  ;;  %s252_s16 = scalar_lea.vmem %s801_s5, %s609_s13 }
  0x11   : > { %v253_v1 = vld [vmem:[%s246_s25] sm:$0xff]  ;;  %v254_v2 = vld [vmem:[%s246_s25 + $0x8] sm:$0xff]  ;;  %v255_v3 = vld [vmem:[%s246_s25 + $0x10] sm:$0xff] }
  0x12   : > { %v281_v4 = vmax.f32 %v253_v1, %v254_v2  ;;  %v268_v5 = vadd.f32 %v254_v2, %v253_v1  ;;  %v256_v6 = vld [vmem:[%s246_s25 + $0x18] sm:$0xff] }
  0x13   : > { %v284_v7 = vmax.f32 %v255_v3, %v256_v6  ;;  %v271_v8 = vadd.f32 %v256_v6, %v255_v3 }
  0x14   : > { %282 = vmax.xlane.f32.xlu1 %v281_v4  ;;  %269 = vadd.xlane.f32.xlu0 %v268_v5 }
  0x18   : > { %285 = vmax.xlane.f32.xlu1 %v284_v7  ;;  %272 = vadd.xlane.f32.xlu0 %v271_v8 }
  0xa1   : > { %v283_v13 = vpop.xlane.xlu1 %282  ;;  %v270_v14 = vpop.xlane.xlu0 %269 }
  0xa2   : > { %v287_v15 = vmax.f32 %v279_v11, %v283_v13  ;;  %v274_v16 = vadd.f32 %v270_v14, %v266_v12 }
  0xa4   : > { %289 = vst.msk [vmem:[#allocation3] sm:$0xff] %vm261_vm0, %v287_v15  ;;  %277 = vst.msk [vmem:[#allocation2] sm:$0xff] %vm261_vm0, %v274_v16 }
  0xa5   : > { %v286_v19 = vpop.xlane.xlu1 %285  ;;  %v273_v20 = vpop.xlane.xlu0 %272 }
  0xa6   : > { %v288_v21 = vmax.f32 %v280_v17, %v286_v19  ;;  %v275_v22 = vadd.f32 %v273_v20, %v267_v18 }
  0xa8   : > { %290 = vst.msk [vmem:[#allocation3 + $0x8] sm:$0xff] %vm261_vm0, %v288_v21  ;;  %278 = vst.msk [vmem:[#allocation2 + $0x8] sm:$0xff] %vm261_vm0, %v275_v22 }
  0xab   : > { %v294_v23 = vld [vmem:[#allocation2] sm:$0xff]  ;;  %v298_v24 = vld [vmem:[#allocation3] sm:$0xff] }
  0xac   : > { %v296_v28 = vmul.f32 0.00390625, %v294_v23 }
  0xaf   : > { %v299_v25 = vld [vmem:[#allocation3 + $0x8] sm:$0xff]  ;;  %v295_v26 = vld [vmem:[#allocation2 + $0x8] sm:$0xff] }
  0xb0   : > { %v667_v27 = vpack.i.bf16 %v299_v25, %v298_v24  ;;  %v297_v29 = vmul.f32 0.00390625, %v295_v26 }
  0xb2   : > { %668 = vperm.xlu1 %666, %v667_v27   ;;  %v661_v30 = vpack.i.bf16 %v297_v29, %v296_v28 }
  0xb4   : > { %662 = vperm.xlu0 %660, %v661_v30  }
  0xb6   : > { %329 = vperm.xlu1 %666, %v326_v31  }
  0xba   : > { %413 = vperm.xlu1 %666, %v409_v33  }
  0xbe   : > { %418 = vperm.xlu1 %666, %v410_v34  }
 0x131   : > { %v669_v37 = vpop.permute.xlu1 %668 }
 0x132   : > { %v671_v39 = vunpack.i.h.bf16 %v669_v37  ;;  %v670_v40 = vunpack.i.l.bf16 %v669_v37 }
 0x133   : > { %v663_v38 = vpop.permute.xlu0 %662 }
 0x134   : > { %v665_v41 = vunpack.i.h.bf16 %v663_v38  ;;  %v664_v42 = vunpack.i.l.bf16 %v663_v38 }
 0x135   : > { %v330_v48 = vpop.permute.xlu1 %329 }
 0x136   : > { %v323_v43 = vsel %vm302_vm2, %v664_v42, %v670_v40  ;;  %v324_v44 = vsel %vm302_vm2, %v665_v41, %v671_v39 }
 0x137   : > { %v629_v45 = vpack.c.bf16 %v324_v44, %v323_v43 }
 0x139   : > { %630 = vmatpush3.bf16.msra.mxu0 %v629_v45  ;;  %v414_v54 = vpop.permute.xlu1 %413 }
 0x13c   : > { %621 = vmatmul.mubr.msk.f32.vlgmr.msra.gmra.mrb[0].mxu0 %vm332_vm3, %v325_v46 }
 0x13d   : > { %v419_v55 = vpop.permute.xlu1 %418 }
 0x20f   : > { %v402_v49 = vpop.f32.mrb[0].mxu0 }
 0x210   : > { %v403_v50 = vadd.f32 %v402_v49, %v330_v48  ;;  %v622_v51 = vpop.f32.mrb[1].mxu0 }
 0x212   : > { %v406_v52 = vmax.f32 %v403_v50, 0.0 }
 0x214   : > { %623 = vmatprep.subr.msk.mxu1 %vm428_vm5, %v406_v52 }
 0x215   : > { %624 = vmatpush3.msk.msra.mxu1 %vm428_vm5, %v406_v52 }
 0x216   : > { %626 = vmatmul.mubr.msk.f32.vlgmr.msra.gmra.mrb[0].mxu1 %vm421_vm4, %v408_v53 }
 0x2e9   : > { %v627_v56 = vpop.f32.mrb[0].mxu1 }
 0x2ea   : > { %v504_v57 = vadd.f32 %v627_v56, %v419_v55  ;;  %v498_v58 = vpop.f32.mrb[1].mxu1 }
 0x2eb   : > { %v499_v59 = vadd.f32 %v498_v58, %v414_v54 }
 0x2ec   : > { %v511_v60 = vsel %vm507_vm6, %v504_v57, 0.0 }
 0x2ed   : > { %512 = vadd.xlane.f32.xlu0 %v511_v60  ;;  %v508_v61 = vsel %vm507_vm6, %v499_v59, 0.0 }
 0x2ee   : > { %509 = vadd.xlane.f32.xlu1 %v508_v61 }
 0x37a   : > { %v513_v62 = vpop.xlane.xlu0 %512 }
 0x37b   : > { %v515_v63 = vadd.f32 3.0, %v513_v62  ;;  %v510_v0 = vpop.xlane.xlu1 %509 }
 0x37c   : > { %v514_v1 = vadd.f32 3.0, %v510_v0 }
 0x37d   : > { %v517_v2 = vmax.f32 %v515_v63, 0.0 }
 0x37e   : > { %v516_v3 = vmax.f32 %v514_v1, 0.0 }
 0x37f   : > { %v519_v4 = vmin.f32 %v517_v2, 6.0 }
 0x380   : > { %v518_v5 = vmin.f32 %v516_v3, 6.0 }
 0x381   : > { %v521_v6 = vmul.f32 0.16666667, %v519_v4 }
 0x382   : > { %v520_v7 = vmul.f32 0.16666667, %v518_v5 }
 0x383   : > { %523 = vst.msk [vmem:[%s252_s16 + $0x8] sm:$0xff] %vm261_vm0, %v521_v6 }
 0x384   : > { %522 = vst.msk [vmem:[%s252_s16] sm:$0xff] %vm261_vm0, %v520_v7 }
 0x385 PF: > { %s15_s20 = sadd.s32 1, %s694_s20   ;;  %s802_s18 = smov %s690_s19 }
 0x386   : > { %p12_p5 = scmp.ge.s32.totalorder %s15_s20, 4   ;;  %s803_s19 = smov %s805_s21 }
 0x388   :  { %14 = sbr.rel (!%p12_p5) target bundleno = 2 (0x2), region = 78 }

// kernel: sent_forward.13
= control target key start
LH: loop header
LB: loop body
LE: loop exit
PB: predicated region body
PF: predicated region fallthrough
CT: control target
= control target key end

     0   :  { %15 = vsyncpa [#allocation3], 0  ;;  %s5997_s0 = inlined_call_operand.vmem [shape: f32[2,16,16,16], index: 0, kind: input, shape index: {}]   ;;  %s5998_s1 = inlined_call_operand.vmem [shape: f32[2,16,8,8], index: 1, kind: input, shape index: {}]   ;;  %s5999_s2 = inlined_call_operand.vmem [shape: f32[2,16,3,3], index: 2, kind: input, shape index: {}]   ;;  %s6000_s3 = inlined_call_operand.vmem [shape: f32[2,16,1,1], index: 3, kind: input, shape index: {}]   ;;  %s6001_s4 = inlined_call_operand.vmem [shape: f32[2,16,1,1], index: 4, kind: input, shape index: {}]   ;;  %s6002_s5 = inlined_call_operand.vmem [shape: f32[2,16,1,1], index: 5, kind: input, shape index: {}]   ;;  %s6003_s6 = inlined_call_operand.vmem [shape: bf16[8,16], index: 6, kind: input, shape index: {}]   ;;  %s6004_s7 = inlined_call_operand.vmem [shape: bf16[16,8], index: 7, kind: input, shape index: {}]   ;;  %s6005_s8 = inlined_call_operand.vmem [shape: bf16[3,16], index: 8, kind: input, shape index: {}]   ;;  %s6006_s9 = inlined_call_operand.vmem [shape: bf16[16,3], index: 9, kind: input, shape index: {}]   ;;  %s6007_s10 = inlined_call_operand.hbm [shape: f32[2,16,16,16], index: 10, kind: output, shape index: {}]  }
   0x1   :  { %17 = vsyncpa [#allocation3 + $0x1], 0  ;;  %s5285_s13 = smov 0   ;;  %s5287_s14 = smov 0  }
   0x2   :  { %s5289_s15 = smov 0   ;;  %s5291_s16 = smov 0  }
   0x3   :  { %s5293_s17 = smov 0   ;;  %s5295_s18 = smov 0  }
   0x4 LB: > { %s4332_s19 = sadd.s32 4294967295, %s5221_s18   ;;  %s4333_s20 = sadd.s32 4294967294, %s5221_s18   ;;  %s5221_s18 = sphi %s5295_s18, %s23_s18   ;;  %s5217_s17 = sphi %s5293_s17, %s6014_s17   ;;  %s5213_s16 = sphi %s5291_s16, %s6013_s16   ;;  %s5209_s15 = sphi %s5289_s15, %s6012_s15   ;;  %s5205_s14 = sphi %s5287_s14, %s6011_s14   ;;  %s5201_s13 = sphi %s5285_s13, %s6010_s13  }
   0x5   : > { %s35_s21 = sadd.s32 1, %s5217_s17  ;;  %s296_s22 = sadd.s32 1, %s5209_s15 }
   0x6   : > { %p37_p0 = scmp.ge.s32.totalorder %s35_s21, 2  ;;  %p306_p1 = scmp.ne.s32.totalorder %s5209_s15, %s5205_s14 }
   0x7   : > { %p307_p2 = scmp.eq.s32.totalorder %s4332_s19, 1  ;;  %p312_p3 = scmp.ne.s32.totalorder %s5205_s14, %s5201_s13 }
   0x8   : > { %s6016_s21 = smov (%p37_p0, %s35_s21), 0  ;;  %p313_p5 = scmp.eq.s32.totalorder %s4333_s20, 1 }
   0x9   : > { %p5325_p4 = por %p307_p2, %p306_p1  ;;  %s291_s24 = ssub.s32 %s5217_s17, %s6016_s21 }
   0xa   : > { %p4336_p6 = scmp.ge.s32.totalorder %s5221_s18, 1  ;;  %p294_p7 = scmp.eq.s32.totalorder %s291_s24, 0 }
   0xb   : > { %p5332_p8 = por %p313_p5, %p312_p3  ;;  %p419_p9 = scmp.lt.s32.totalorder %s5221_s18, 3 }
   0xc   : > { %s5338_s26 = scalar_select %p294_p7, %s5209_s15, %s296_s22  }
   0xd   : > { %p420_p10 = pnand %p4336_p6, %p419_p9 }
   0xe   : > { %p505_p11 = scmp.lt.s32.totalorder (!%p420_p10), %s5213_s16, 1  ;;  %v5223_v0 = vmov (!%p420_p10), 0   ;;  %v980_v11 = vld [vmem:[%s6003_s6] sm:$0xf] (!%p420_p10)  ;;  %vm1001_vm0 = vcmask (!%p420_p10), 1043456   ;;  %v5224_v15 = vmov (!%p420_p10), 0.0  }
   0xf   : > { %423 = sbr.rel (%p420_p10) target bundleno = 951 (0x3b7), region = 60  ;;  %5140 = vset.pattern.permute.xlu1 (!%p420_p10), %v5223_v0  ;;  %5139 = vset.pattern.permute.xlu0 (!%p420_p10), %v5223_v0  ;;  %v5367_v12 = vsel (!%p420_p10), %vm1001_vm0, %v980_v11, 0  ;;  %vm5225_vm1 = vmmov (!%p420_p10), 0   ;;  %vm997_vm2 = vcmask (!%p420_p10), 64512   ;;  %vm2665_vm3 = vcmask (!%p420_p10), 1040384  }
  0x10   : > { %4598 = vmatprep.subr.bf16.mxu0 (!%p420_p10), %v5224_v15  ;;  %4600 = vmatprep.mubr.msk.bf16.mxu0 (!%p420_p10), %vm5225_vm1, %v5224_v15  ;;  %vm2666_vm4 = vcmask (!%p420_p10), 1041408   ;;  %vm2661_vm5 = vcmask (!%p420_p10), 23552   ;;  %vm4119_vm6 = vcmask (!%p420_p10), 130048  }
  0x11   : > { %4599 = vmatpush3.bf16.msra.mxu0 (!%p420_p10), %v5367_v12  ;;  %4604 = vmatprep.subr.bf16.mxu1 (!%p420_p10), %v5224_v15 }
  0x12   : > { %4605 = vmatpush3.bf16.msra.mxu1 (!%p420_p10), %v5367_v12  ;;  %4606 = vmatprep.mubr.msk.bf16.mxu1 (!%p420_p10), %vm5225_vm1, %v5224_v15 }
  0x13   : > { %4610 = vmatprep.subr.bf16.mxu0 (!%p420_p10), %v5224_v15  ;;  %4616 = vmatprep.subr.bf16.mxu1 (!%p420_p10), %v5224_v15 }
  0x16   : > { %s5342_s27 = scalar_select %p505_p11, %s5213_s16, 1 }
  0x18   : > { %s5345_s28 = sshll.u32 %s5342_s27, 4  ;;  %s4468_s29 = sshll.u32 %s5342_s27, 6 }
  0x19   : > { %s5351_s11 = scalar_lea.vmem %s6001_s4, %s5345_s28  ;;  %s5389_s24 = scalar_lea.vmem %s6002_s5, %s5345_s28 }
  0x1a   : > { %v4365_v1 = vld [vmem:[%s5351_s11 + $0x2] ss:$0 sm:$0xff]  ;;  %v4363_v2 = vld [vmem:[%s5351_s11] ss:$0 sm:$0xff]  ;;  %v4366_v3 = vld [vmem:[%s5351_s11 + $0x3] ss:$0 sm:$0xff]  ;;  %s5621_s19 = scalar_lea.vmem %s5999_s2, %s4468_s29 }
  0x1b   : > { %909 = vperm.xlu1 %5140, %v4365_v1   ;;  %901 = vperm.xlu0 %5139, %v4363_v2   ;;  %v4364_v4 = vld [vmem:[%s5351_s11 + $0x1] ss:$0 sm:$0xff]  ;;  %v4368_v5 = vld [vmem:[%s5351_s11 + $0x5] ss:$0 sm:$0xff]  ;;  %v4367_v6 = vld [vmem:[%s5351_s11 + $0x4] ss:$0 sm:$0xff] }
  0x1c   : > { %v4370_v7 = vld [vmem:[%s5351_s11 + $0x7] ss:$0 sm:$0xff]  ;;  %v4369_v8 = vld [vmem:[%s5351_s11 + $0x6] ss:$0 sm:$0xff]  ;;  %v4372_v9 = vld [vmem:[%s5351_s11 + $0x9] ss:$0 sm:$0xff] }
  0x1d   : > { %v4371_v10 = vld [vmem:[%s5351_s11 + $0x8] ss:$0 sm:$0xff]  ;;  %v4374_v13 = vld [vmem:[%s5351_s11 + $0xb] ss:$0 sm:$0xff]  ;;  %v4373_v14 = vld [vmem:[%s5351_s11 + $0xa] ss:$0 sm:$0xff] }
  0x1e   : > { %v4376_v16 = vld [vmem:[%s5351_s11 + $0xd] ss:$0 sm:$0xff]  ;;  %v4375_v17 = vld [vmem:[%s5351_s11 + $0xc] ss:$0 sm:$0xff]  ;;  %v4378_v18 = vld [vmem:[%s5351_s11 + $0xf] ss:$0 sm:$0xff] }
  0x1f   : > { %913 = vperm.xlu1 %5140, %v4366_v3   ;;  %905 = vperm.xlu0 %5139, %v4364_v4   ;;  %v4377_v19 = vld [vmem:[%s5351_s11 + $0xe] ss:$0 sm:$0xff]  ;;  %v4413_v20 = vld [vmem:[%s5389_s24 + $0x1] ss:$0 sm:$0xff]  ;;  %v4412_v21 = vld [vmem:[%s5389_s24] ss:$0 sm:$0xff]  ;;  %s5411_s11 = scalar_lea.vmem %s6000_s3, %s5345_s28 }
  0x20   : > { %v4415_v22 = vld [vmem:[%s5389_s24 + $0x3] ss:$0 sm:$0xff]  ;;  %v4414_v23 = vld [vmem:[%s5389_s24 + $0x2] ss:$0 sm:$0xff]  ;;  %v4417_v24 = vld [vmem:[%s5389_s24 + $0x5] ss:$0 sm:$0xff] }
  0x21   : > { %v4416_v25 = vld [vmem:[%s5389_s24 + $0x4] ss:$0 sm:$0xff]  ;;  %v4419_v26 = vld [vmem:[%s5389_s24 + $0x7] ss:$0 sm:$0xff]  ;;  %v4418_v27 = vld [vmem:[%s5389_s24 + $0x6] ss:$0 sm:$0xff] }
  0x22   : > { %v4421_v28 = vld [vmem:[%s5389_s24 + $0x9] ss:$0 sm:$0xff]  ;;  %v4420_v29 = vld [vmem:[%s5389_s24 + $0x8] ss:$0 sm:$0xff]  ;;  %v4423_v30 = vld [vmem:[%s5389_s24 + $0xb] ss:$0 sm:$0xff] }
  0x23   : > { %921 = vperm.xlu1 %5140, %v4368_v5   ;;  %917 = vperm.xlu0 %5139, %v4367_v6   ;;  %v4422_v31 = vld [vmem:[%s5389_s24 + $0xa] ss:$0 sm:$0xff]  ;;  %v4425_v32 = vld [vmem:[%s5389_s24 + $0xd] ss:$0 sm:$0xff]  ;;  %v4424_v33 = vld [vmem:[%s5389_s24 + $0xc] ss:$0 sm:$0xff] }
  0x24   : > { %v4427_v34 = vld [vmem:[%s5389_s24 + $0xf] ss:$0 sm:$0xff]  ;;  %v4426_v35 = vld [vmem:[%s5389_s24 + $0xe] ss:$0 sm:$0xff]  ;;  %v4348_v36 = vld [vmem:[%s5411_s11 + $0x1] ss:$0 sm:$0xff] }
  0x25   : > { %v4347_v37 = vld [vmem:[%s5411_s11] ss:$0 sm:$0xff]  ;;  %v4350_v38 = vld [vmem:[%s5411_s11 + $0x3] ss:$0 sm:$0xff]  ;;  %v4349_v39 = vld [vmem:[%s5411_s11 + $0x2] ss:$0 sm:$0xff] }
  0x26   : > { %v4352_v40 = vld [vmem:[%s5411_s11 + $0x5] ss:$0 sm:$0xff]  ;;  %v4351_v41 = vld [vmem:[%s5411_s11 + $0x4] ss:$0 sm:$0xff]  ;;  %v4354_v42 = vld [vmem:[%s5411_s11 + $0x7] ss:$0 sm:$0xff] }
  0x27   : > { %929 = vperm.xlu1 %5140, %v4370_v7   ;;  %925 = vperm.xlu0 %5139, %v4369_v8   ;;  %v4353_v43 = vld [vmem:[%s5411_s11 + $0x6] ss:$0 sm:$0xff]  ;;  %v4356_v44 = vld [vmem:[%s5411_s11 + $0x9] ss:$0 sm:$0xff]  ;;  %v4355_v45 = vld [vmem:[%s5411_s11 + $0x8] ss:$0 sm:$0xff] }
  0x28   : > { %v4358_v46 = vld [vmem:[%s5411_s11 + $0xb] ss:$0 sm:$0xff]  ;;  %v4357_v47 = vld [vmem:[%s5411_s11 + $0xa] ss:$0 sm:$0xff]  ;;  %v4360_v48 = vld [vmem:[%s5411_s11 + $0xd] ss:$0 sm:$0xff] }
  0x29   : > { %v4359_v49 = vld [vmem:[%s5411_s11 + $0xc] ss:$0 sm:$0xff]  ;;  %v4362_v50 = vld [vmem:[%s5411_s11 + $0xf] ss:$0 sm:$0xff]  ;;  %v4361_v51 = vld [vmem:[%s5411_s11 + $0xe] ss:$0 sm:$0xff] }
  0x2a   : > { %s4467_s28 = sshll.u32 %s5342_s27, 7  ;;  %s4466_s24 = sshll.u32 %s5342_s27, 8 }
  0x2b   : > { %937 = vperm.xlu1 %5140, %v4372_v9   ;;  %933 = vperm.xlu0 %5139, %v4371_v10   ;;  %s5433_s20 = scalar_lea.vmem %s5998_s1, %s4467_s28  ;;  %s5837_s11 = scalar_lea.vmem %s5997_s0, %s4466_s24 }
  0x2c   : > { %v788_v52 = vld [vmem:[%s5433_s20] sm:$0xff]  ;;  %v790_v55 = vld [vmem:[%s5433_s20 + $0x10] sm:$0xff]  ;;  %v789_v56 = vld [vmem:[%s5433_s20 + $0x8] sm:$0xff]  ;;  %s501_s28 = sand.u32 1, %s5205_s14  }
  0x2d   : > { %v791_v63 = vld [vmem:[%s5433_s20 + $0x18] sm:$0xff]  ;;  %v792_v4 = vld [vmem:[%s5433_s20 + $0x20] sm:$0xff]  ;;  %v793_v8 = vld [vmem:[%s5433_s20 + $0x28] sm:$0xff]  ;;  %s4337_s12 = sshll.u32 %s501_s28, 8 }
  0x2e   : > { %s5846_s27 = scalar_lea.vmem [#allocation2], %s4337_s12 }
  0x2f   : > { %945 = vperm.xlu1 %5140, %v4374_v13   ;;  %941 = vperm.xlu0 %5139, %v4373_v14   ;;  %v794_v13 = vld [vmem:[%s5433_s20 + $0x30] sm:$0xff] }
  0x33   : > { %953 = vperm.xlu1 %5140, %v4376_v16   ;;  %949 = vperm.xlu0 %5139, %v4375_v17  }
  0x37   : > { %961 = vperm.xlu1 %5140, %v4378_v18   ;;  %957 = vperm.xlu0 %5139, %v4377_v19   ;;  %v795_v18 = vld [vmem:[%s5433_s20 + $0x38] sm:$0xff] }
  0x3b   : > { %2569 = vperm.xlu1 %5140, %v4413_v20   ;;  %2565 = vperm.xlu0 %5139, %v4412_v21  }
  0x3f   : > { %2577 = vperm.xlu1 %5140, %v4415_v22   ;;  %2573 = vperm.xlu0 %5139, %v4414_v23   ;;  %v796_v22 = vld [vmem:[%s5433_s20 + $0x40] sm:$0xff] }
  0x43   : > { %2585 = vperm.xlu1 %5140, %v4417_v24   ;;  %2581 = vperm.xlu0 %5139, %v4416_v25  }
  0x47   : > { %2593 = vperm.xlu1 %5140, %v4419_v26   ;;  %2589 = vperm.xlu0 %5139, %v4418_v27   ;;  %v797_v26 = vld [vmem:[%s5433_s20 + $0x48] sm:$0xff] }
  0x4b   : > { %2601 = vperm.xlu1 %5140, %v4421_v28   ;;  %2597 = vperm.xlu0 %5139, %v4420_v29  }
  0x4f   : > { %2609 = vperm.xlu1 %5140, %v4423_v30   ;;  %2605 = vperm.xlu0 %5139, %v4422_v31   ;;  %v798_v30 = vld [vmem:[%s5433_s20 + $0x50] sm:$0xff] }
  0x53   : > { %2617 = vperm.xlu1 %5140, %v4425_v32   ;;  %2613 = vperm.xlu0 %5139, %v4424_v33  }
  0x57   : > { %2625 = vperm.xlu1 %5140, %v4427_v34   ;;  %2621 = vperm.xlu0 %5139, %v4426_v35   ;;  %v799_v34 = vld [vmem:[%s5433_s20 + $0x58] sm:$0xff] }
  0x5b   : > { %697 = vperm.xlu1 %5140, %v4348_v36   ;;  %693 = vperm.xlu0 %5139, %v4347_v37  }
  0x5f   : > { %705 = vperm.xlu1 %5140, %v4350_v38   ;;  %701 = vperm.xlu0 %5139, %v4349_v39   ;;  %v800_v38 = vld [vmem:[%s5433_s20 + $0x60] sm:$0xff] }
  0x63   : > { %713 = vperm.xlu1 %5140, %v4352_v40   ;;  %709 = vperm.xlu0 %5139, %v4351_v41  }
  0x67   : > { %721 = vperm.xlu1 %5140, %v4354_v42   ;;  %717 = vperm.xlu0 %5139, %v4353_v43   ;;  %v801_v42 = vld [vmem:[%s5433_s20 + $0x68] sm:$0xff] }
  0x6b   : > { %729 = vperm.xlu1 %5140, %v4356_v44   ;;  %725 = vperm.xlu0 %5139, %v4355_v45  }
  0x6f   : > { %737 = vperm.xlu1 %5140, %v4358_v46   ;;  %733 = vperm.xlu0 %5139, %v4357_v47   ;;  %v802_v46 = vld [vmem:[%s5433_s20 + $0x70] sm:$0xff] }
  0x73   : > { %745 = vperm.xlu1 %5140, %v4360_v48   ;;  %741 = vperm.xlu0 %5139, %v4359_v49  }
  0x77   : > { %753 = vperm.xlu1 %5140, %v4362_v50   ;;  %749 = vperm.xlu0 %5139, %v4361_v51   ;;  %v803_v50 = vld [vmem:[%s5433_s20 + $0x78] sm:$0xff]  ;;  %s4169_s20 = sshll.u32 %s5846_s27, 4  ;;  %s5943_s20 = int_to_ptr.vmem [resolvable:$true] %s4169_s20 }
  0x78   : > { %s5143_s30 = scalar_lea.vmem %s5943_s20, 4096 }
  0x79   : > { %p5144_p12 = scmp.ne.s32.totalorder %s5943_s20, %s5143_s30 }
  0x7b   : > { %p5145_p13 = pnand %p5144_p12, %p5325_p4 }
  0x7d   : > { %p5146_p0 = pneg %p5145_p13 }
  0x9a   : > { %v902_v53 = vpop.permute.xlu0 %901  ;;  %v910_v58 = vpop.permute.xlu1 %909 }
  0x9b   : > { %v964_v54 = vmul.f32 %v902_v53, %v788_v52  ;;  %v966_v60 = vmul.f32 %v910_v58, %v790_v55 }
  0x9d   : > { %v981_v57 = vpack.c.bf16 %v964_v54, %v964_v54  ;;  %v983_v0 = vpack.c.bf16 %v966_v60, %v966_v60 }
  0x9e   : > { %v906_v59 = vpop.permute.xlu0 %905  ;;  %v914_v1 = vpop.permute.xlu1 %913 }
  0x9f   : > { %v965_v61 = vmul.f32 %v906_v59, %v789_v56  ;;  %4601 = vmatmul.mubr.msk.bf16.vlgmr.msra.gmra.mrb[0].mxu0 %vm997_vm2, %v981_v57  ;;  %v967_v2 = vmul.f32 %v914_v1, %v791_v63  ;;  %v5531_v59 = vld [vmem:[%s6004_s7] sm:$0xff]  }
  0xa0   : > { %4611 = vmatpush3.bf16.msra.mxu0 %v5367_v12  ;;  %4612 = vmatprep.mubr.msk.bf16.mxu0 %vm5225_vm1, %v5224_v15 }
  0xa1   : > { %v982_v62 = vpack.c.bf16 %v965_v61, %v965_v61  ;;  %4622 = vmatprep.subr.bf16.mxu0 %v5224_v15  ;;  %v984_v5 = vpack.c.bf16 %v967_v2, %v967_v2 }
  0xa2   : > { %v918_v3 = vpop.permute.xlu0 %917  ;;  %v922_v7 = vpop.permute.xlu1 %921 }
  0xa3   : > { %4607 = vmatmul.mubr.msk.bf16.vlgmr.msra.gmra.mrb[0].mxu1 %vm997_vm2, %v982_v62  ;;  %v968_v6 = vmul.f32 %v918_v3, %v792_v4  ;;  %v969_v9 = vmul.f32 %v922_v7, %v793_v8 }
  0xa4   : > { %4617 = vmatpush3.bf16.msra.mxu1 %v5367_v12  ;;  %4618 = vmatprep.mubr.msk.bf16.mxu1 %vm5225_vm1, %v5224_v15 }
  0xa5   : > { %4628 = vmatprep.subr.bf16.mxu1 %v5224_v15  ;;  %v985_v10 = vpack.c.bf16 %v968_v6, %v968_v6  ;;  %v986_v14 = vpack.c.bf16 %v969_v9, %v969_v9 }
  0xa6   : > { %v926_v11 = vpop.permute.xlu0 %925  ;;  %v930_v17 = vpop.permute.xlu1 %929 }
  0xa7   : > { %4613 = vmatmul.mubr.msk.bf16.vlgmr.msra.gmra.mrb[4].mxu0 %vm997_vm2, %v983_v0  ;;  %v970_v16 = vmul.f32 %v926_v11, %v794_v13  ;;  %v971_v19 = vmul.f32 %v930_v17, %v795_v18 }
  0xa8   : > { %4623 = vmatpush3.bf16.msra.mxu0 %v5367_v12  ;;  %4624 = vmatprep.mubr.msk.bf16.mxu0 %vm5225_vm1, %v5224_v15 }
  0xa9   : > { %4634 = vmatprep.subr.bf16.mxu0 %v5224_v15  ;;  %v987_v20 = vpack.c.bf16 %v970_v16, %v970_v16  ;;  %v988_v23 = vpack.c.bf16 %v971_v19, %v971_v19 }
  0xaa   : > { %v934_v21 = vpop.permute.xlu0 %933  ;;  %v938_v25 = vpop.permute.xlu1 %937 }
  0xab   : > { %4619 = vmatmul.mubr.msk.bf16.vlgmr.msra.gmra.mrb[4].mxu1 %vm997_vm2, %v984_v5  ;;  %v972_v24 = vmul.f32 %v934_v21, %v796_v22  ;;  %v973_v27 = vmul.f32 %v938_v25, %v797_v26 }
  0xac   : > { %4629 = vmatpush3.bf16.msra.mxu1 %v5367_v12  ;;  %4630 = vmatprep.mubr.msk.bf16.mxu1 %vm5225_vm1, %v5224_v15 }
  0xad   : > { %4640 = vmatprep.subr.bf16.mxu1 %v5224_v15  ;;  %v989_v28 = vpack.c.bf16 %v972_v24, %v972_v24  ;;  %v990_v31 = vpack.c.bf16 %v973_v27, %v973_v27 }
  0xae   : > { %v942_v29 = vpop.permute.xlu0 %941  ;;  %v946_v33 = vpop.permute.xlu1 %945 }
  0xaf   : > { %4625 = vmatmul.mubr.msk.bf16.vlgmr.msra.gmra.mrb[8].mxu0 %vm997_vm2, %v985_v10  ;;  %v974_v32 = vmul.f32 %v942_v29, %v798_v30  ;;  %v975_v35 = vmul.f32 %v946_v33, %v799_v34 }
  0xb0   : > { %4635 = vmatpush3.bf16.msra.mxu0 %v5367_v12  ;;  %4636 = vmatprep.mubr.msk.bf16.mxu0 %vm5225_vm1, %v5224_v15 }
  0xb1   : > { %4646 = vmatprep.subr.bf16.mxu0 %v5224_v15  ;;  %v991_v36 = vpack.c.bf16 %v974_v32, %v974_v32  ;;  %v992_v39 = vpack.c.bf16 %v975_v35, %v975_v35 }
  0xb2   : > { %v950_v37 = vpop.permute.xlu0 %949  ;;  %v954_v41 = vpop.permute.xlu1 %953 }
  0xb3   : > { %4631 = vmatmul.mubr.msk.bf16.vlgmr.msra.gmra.mrb[8].mxu1 %vm997_vm2, %v986_v14  ;;  %v976_v40 = vmul.f32 %v950_v37, %v800_v38  ;;  %v977_v43 = vmul.f32 %v954_v41, %v801_v42 }
  0xb4   : > { %4641 = vmatpush3.bf16.msra.mxu1 %v5367_v12  ;;  %4642 = vmatprep.mubr.msk.bf16.mxu1 %vm5225_vm1, %v5224_v15 }
  0xb5   : > { %4652 = vmatprep.subr.bf16.mxu1 %v5224_v15  ;;  %v993_v44 = vpack.c.bf16 %v976_v40, %v976_v40  ;;  %v994_v47 = vpack.c.bf16 %v977_v43, %v977_v43 }
  0xb6   : > { %v958_v45 = vpop.permute.xlu0 %957  ;;  %v962_v49 = vpop.permute.xlu1 %961 }
  0xb7   : > { %4637 = vmatmul.mubr.msk.bf16.vlgmr.msra.gmra.mrb[12].mxu0 %vm997_vm2, %v987_v20  ;;  %v978_v48 = vmul.f32 %v958_v45, %v802_v46  ;;  %v979_v51 = vmul.f32 %v962_v49, %v803_v50 }
  0xb8   : > { %4647 = vmatpush3.bf16.msra.mxu0 %v5367_v12  ;;  %4648 = vmatprep.mubr.msk.bf16.mxu0 %vm5225_vm1, %v5224_v15 }
  0xb9   : > { %4658 = vmatprep.subr.bf16.mxu0 %v5224_v15  ;;  %v995_v52 = vpack.c.bf16 %v978_v48, %v978_v48  ;;  %v996_v53 = vpack.c.bf16 %v979_v51, %v979_v51 }
  0xbb   : > { %4643 = vmatmul.mubr.msk.bf16.vlgmr.msra.gmra.mrb[12].mxu1 %vm997_vm2, %v988_v23 }
  0xbc   : > { %4653 = vmatpush3.bf16.msra.mxu1 %v5367_v12  ;;  %4654 = vmatprep.mubr.msk.bf16.mxu1 %vm5225_vm1, %v5224_v15 }
  0xbd   : > { %4664 = vmatprep.subr.bf16.mxu1 %v5224_v15 }
  0xbf   : > { %4649 = vmatmul.mubr.msk.bf16.vlgmr.msra.gmra.mrb[16].mxu0 %vm997_vm2, %v989_v28 }
  0xc0   : > { %4659 = vmatpush3.bf16.msra.mxu0 %v5367_v12  ;;  %4660 = vmatprep.mubr.msk.bf16.mxu0 %vm5225_vm1, %v5224_v15 }
  0xc1   : > { %4670 = vmatprep.subr.bf16.mxu0 %v5224_v15 }
  0xc3   : > { %4655 = vmatmul.mubr.msk.bf16.vlgmr.msra.gmra.mrb[16].mxu1 %vm997_vm2, %v990_v31 }
  0xc4   : > { %4665 = vmatpush3.bf16.msra.mxu1 %v5367_v12  ;;  %4666 = vmatprep.mubr.msk.bf16.mxu1 %vm5225_vm1, %v5224_v15 }
  0xc5   : > { %4676 = vmatprep.subr.bf16.mxu1 %v5224_v15 }
  0xc7   : > { %4661 = vmatmul.mubr.msk.bf16.vlgmr.msra.gmra.mrb[20].mxu0 %vm997_vm2, %v991_v36 }
  0xc8   : > { %4671 = vmatpush3.bf16.msra.mxu0 %v5367_v12  ;;  %4672 = vmatprep.mubr.msk.bf16.mxu0 %vm5225_vm1, %v5224_v15 }
  0xc9   : > { %4682 = vmatprep.subr.bf16.mxu0 %v5224_v15 }
  0xcb   : > { %4667 = vmatmul.mubr.msk.bf16.vlgmr.msra.gmra.mrb[20].mxu1 %vm997_vm2, %v992_v39 }
  0xcc   : > { %4677 = vmatpush3.bf16.msra.mxu1 %v5367_v12  ;;  %4678 = vmatprep.mubr.msk.bf16.mxu1 %vm5225_vm1, %v5224_v15 }
  0xcd   : > { %4688 = vmatprep.subr.bf16.mxu1 %v5224_v15 }
  0xcf   : > { %4673 = vmatmul.mubr.msk.bf16.vlgmr.msra.gmra.mrb[24].mxu0 %vm997_vm2, %v993_v44 }
  0xd0   : > { %4683 = vmatpush3.bf16.msra.mxu0 %v5367_v12  ;;  %4684 = vmatprep.mubr.msk.bf16.mxu0 %vm5225_vm1, %v5224_v15 }
  0xd1   : > { %4694 = vmatprep.subr.bf16.mxu0 %v5224_v15 }
  0xd3   : > { %4679 = vmatmul.mubr.msk.bf16.vlgmr.msra.gmra.mrb[24].mxu1 %vm997_vm2, %v994_v47 }
  0xd4   : > { %4689 = vmatpush3.bf16.msra.mxu1 %v5367_v12  ;;  %4690 = vmatprep.mubr.msk.bf16.mxu1 %vm5225_vm1, %v5224_v15 }
  0xd5   : > { %4700 = vmatprep.subr.bf16.mxu1 %v5224_v15 }
  0xd7   : > { %4685 = vmatmul.mubr.msk.bf16.vlgmr.msra.gmra.mrb[28].mxu0 %vm997_vm2, %v995_v52 }
  0xd8   : > { %4696 = vmatprep.mubr.msk.bf16.mxu0 %vm5225_vm1, %v5224_v15 }
  0xdb   : > { %4691 = vmatmul.mubr.msk.bf16.vlgmr.msra.gmra.mrb[28].mxu1 %vm997_vm2, %v996_v53 }
  0xdc   : > { %4702 = vmatprep.mubr.msk.bf16.mxu1 %vm5225_vm1, %v5224_v15 }
 0x172   : > { %v1039_v54 = vpop.f32.mrb[0].mxu0 }
 0x173   : > { %v1692_v12 = vpack.c.bf16 %v1039_v54, %v1039_v54  ;;  %v4602_v55 = vpop.f32.mrb[1].mxu0 }
 0x174   : > { %v1042_v56 = vpop.f32.mrb[2].mxu0 }
 0x175   : > { %v1717_v57 = vsel %vm1001_vm0, %v1692_v12, 0  ;;  %v4603_v58 = vpop.f32.mrb[3].mxu0 }
 0x176   : > { %v1082_v60 = vpop.f32.mrb[0].mxu1  ;;  %4695 = vmatpush3.bf16.msra.mxu0 %v1717_v57 }
 0x177   : > { %v1693_v61 = vpack.c.bf16 %v1082_v60, %v1082_v60  ;;  %v4608_v62 = vpop.f32.mrb[1].mxu1  ;;  %4706 = vmatprep.subr.bf16.mxu0 %v5224_v15 }
 0x178   : > { %v1085_v63 = vpop.f32.mrb[2].mxu1 }
 0x179   : > { %v1761_v0 = vsel %vm1001_vm0, %v1693_v61, 0  ;;  %v4609_v1 = vpop.f32.mrb[3].mxu1  ;;  %4697 = vmatmul.mubr.msk.bf16.vlgmr.msra.gmra.mrb[32].mxu0 %vm997_vm2, %v5531_v59 }
 0x17a   : > { %v1125_v2 = vpop.f32.mrb[4].mxu0  ;;  %4701 = vmatpush3.bf16.msra.mxu1 %v1761_v0  ;;  %4708 = vmatprep.mubr.msk.bf16.mxu0 %vm5225_vm1, %v5224_v15 }
 0x17b   : > { %v1694_v3 = vpack.c.bf16 %v1125_v2, %v1125_v2  ;;  %v4614_v4 = vpop.f32.mrb[5].mxu0  ;;  %4712 = vmatprep.subr.bf16.mxu1 %v5224_v15 }
 0x17c   : > { %v1128_v5 = vpop.f32.mrb[6].mxu0 }
 0x17d   : > { %v1805_v6 = vsel %vm1001_vm0, %v1694_v3, 0  ;;  %v4615_v7 = vpop.f32.mrb[7].mxu0  ;;  %4703 = vmatmul.mubr.msk.bf16.vlgmr.msra.gmra.mrb[32].mxu1 %vm997_vm2, %v5531_v59 }
 0x17e   : > { %v1168_v8 = vpop.f32.mrb[4].mxu1  ;;  %4707 = vmatpush3.bf16.msra.mxu0 %v1805_v6  ;;  %4714 = vmatprep.mubr.msk.bf16.mxu1 %vm5225_vm1, %v5224_v15 }
 0x17f   : > { %v1695_v9 = vpack.c.bf16 %v1168_v8, %v1168_v8  ;;  %v4620_v10 = vpop.f32.mrb[5].mxu1  ;;  %4718 = vmatprep.subr.bf16.mxu0 %v5224_v15 }
 0x180   : > { %v1171_v11 = vpop.f32.mrb[6].mxu1  ;;  %v5226_v10 = vmov 65535  }
 0x181   : > { %v1849_v13 = vsel %vm1001_vm0, %v1695_v9, 0  ;;  %v4621_v14 = vpop.f32.mrb[7].mxu1  ;;  %4709 = vmatmul.mubr.msk.bf16.vlgmr.msra.gmra.mrb[36].mxu0 %vm997_vm2, %v5531_v59  ;;  %v2667_v11 = vsel %vm2665_vm3, 4294967295, %v5226_v10  ;;  %v2463_v10 = vld [vmem:[%s5621_s19 + $0x2c] sm:$0x7] }
 0x182   : > { %v1211_v16 = vpop.f32.mrb[8].mxu0  ;;  %4713 = vmatpush3.bf16.msra.mxu1 %v1849_v13  ;;  %4720 = vmatprep.mubr.msk.bf16.mxu0 %vm5225_vm1, %v5224_v15 }
 0x183   : > { %v1696_v17 = vpack.c.bf16 %v1211_v16, %v1211_v16  ;;  %v4626_v18 = vpop.f32.mrb[9].mxu0  ;;  %4724 = vmatprep.subr.bf16.mxu1 %v5224_v15 }
 0x184   : > { %v1214_v19 = vpop.f32.mrb[10].mxu0 }
 0x185   : > { %v1893_v20 = vsel %vm1001_vm0, %v1696_v17, 0  ;;  %v4627_v21 = vpop.f32.mrb[11].mxu0  ;;  %4715 = vmatmul.mubr.msk.bf16.vlgmr.msra.gmra.mrb[36].mxu1 %vm997_vm2, %v5531_v59  ;;  %v2644_v19 = vld [vmem:[%s6005_s8] sm:$0x3] }
 0x186   : > { %v1254_v22 = vpop.f32.mrb[8].mxu1  ;;  %4719 = vmatpush3.bf16.msra.mxu0 %v1893_v20  ;;  %4726 = vmatprep.mubr.msk.bf16.mxu1 %vm5225_vm1, %v5224_v15  ;;  %v5616_v20 = vsel %vm2666_vm4, %v2667_v11, 0 }
 0x187   : > { %v1697_v23 = vpack.c.bf16 %v1254_v22, %v1254_v22  ;;  %v4632_v24 = vpop.f32.mrb[9].mxu1  ;;  %4730 = vmatprep.subr.bf16.mxu0 %v5224_v15 }
 0x188   : > { %v1257_v25 = vpop.f32.mrb[10].mxu1 }
 0x189   : > { %v1937_v26 = vsel %vm1001_vm0, %v1697_v23, 0  ;;  %v4633_v27 = vpop.f32.mrb[11].mxu1  ;;  %4721 = vmatmul.mubr.msk.bf16.vlgmr.msra.gmra.mrb[40].mxu0 %vm997_vm2, %v5531_v59  ;;  %v5629_v25 = vand.u32 %v5616_v20, %v2644_v19 }
 0x18a   : > { %v1297_v28 = vpop.f32.mrb[12].mxu0  ;;  %4725 = vmatpush3.bf16.msra.mxu1 %v1937_v26  ;;  %4732 = vmatprep.mubr.msk.bf16.mxu0 %vm5225_vm1, %v5224_v15 }
 0x18b   : > { %v1698_v29 = vpack.c.bf16 %v1297_v28, %v1297_v28  ;;  %v4638_v30 = vpop.f32.mrb[13].mxu0  ;;  %4736 = vmatprep.subr.bf16.mxu1 %v5224_v15  ;;  %v2566_v28 = vpop.permute.xlu0 %2565 }
 0x18c   : > { %v1300_v31 = vpop.f32.mrb[14].mxu0 }
 0x18d   : > { %v1981_v32 = vsel %vm1001_vm0, %v1698_v29, 0  ;;  %v4639_v33 = vpop.f32.mrb[15].mxu0  ;;  %4727 = vmatmul.mubr.msk.bf16.vlgmr.msra.gmra.mrb[40].mxu1 %vm997_vm2, %v5531_v59  ;;  %v2452_v29 = vld [vmem:[%s5621_s19] sm:$0x7] }
 0x18e   : > { %v1340_v34 = vpop.f32.mrb[12].mxu1  ;;  %4731 = vmatpush3.bf16.msra.mxu0 %v1981_v32  ;;  %4738 = vmatprep.mubr.msk.bf16.mxu1 %vm5225_vm1, %v5224_v15  ;;  %v2628_v33 = vmul.f32 %v2566_v28, %v2452_v29 }
 0x18f   : > { %v1699_v35 = vpack.c.bf16 %v1340_v34, %v1340_v34  ;;  %v4644_v36 = vpop.f32.mrb[13].mxu1  ;;  %4742 = vmatprep.subr.bf16.mxu0 %v5224_v15  ;;  %v2570_v34 = vpop.permute.xlu1 %2569 }
 0x190   : > { %v1343_v37 = vpop.f32.mrb[14].mxu1 }
 0x191   : > { %v2025_v38 = vsel %vm1001_vm0, %v1699_v35, 0  ;;  %v4645_v39 = vpop.f32.mrb[15].mxu1  ;;  %4733 = vmatmul.mubr.msk.bf16.vlgmr.msra.gmra.mrb[44].mxu0 %vm997_vm2, %v5531_v59  ;;  %v2453_v35 = vld [vmem:[%s5621_s19 + $0x4] sm:$0x7]  ;;  %v2645_v37 = vpack.c.bf16 %v2628_v33, %v2628_v33 }
 0x192   : > { %v1383_v40 = vpop.f32.mrb[16].mxu0  ;;  %4737 = vmatpush3.bf16.msra.mxu1 %v2025_v38  ;;  %4744 = vmatprep.mubr.msk.bf16.mxu0 %vm5225_vm1, %v5224_v15  ;;  %v2629_v36 = vmul.f32 %v2570_v34, %v2453_v35  ;;  %v2574_v38 = vpop.permute.xlu0 %2573  ;;  %v2454_v39 = vld [vmem:[%s5621_s19 + $0x8] sm:$0x7] }
 0x193   : > { %v1700_v41 = vpack.c.bf16 %v1383_v40, %v1383_v40  ;;  %v4650_v42 = vpop.f32.mrb[17].mxu0  ;;  %4748 = vmatprep.subr.bf16.mxu1 %v5224_v15  ;;  %v2630_v40 = vmul.f32 %v2574_v38, %v2454_v39 }
 0x194   : > { %v1386_v43 = vpop.f32.mrb[18].mxu0  ;;  %v2455_v42 = vld [vmem:[%s5621_s19 + $0xc] sm:$0x7] }
 0x195   : > { %v2069_v44 = vsel %vm1001_vm0, %v1700_v41, 0  ;;  %v4651_v45 = vpop.f32.mrb[19].mxu0  ;;  %4739 = vmatmul.mubr.msk.bf16.vlgmr.msra.gmra.mrb[44].mxu1 %vm997_vm2, %v5531_v59  ;;  %v2578_v41 = vpop.permute.xlu1 %2577 }
 0x196   : > { %v1426_v46 = vpop.f32.mrb[16].mxu1  ;;  %4743 = vmatpush3.bf16.msra.mxu0 %v2069_v44  ;;  %4750 = vmatprep.mubr.msk.bf16.mxu1 %vm5225_vm1, %v5224_v15  ;;  %v2631_v43 = vmul.f32 %v2578_v41, %v2455_v42  ;;  %v2647_v44 = vpack.c.bf16 %v2630_v40, %v2630_v40  ;;  %v2582_v45 = vpop.permute.xlu0 %2581 }
 0x197   : > { %v1701_v47 = vpack.c.bf16 %v1426_v46, %v1426_v46  ;;  %v4656_v48 = vpop.f32.mrb[17].mxu1  ;;  %4754 = vmatprep.subr.bf16.mxu0 %v5224_v15  ;;  %v2456_v46 = vld [vmem:[%s5621_s19 + $0x10] sm:$0x7] }
 0x198   : > { %v1429_v49 = vpop.f32.mrb[18].mxu1  ;;  %v2632_v48 = vmul.f32 %v2582_v45, %v2456_v46 }
 0x199   : > { %v2113_v50 = vsel %vm1001_vm0, %v1701_v47, 0  ;;  %v4657_v51 = vpop.f32.mrb[19].mxu1  ;;  %4745 = vmatmul.mubr.msk.bf16.vlgmr.msra.gmra.mrb[48].mxu0 %vm997_vm2, %v5531_v59  ;;  %v2648_v47 = vpack.c.bf16 %v2631_v43, %v2631_v43  ;;  %v2586_v49 = vpop.permute.xlu1 %2585 }
 0x19a   : > { %v1469_v52 = vpop.f32.mrb[20].mxu0  ;;  %4749 = vmatpush3.bf16.msra.mxu1 %v2113_v50  ;;  %4756 = vmatprep.mubr.msk.bf16.mxu0 %vm5225_vm1, %v5224_v15  ;;  %v2457_v50 = vld [vmem:[%s5621_s19 + $0x14] sm:$0x7] }
 0x19b   : > { %v1702_v53 = vpack.c.bf16 %v1469_v52, %v1469_v52  ;;  %v4662_v54 = vpop.f32.mrb[21].mxu0  ;;  %4760 = vmatprep.subr.bf16.mxu1 %v5224_v15  ;;  %v2633_v51 = vmul.f32 %v2586_v49, %v2457_v50  ;;  %v2649_v52 = vpack.c.bf16 %v2632_v48, %v2632_v48 }
 0x19c   : > { %v1472_v12 = vpop.f32.mrb[22].mxu0  ;;  %v2458_v54 = vld [vmem:[%s5621_s19 + $0x18] sm:$0x7] }
 0x19d   : > { %v2157_v55 = vsel %vm1001_vm0, %v1702_v53, 0  ;;  %v4663_v56 = vpop.f32.mrb[23].mxu0  ;;  %4751 = vmatmul.mubr.msk.bf16.vlgmr.msra.gmra.mrb[48].mxu1 %vm997_vm2, %v5531_v59  ;;  %v2590_v53 = vpop.permute.xlu0 %2589  ;;  %v2650_v12 = vpack.c.bf16 %v2633_v51, %v2633_v51 }
 0x19e   : > { %v1512_v57 = vpop.f32.mrb[20].mxu1  ;;  %4755 = vmatpush3.bf16.msra.mxu0 %v2157_v55  ;;  %4762 = vmatprep.mubr.msk.bf16.mxu1 %vm5225_vm1, %v5224_v15  ;;  %v2634_v55 = vmul.f32 %v2590_v53, %v2458_v54  ;;  %v2594_v56 = vpop.permute.xlu1 %2593 }
 0x19f   : > { %v1703_v58 = vpack.c.bf16 %v1512_v57, %v1512_v57  ;;  %v4668_v60 = vpop.f32.mrb[21].mxu1  ;;  %4766 = vmatprep.subr.bf16.mxu0 %v5224_v15  ;;  %v2459_v57 = vld [vmem:[%s5621_s19 + $0x1c] sm:$0x7] }
 0x1a0   : > { %v1515_v61 = vpop.f32.mrb[22].mxu1  ;;  %v2651_v60 = vpack.c.bf16 %v2634_v55, %v2634_v55 }
 0x1a1   : > { %v2201_v62 = vsel %vm1001_vm0, %v1703_v58, 0  ;;  %v4669_v63 = vpop.f32.mrb[23].mxu1  ;;  %4757 = vmatmul.mubr.msk.bf16.vlgmr.msra.gmra.mrb[52].mxu0 %vm997_vm2, %v5531_v59  ;;  %v2635_v58 = vmul.f32 %v2594_v56, %v2459_v57  ;;  %v2598_v61 = vpop.permute.xlu0 %2597 }
 0x1a2   : > { %v1555_v0 = vpop.f32.mrb[24].mxu0  ;;  %4761 = vmatpush3.bf16.msra.mxu1 %v2201_v62  ;;  %4768 = vmatprep.mubr.msk.bf16.mxu0 %vm5225_vm1, %v5224_v15  ;;  %v2460_v62 = vld [vmem:[%s5621_s19 + $0x20] sm:$0x7] }
 0x1a3   : > { %v1704_v1 = vpack.c.bf16 %v1555_v0, %v1555_v0  ;;  %v4674_v2 = vpop.f32.mrb[25].mxu0  ;;  %4772 = vmatprep.subr.bf16.mxu1 %v5224_v15  ;;  %v2652_v63 = vpack.c.bf16 %v2635_v58, %v2635_v58  ;;  %v2636_v0 = vmul.f32 %v2598_v61, %v2460_v62 }
 0x1a4   : > { %v1558_v3 = vpop.f32.mrb[26].mxu0  ;;  %v2461_v2 = vld [vmem:[%s5621_s19 + $0x24] sm:$0x7] }
 0x1a5   : > { %v2245_v4 = vsel %vm1001_vm0, %v1704_v1, 0  ;;  %v4675_v5 = vpop.f32.mrb[27].mxu0  ;;  %4763 = vmatmul.mubr.msk.bf16.vlgmr.msra.gmra.mrb[52].mxu1 %vm997_vm2, %v5531_v59  ;;  %v2602_v1 = vpop.permute.xlu1 %2601 }
 0x1a6   : > { %v1598_v6 = vpop.f32.mrb[24].mxu1  ;;  %4767 = vmatpush3.bf16.msra.mxu0 %v2245_v4  ;;  %4774 = vmatprep.mubr.msk.bf16.mxu1 %vm5225_vm1, %v5224_v15  ;;  %v2637_v3 = vmul.f32 %v2602_v1, %v2461_v2  ;;  %v2653_v4 = vpack.c.bf16 %v2636_v0, %v2636_v0  ;;  %v2606_v5 = vpop.permute.xlu0 %2605 }
 0x1a7   : > { %v1705_v7 = vpack.c.bf16 %v1598_v6, %v1598_v6  ;;  %v4680_v8 = vpop.f32.mrb[25].mxu1  ;;  %4778 = vmatprep.subr.bf16.mxu0 %v5224_v15  ;;  %v2462_v6 = vld [vmem:[%s5621_s19 + $0x28] sm:$0x7] }
 0x1a8   : > { %v1601_v9 = vpop.f32.mrb[26].mxu1  ;;  %v2638_v8 = vmul.f32 %v2606_v5, %v2462_v6 }
 0x1a9   : > { %v2289_v13 = vsel %vm1001_vm0, %v1705_v7, 0  ;;  %v4681_v14 = vpop.f32.mrb[27].mxu1  ;;  %4769 = vmatmul.mubr.msk.bf16.vlgmr.msra.gmra.mrb[56].mxu0 %vm997_vm2, %v5531_v59  ;;  %v2654_v7 = vpack.c.bf16 %v2637_v3, %v2637_v3  ;;  %v2610_v9 = vpop.permute.xlu1 %2609 }
 0x1aa   : > { %v1641_v16 = vpop.f32.mrb[28].mxu0  ;;  %4773 = vmatpush3.bf16.msra.mxu1 %v2289_v13  ;;  %4780 = vmatprep.mubr.msk.bf16.mxu0 %vm5225_vm1, %v5224_v15  ;;  %v2639_v11 = vmul.f32 %v2610_v9, %v2463_v10  ;;  %v2655_v13 = vpack.c.bf16 %v2638_v8, %v2638_v8  ;;  %v2614_v14 = vpop.permute.xlu0 %2613 }
 0x1ab   : > { %v1706_v17 = vpack.c.bf16 %v1641_v16, %v1641_v16  ;;  %v4686_v18 = vpop.f32.mrb[29].mxu0  ;;  %4784 = vmatprep.subr.bf16.mxu1 %v5224_v15  ;;  %v2464_v16 = vld [vmem:[%s5621_s19 + $0x30] sm:$0x7] }
 0x1ac   : > { %v1644_v21 = vpop.f32.mrb[30].mxu0  ;;  %v2640_v18 = vmul.f32 %v2614_v14, %v2464_v16 }
 0x1ad   : > { %v2333_v22 = vsel %vm1001_vm0, %v1706_v17, 0  ;;  %v4687_v23 = vpop.f32.mrb[31].mxu0  ;;  %4775 = vmatmul.mubr.msk.bf16.vlgmr.msra.gmra.mrb[56].mxu1 %vm997_vm2, %v5531_v59  ;;  %v2656_v17 = vpack.c.bf16 %v2639_v11, %v2639_v11  ;;  %v2618_v19 = vpop.permute.xlu1 %2617  ;;  %v2465_v21 = vld [vmem:[%s5621_s19 + $0x34] sm:$0x7] }
 0x1ae   : > { %v1684_v24 = vpop.f32.mrb[28].mxu1  ;;  %4779 = vmatpush3.bf16.msra.mxu0 %v2333_v22  ;;  %4786 = vmatprep.mubr.msk.bf16.mxu1 %vm5225_vm1, %v5224_v15  ;;  %v2641_v22 = vmul.f32 %v2618_v19, %v2465_v21  ;;  %v2657_v23 = vpack.c.bf16 %v2640_v18, %v2640_v18 }
 0x1af   : > { %v1707_v26 = vpack.c.bf16 %v1684_v24, %v1684_v24  ;;  %v4692_v27 = vpop.f32.mrb[29].mxu1  ;;  %4790 = vmatprep.subr.bf16.mxu0 %v5224_v15  ;;  %v2622_v24 = vpop.permute.xlu0 %2621 }
 0x1b0   : > { %v1687_v30 = vpop.f32.mrb[30].mxu1  ;;  %v2658_v27 = vpack.c.bf16 %v2641_v22, %v2641_v22 }
 0x1b1   : > { %v2377_v31 = vsel %vm1001_vm0, %v1707_v26, 0  ;;  %v4693_v32 = vpop.f32.mrb[31].mxu1  ;;  %4781 = vmatmul.mubr.msk.bf16.vlgmr.msra.gmra.mrb[60].mxu0 %vm997_vm2, %v5531_v59  ;;  %v2466_v26 = vld [vmem:[%s5621_s19 + $0x38] sm:$0x7]  ;;  %v2626_v29 = vpop.permute.xlu1 %2625  ;;  %v2467_v30 = vld [vmem:[%s5621_s19 + $0x3c] sm:$0x7] }
 0x1b2   : > { %4785 = vmatpush3.bf16.msra.mxu1 %v2377_v31  ;;  %4791 = vmatpush3.bf16.msra.mxu0 %v5629_v25  ;;  %v2642_v28 = vmul.f32 %v2622_v24, %v2466_v26  ;;  %v2643_v31 = vmul.f32 %v2626_v29, %v2467_v30  ;;  %s4469_s19 = sshll.u32 %s5213_s16, 12  ;;  %s5951_s16 = scalar_lea.sflag [#allocation3], %s501_s28 }
 0x1b3   : > { %4792 = vmatprep.mubr.msk.bf16.mxu0 %vm5225_vm1, %v5224_v15  ;;  %4796 = vmatprep.subr.bf16.mxu1 %v5224_v15  ;;  %s5941_s29 = scalar_lea.hbm %s6007_s10, %s4469_s19 }
 0x1b4   : > { %4802 = vmatprep.subr.bf16.mxu0 %v5224_v15  ;;  %v2659_v32 = vpack.c.bf16 %v2642_v28, %v2642_v28  ;;  %v2660_v33 = vpack.c.bf16 %v2643_v31, %v2643_v31 }
 0x1b5   : > { %4787 = vmatmul.mubr.msk.bf16.vlgmr.msra.gmra.mrb[60].mxu1 %vm997_vm2, %v5531_v59  ;;  %v2646_v59 = vpack.c.bf16 %v2629_v36, %v2629_v36 }
 0x1b6   : > { %4797 = vmatpush3.bf16.msra.mxu1 %v5629_v25  ;;  %4798 = vmatprep.mubr.msk.bf16.mxu1 %vm5225_vm1, %v5224_v15 }
 0x1b7   : > { %4808 = vmatprep.subr.bf16.mxu1 %v5224_v15 }
 0x1b9   : > { %4793 = vmatmul.mubr.msk.bf16.vlgmr.msra.gmra.mrb[64].mxu0 %vm2661_vm5, %v2645_v37 }
 0x1ba   : > { %4803 = vmatpush3.bf16.msra.mxu0 %v5629_v25  ;;  %4804 = vmatprep.mubr.msk.bf16.mxu0 %vm5225_vm1, %v5224_v15 }
 0x1bb   : > { %4814 = vmatprep.subr.bf16.mxu0 %v5224_v15 }
 0x1bd   : > { %4799 = vmatmul.mubr.msk.bf16.vlgmr.msra.gmra.mrb[64].mxu1 %vm2661_vm5, %v2646_v59  ;;  %v5742_v59 = vld [vmem:[%s6006_s9] sm:$0xff]  }
 0x1be   : > { %4809 = vmatpush3.bf16.msra.mxu1 %v5629_v25  ;;  %4810 = vmatprep.mubr.msk.bf16.mxu1 %vm5225_vm1, %v5224_v15 }
 0x1bf   : > { %4820 = vmatprep.subr.bf16.mxu1 %v5224_v15 }
 0x1c1   : > { %4805 = vmatmul.mubr.msk.bf16.vlgmr.msra.gmra.mrb[68].mxu0 %vm2661_vm5, %v2647_v44 }
 0x1c2   : > { %4815 = vmatpush3.bf16.msra.mxu0 %v5629_v25  ;;  %4816 = vmatprep.mubr.msk.bf16.mxu0 %vm5225_vm1, %v5224_v15 }
 0x1c3   : > { %4826 = vmatprep.subr.bf16.mxu0 %v5224_v15 }
 0x1c5   : > { %4811 = vmatmul.mubr.msk.bf16.vlgmr.msra.gmra.mrb[68].mxu1 %vm2661_vm5, %v2648_v47 }
 0x1c6   : > { %4821 = vmatpush3.bf16.msra.mxu1 %v5629_v25  ;;  %4822 = vmatprep.mubr.msk.bf16.mxu1 %vm5225_vm1, %v5224_v15 }
 0x1c7   : > { %4832 = vmatprep.subr.bf16.mxu1 %v5224_v15 }
 0x1c9   : > { %4817 = vmatmul.mubr.msk.bf16.vlgmr.msra.gmra.mrb[72].mxu0 %vm2661_vm5, %v2649_v52 }
 0x1ca   : > { %4827 = vmatpush3.bf16.msra.mxu0 %v5629_v25  ;;  %4828 = vmatprep.mubr.msk.bf16.mxu0 %vm5225_vm1, %v5224_v15 }
 0x1cb   : > { %4838 = vmatprep.subr.bf16.mxu0 %v5224_v15 }
 0x1cd   : > { %4823 = vmatmul.mubr.msk.bf16.vlgmr.msra.gmra.mrb[72].mxu1 %vm2661_vm5, %v2650_v12 }
 0x1ce   : > { %4833 = vmatpush3.bf16.msra.mxu1 %v5629_v25  ;;  %4834 = vmatprep.mubr.msk.bf16.mxu1 %vm5225_vm1, %v5224_v15 }
 0x1cf   : > { %4844 = vmatprep.subr.bf16.mxu1 %v5224_v15 }
 0x1d1   : > { %4829 = vmatmul.mubr.msk.bf16.vlgmr.msra.gmra.mrb[76].mxu0 %vm2661_vm5, %v2651_v60 }
 0x1d2   : > { %4839 = vmatpush3.bf16.msra.mxu0 %v5629_v25  ;;  %4840 = vmatprep.mubr.msk.bf16.mxu0 %vm5225_vm1, %v5224_v15 }
 0x1d3   : > { %4850 = vmatprep.subr.bf16.mxu0 %v5224_v15 }
 0x1d5   : > { %4835 = vmatmul.mubr.msk.bf16.vlgmr.msra.gmra.mrb[76].mxu1 %vm2661_vm5, %v2652_v63 }
 0x1d6   : > { %4845 = vmatpush3.bf16.msra.mxu1 %v5629_v25  ;;  %4846 = vmatprep.mubr.msk.bf16.mxu1 %vm5225_vm1, %v5224_v15 }
 0x1d7   : > { %4856 = vmatprep.subr.bf16.mxu1 %v5224_v15 }
 0x1d9   : > { %4841 = vmatmul.mubr.msk.bf16.vlgmr.msra.gmra.mrb[80].mxu0 %vm2661_vm5, %v2653_v4 }
 0x1da   : > { %4851 = vmatpush3.bf16.msra.mxu0 %v5629_v25  ;;  %4852 = vmatprep.mubr.msk.bf16.mxu0 %vm5225_vm1, %v5224_v15 }
 0x1db   : > { %4862 = vmatprep.subr.bf16.mxu0 %v5224_v15 }
 0x1dd   : > { %4847 = vmatmul.mubr.msk.bf16.vlgmr.msra.gmra.mrb[80].mxu1 %vm2661_vm5, %v2654_v7 }
 0x1de   : > { %4857 = vmatpush3.bf16.msra.mxu1 %v5629_v25  ;;  %4858 = vmatprep.mubr.msk.bf16.mxu1 %vm5225_vm1, %v5224_v15 }
 0x1df   : > { %4868 = vmatprep.subr.bf16.mxu1 %v5224_v15 }
 0x1e1   : > { %4853 = vmatmul.mubr.msk.bf16.vlgmr.msra.gmra.mrb[84].mxu0 %vm2661_vm5, %v2655_v13 }
 0x1e2   : > { %4863 = vmatpush3.bf16.msra.mxu0 %v5629_v25  ;;  %4864 = vmatprep.mubr.msk.bf16.mxu0 %vm5225_vm1, %v5224_v15 }
 0x1e3   : > { %4874 = vmatprep.subr.bf16.mxu0 %v5224_v15 }
 0x1e5   : > { %4859 = vmatmul.mubr.msk.bf16.vlgmr.msra.gmra.mrb[84].mxu1 %vm2661_vm5, %v2656_v17 }
 0x1e6   : > { %4869 = vmatpush3.bf16.msra.mxu1 %v5629_v25  ;;  %4870 = vmatprep.mubr.msk.bf16.mxu1 %vm5225_vm1, %v5224_v15 }
 0x1e7   : > { %4880 = vmatprep.subr.bf16.mxu1 %v5224_v15 }
 0x1e9   : > { %4865 = vmatmul.mubr.msk.bf16.vlgmr.msra.gmra.mrb[88].mxu0 %vm2661_vm5, %v2657_v23 }
 0x1ea   : > { %4875 = vmatpush3.bf16.msra.mxu0 %v5629_v25  ;;  %4876 = vmatprep.mubr.msk.bf16.mxu0 %vm5225_vm1, %v5224_v15 }
 0x1eb   : > { %4886 = vmatprep.subr.bf16.mxu0 %v5224_v15 }
 0x1ed   : > { %4871 = vmatmul.mubr.msk.bf16.vlgmr.msra.gmra.mrb[88].mxu1 %vm2661_vm5, %v2658_v27 }
 0x1ee   : > { %4881 = vmatpush3.bf16.msra.mxu1 %v5629_v25  ;;  %4882 = vmatprep.mubr.msk.bf16.mxu1 %vm5225_vm1, %v5224_v15 }
 0x1ef   : > { %4892 = vmatprep.subr.bf16.mxu1 %v5224_v15 }
 0x1f1   : > { %4877 = vmatmul.mubr.msk.bf16.vlgmr.msra.gmra.mrb[92].mxu0 %vm2661_vm5, %v2659_v32 }
 0x1f2   : > { %4888 = vmatprep.mubr.msk.bf16.mxu0 %vm5225_vm1, %v5224_v15 }
 0x1f5   : > { %4883 = vmatmul.mubr.msk.bf16.vlgmr.msra.gmra.mrb[92].mxu1 %vm2661_vm5, %v2660_v33 }
 0x1f6   : > { %4894 = vmatprep.mubr.msk.bf16.mxu1 %vm5225_vm1, %v5224_v15 }
 0x28c   : > { %v2706_v34 = vpop.f32.mrb[64].mxu0 }
 0x28d   : > { %v3359_v25 = vpack.c.bf16 %v2706_v34, %v2706_v34  ;;  %v4794_v35 = vpop.f32.mrb[65].mxu0 }
 0x28e   : > { %v2709_v36 = vpop.f32.mrb[66].mxu0 }
 0x28f   : > { %v3384_v37 = vand.u32 %v3359_v25, %v5616_v20  ;;  %v4795_v38 = vpop.f32.mrb[67].mxu0 }
 0x290   : > { %v2749_v39 = vpop.f32.mrb[64].mxu1 }
 0x291   : > { %v3360_v40 = vpack.c.bf16 %v2749_v39, %v2749_v39  ;;  %v4800_v41 = vpop.f32.mrb[65].mxu1  ;;  %4887 = vmatpush3.bf16.msra.mxu0 %v3384_v37 }
 0x292   : > { %v2752_v42 = vpop.f32.mrb[66].mxu1  ;;  %4898 = vmatprep.subr.bf16.mxu0 %v5224_v15 }
 0x293   : > { %v3428_v43 = vand.u32 %v3360_v40, %v5616_v20  ;;  %v4801_v44 = vpop.f32.mrb[67].mxu1 }
 0x294   : > { %v2792_v45 = vpop.f32.mrb[68].mxu0  ;;  %4889 = vmatmul.mubr.msk.bf16.vlgmr.msra.gmra.mrb[32].mxu0 %vm2661_vm5, %v5742_v59 }
 0x295   : > { %v3361_v46 = vpack.c.bf16 %v2792_v45, %v2792_v45  ;;  %v4806_v47 = vpop.f32.mrb[69].mxu0  ;;  %4893 = vmatpush3.bf16.msra.mxu1 %v3428_v43  ;;  %4900 = vmatprep.mubr.msk.bf16.mxu0 %vm5225_vm1, %v5224_v15 }
 0x296   : > { %v2795_v48 = vpop.f32.mrb[70].mxu0  ;;  %4904 = vmatprep.subr.bf16.mxu1 %v5224_v15 }
 0x297   : > { %v3472_v49 = vand.u32 %v3361_v46, %v5616_v20  ;;  %v4807_v50 = vpop.f32.mrb[71].mxu0 }
 0x298   : > { %v2835_v51 = vpop.f32.mrb[68].mxu1  ;;  %4895 = vmatmul.mubr.msk.bf16.vlgmr.msra.gmra.mrb[32].mxu1 %vm2661_vm5, %v5742_v59 }
 0x299   : > { %v3362_v52 = vpack.c.bf16 %v2835_v51, %v2835_v51  ;;  %v4812_v53 = vpop.f32.mrb[69].mxu1  ;;  %4899 = vmatpush3.bf16.msra.mxu0 %v3472_v49  ;;  %4906 = vmatprep.mubr.msk.bf16.mxu1 %vm5225_vm1, %v5224_v15 }
 0x29a   : > { %v2838_v54 = vpop.f32.mrb[70].mxu1  ;;  %4910 = vmatprep.subr.bf16.mxu0 %v5224_v15 }
 0x29b   : > { %v3516_v12 = vand.u32 %v3362_v52, %v5616_v20  ;;  %v4813_v55 = vpop.f32.mrb[71].mxu1 }
 0x29c   : > { %v2878_v56 = vpop.f32.mrb[72].mxu0  ;;  %4901 = vmatmul.mubr.msk.bf16.vlgmr.msra.gmra.mrb[36].mxu0 %vm2661_vm5, %v5742_v59 }
 0x29d   : > { %v3363_v57 = vpack.c.bf16 %v2878_v56, %v2878_v56  ;;  %v4818_v58 = vpop.f32.mrb[73].mxu0  ;;  %4905 = vmatpush3.bf16.msra.mxu1 %v3516_v12  ;;  %4912 = vmatprep.mubr.msk.bf16.mxu0 %vm5225_vm1, %v5224_v15 }
 0x29e   : > { %v2881_v60 = vpop.f32.mrb[74].mxu0  ;;  %4916 = vmatprep.subr.bf16.mxu1 %v5224_v15 }
 0x29f   : > { %v3560_v61 = vand.u32 %v3363_v57, %v5616_v20  ;;  %v4819_v62 = vpop.f32.mrb[75].mxu0 }
 0x2a0   : > { %v2921_v63 = vpop.f32.mrb[72].mxu1  ;;  %4907 = vmatmul.mubr.msk.bf16.vlgmr.msra.gmra.mrb[36].mxu1 %vm2661_vm5, %v5742_v59 }
 0x2a1   : > { %v3364_v0 = vpack.c.bf16 %v2921_v63, %v2921_v63  ;;  %v4824_v1 = vpop.f32.mrb[73].mxu1  ;;  %4911 = vmatpush3.bf16.msra.mxu0 %v3560_v61  ;;  %4918 = vmatprep.mubr.msk.bf16.mxu1 %vm5225_vm1, %v5224_v15 }
 0x2a2   : > { %v2924_v2 = vpop.f32.mrb[74].mxu1  ;;  %4922 = vmatprep.subr.bf16.mxu0 %v5224_v15 }
 0x2a3   : > { %v3604_v3 = vand.u32 %v3364_v0, %v5616_v20  ;;  %v4825_v4 = vpop.f32.mrb[75].mxu1 }
 0x2a4   : > { %v2964_v5 = vpop.f32.mrb[76].mxu0  ;;  %4913 = vmatmul.mubr.msk.bf16.vlgmr.msra.gmra.mrb[40].mxu0 %vm2661_vm5, %v5742_v59  ;;  %v565_v4 = vld [vmem:[%s5837_s11 + $0x8] sm:$0xff] }
 0x2a5   : > { %v3365_v6 = vpack.c.bf16 %v2964_v5, %v2964_v5  ;;  %v4830_v7 = vpop.f32.mrb[77].mxu0  ;;  %4917 = vmatpush3.bf16.msra.mxu1 %v3604_v3  ;;  %4924 = vmatprep.mubr.msk.bf16.mxu0 %vm5225_vm1, %v5224_v15 }
 0x2a6   : > { %v2967_v8 = vpop.f32.mrb[78].mxu0  ;;  %4928 = vmatprep.subr.bf16.mxu1 %v5224_v15 }
 0x2a7   : > { %v3648_v9 = vand.u32 %v3365_v6, %v5616_v20  ;;  %v4831_v10 = vpop.f32.mrb[79].mxu0  ;;  %v698_v6 = vpop.permute.xlu1 %697 }
 0x2a8   : > { %v3007_v11 = vpop.f32.mrb[76].mxu1  ;;  %4919 = vmatmul.mubr.msk.bf16.vlgmr.msra.gmra.mrb[40].mxu1 %vm2661_vm5, %v5742_v59 }
 0x2a9   : > { %v3366_v13 = vpack.c.bf16 %v3007_v11, %v3007_v11  ;;  %v4836_v14 = vpop.f32.mrb[77].mxu1  ;;  %4923 = vmatpush3.bf16.msra.mxu0 %v3648_v9  ;;  %4930 = vmatprep.mubr.msk.bf16.mxu1 %vm5225_vm1, %v5224_v15  ;;  %v567_v11 = vld [vmem:[%s5837_s11 + $0x18] sm:$0xff] }
 0x2aa   : > { %v3010_v16 = vpop.f32.mrb[78].mxu1  ;;  %4934 = vmatprep.subr.bf16.mxu0 %v5224_v15 }
 0x2ab   : > { %v3692_v17 = vand.u32 %v3366_v13, %v5616_v20  ;;  %v4837_v18 = vpop.f32.mrb[79].mxu1 }
 0x2ac   : > { %v3050_v19 = vpop.f32.mrb[80].mxu0  ;;  %4925 = vmatmul.mubr.msk.bf16.vlgmr.msra.gmra.mrb[44].mxu0 %vm2661_vm5, %v5742_v59 }
 0x2ad   : > { %v3367_v21 = vpack.c.bf16 %v3050_v19, %v3050_v19  ;;  %v4842_v22 = vpop.f32.mrb[81].mxu0  ;;  %4929 = vmatpush3.bf16.msra.mxu1 %v3692_v17  ;;  %4936 = vmatprep.mubr.msk.bf16.mxu0 %vm5225_vm1, %v5224_v15  ;;  %v568_v19 = vld [vmem:[%s5837_s11 + $0x20] sm:$0xff] }
 0x2ae   : > { %v3053_v23 = vpop.f32.mrb[82].mxu0  ;;  %4940 = vmatprep.subr.bf16.mxu1 %v5224_v15  ;;  %v759_v22 = vmul.f32 %v698_v6, %v567_v11 }
 0x2af   : > { %v3736_v24 = vand.u32 %v3367_v21, %v5616_v20  ;;  %v4843_v26 = vpop.f32.mrb[83].mxu0 }
 0x2b0   : > { %v3093_v27 = vpop.f32.mrb[80].mxu1  ;;  %4931 = vmatmul.mubr.msk.bf16.vlgmr.msra.gmra.mrb[44].mxu1 %vm2661_vm5, %v5742_v59  ;;  %v569_v26 = vld [vmem:[%s5837_s11 + $0x28] sm:$0xff] }
 0x2b1   : > { %v3368_v28 = vpack.c.bf16 %v3093_v27, %v3093_v27  ;;  %v4848_v29 = vpop.f32.mrb[81].mxu1  ;;  %4935 = vmatpush3.bf16.msra.mxu0 %v3736_v24  ;;  %4942 = vmatprep.mubr.msk.bf16.mxu1 %vm5225_vm1, %v5224_v15 }
 0x2b2   : > { %v3096_v30 = vpop.f32.mrb[82].mxu1  ;;  %4946 = vmatprep.subr.bf16.mxu0 %v5224_v15 }
 0x2b3   : > { %v3780_v31 = vand.u32 %v3368_v28, %v5616_v20  ;;  %v4849_v32 = vpop.f32.mrb[83].mxu1 }
 0x2b4   : > { %v3136_v33 = vpop.f32.mrb[84].mxu0  ;;  %4937 = vmatmul.mubr.msk.bf16.vlgmr.msra.gmra.mrb[48].mxu0 %vm2661_vm5, %v5742_v59  ;;  %v570_v32 = vld [vmem:[%s5837_s11 + $0x30] sm:$0xff] }
 0x2b5   : > { %v3369_v34 = vpack.c.bf16 %v3136_v33, %v3136_v33  ;;  %v4854_v25 = vpop.f32.mrb[85].mxu0  ;;  %4941 = vmatpush3.bf16.msra.mxu1 %v3780_v31  ;;  %4948 = vmatprep.mubr.msk.bf16.mxu0 %vm5225_vm1, %v5224_v15  ;;  %v706_v31 = vpop.permute.xlu1 %705 }
 0x2b6   : > { %v3139_v35 = vpop.f32.mrb[86].mxu0  ;;  %4952 = vmatprep.subr.bf16.mxu1 %v5224_v15 }
 0x2b7   : > { %v3824_v36 = vand.u32 %v3369_v34, %v5616_v20  ;;  %v4855_v37 = vpop.f32.mrb[87].mxu0 }
 0x2b8   : > { %v3179_v38 = vpop.f32.mrb[84].mxu1  ;;  %4943 = vmatmul.mubr.msk.bf16.vlgmr.msra.gmra.mrb[48].mxu1 %vm2661_vm5, %v5742_v59 }
 0x2b9   : > { %v3370_v39 = vpack.c.bf16 %v3179_v38, %v3179_v38  ;;  %v4860_v40 = vpop.f32.mrb[85].mxu1  ;;  %4947 = vmatpush3.bf16.msra.mxu0 %v3824_v36  ;;  %4954 = vmatprep.mubr.msk.bf16.mxu1 %vm5225_vm1, %v5224_v15  ;;  %v571_v36 = vld [vmem:[%s5837_s11 + $0x38] sm:$0xff]  ;;  %v762_v38 = vmul.f32 %v706_v31, %v570_v32 }
 0x2ba   : > { %v3182_v41 = vpop.f32.mrb[86].mxu1  ;;  %4958 = vmatprep.subr.bf16.mxu0 %v5224_v15 }
 0x2bb   : > { %v3868_v42 = vand.u32 %v3370_v39, %v5616_v20  ;;  %v4861_v43 = vpop.f32.mrb[87].mxu1 }
 0x2bc   : > { %v3222_v44 = vpop.f32.mrb[88].mxu0  ;;  %4949 = vmatmul.mubr.msk.bf16.vlgmr.msra.gmra.mrb[52].mxu0 %vm2661_vm5, %v5742_v59 }
 0x2bd   : > { %v3371_v45 = vpack.c.bf16 %v3222_v44, %v3222_v44  ;;  %v4866_v46 = vpop.f32.mrb[89].mxu0  ;;  %4953 = vmatpush3.bf16.msra.mxu1 %v3868_v42  ;;  %4960 = vmatprep.mubr.msk.bf16.mxu0 %vm5225_vm1, %v5224_v15  ;;  %v572_v42 = vld [vmem:[%s5837_s11 + $0x40] sm:$0xff]  ;;  %v763_v44 = vmul.f32 %v706_v31, %v571_v36 }
 0x2be   : > { %v3225_v47 = vpop.f32.mrb[90].mxu0  ;;  %4964 = vmatprep.subr.bf16.mxu1 %v5224_v15 }
 0x2bf   : > { %v3912_v48 = vand.u32 %v3371_v45, %v5616_v20  ;;  %v4867_v49 = vpop.f32.mrb[91].mxu0  ;;  %v573_v47 = vld [vmem:[%s5837_s11 + $0x48] sm:$0xff] }
 0x2c0   : > { %v3265_v50 = vpop.f32.mrb[88].mxu1  ;;  %4955 = vmatmul.mubr.msk.bf16.vlgmr.msra.gmra.mrb[52].mxu1 %vm2661_vm5, %v5742_v59 }
 0x2c1   : > { %v3372_v51 = vpack.c.bf16 %v3265_v50, %v3265_v50  ;;  %v4872_v52 = vpop.f32.mrb[89].mxu1  ;;  %4959 = vmatpush3.bf16.msra.mxu0 %v3912_v48  ;;  %4966 = vmatprep.mubr.msk.bf16.mxu1 %vm5225_vm1, %v5224_v15 }
 0x2c2   : > { %v3268_v53 = vpop.f32.mrb[90].mxu1  ;;  %4970 = vmatprep.subr.bf16.mxu0 %v5224_v15  ;;  %v714_v52 = vpop.permute.xlu1 %713 }
 0x2c3   : > { %v3956_v54 = vand.u32 %v3372_v51, %v5616_v20  ;;  %v4873_v12 = vpop.f32.mrb[91].mxu1  ;;  %v574_v53 = vld [vmem:[%s5837_s11 + $0x50] sm:$0xff] }
 0x2c4   : > { %v3308_v55 = vpop.f32.mrb[92].mxu0  ;;  %4961 = vmatmul.mubr.msk.bf16.vlgmr.msra.gmra.mrb[56].mxu0 %vm2661_vm5, %v5742_v59 }
 0x2c5   : > { %v3373_v56 = vpack.c.bf16 %v3308_v55, %v3308_v55  ;;  %v4878_v57 = vpop.f32.mrb[93].mxu0  ;;  %4965 = vmatpush3.bf16.msra.mxu1 %v3956_v54  ;;  %4972 = vmatprep.mubr.msk.bf16.mxu0 %vm5225_vm1, %v5224_v15 }
 0x2c6   : > { %v3311_v58 = vpop.f32.mrb[94].mxu0  ;;  %4976 = vmatprep.subr.bf16.mxu1 %v5224_v15  ;;  %v575_v57 = vld [vmem:[%s5837_s11 + $0x58] sm:$0xff] }
 0x2c7   : > { %v4000_v60 = vand.u32 %v3373_v56, %v5616_v20  ;;  %v4879_v61 = vpop.f32.mrb[95].mxu0 }
 0x2c8   : > { %v3351_v62 = vpop.f32.mrb[92].mxu1  ;;  %4967 = vmatmul.mubr.msk.bf16.vlgmr.msra.gmra.mrb[56].mxu1 %vm2661_vm5, %v5742_v59 }
 0x2c9   : > { %v3374_v63 = vpack.c.bf16 %v3351_v62, %v3351_v62  ;;  %v4884_v0 = vpop.f32.mrb[93].mxu1  ;;  %4971 = vmatpush3.bf16.msra.mxu0 %v4000_v60  ;;  %4978 = vmatprep.mubr.msk.bf16.mxu1 %vm5225_vm1, %v5224_v15  ;;  %v694_v15 = vpop.permute.xlu0 %693  ;;  %v766_v60 = vmul.f32 %v714_v52, %v574_v53 }
 0x2ca   : > { %v3354_v1 = vpop.f32.mrb[94].mxu1  ;;  %v757_v8 = vmul.f32 %v694_v15, %v565_v4  ;;  %v576_v0 = vld [vmem:[%s5837_s11 + $0x60] sm:$0xff] }
 0x2cb   : > { %v4044_v2 = vand.u32 %v3374_v63, %v5616_v20  ;;  %v4885_v3 = vpop.f32.mrb[95].mxu1  ;;  %v564_v20 = vld [vmem:[%s5837_s11] sm:$0xff] }
 0x2cc   : > { %4973 = vmatmul.mubr.msk.bf16.vlgmr.msra.gmra.mrb[60].mxu0 %vm2661_vm5, %v5742_v59  ;;  %v756_v5 = vmul.f32 %v694_v15, %v564_v20  ;;  %v577_v20 = vld [vmem:[%s5837_s11 + $0x68] sm:$0xff] }
 0x2cd   : > { %4977 = vmatpush3.bf16.msra.mxu1 %v4044_v2  ;;  %v702_v18 = vpop.permute.xlu0 %701  ;;  %v767_v2 = vmul.f32 %v714_v52, %v575_v57 }
 0x2ce   : > { %v760_v28 = vmul.f32 %v702_v18, %v568_v19  ;;  %v761_v34 = vmul.f32 %v702_v18, %v569_v26 }
 0x2d0   : > { %4979 = vmatmul.mubr.msk.bf16.vlgmr.msra.gmra.mrb[60].mxu1 %vm2661_vm5, %v5742_v59  ;;  %v566_v59 = vld [vmem:[%s5837_s11 + $0x10] sm:$0xff] }
 0x2d1   : > { %v758_v14 = vmul.f32 %v698_v6, %v566_v59  ;;  %v710_v41 = vpop.permute.xlu0 %709 }
 0x2d2   : > { %v764_v49 = vmul.f32 %v710_v41, %v572_v42  ;;  %v765_v12 = vmul.f32 %v710_v41, %v573_v47 }
 0x2d5   : > { %v718_v63 = vpop.permute.xlu0 %717 }
 0x367   : > { %v3420_v7 = vpop.f32.mrb[32].mxu0 }
 0x368   : > { %v4982_v9 = vadd.f32 %v3420_v7, %v756_v5  ;;  %v4890_v10 = vpop.f32.mrb[33].mxu0  ;;  %v768_v5 = vmul.f32 %v718_v63, %v576_v0  ;;  %v722_v7 = vpop.permute.xlu1 %721 }
 0x369   : > { %v3423_v13 = vpop.f32.mrb[34].mxu0  ;;  %v769_v10 = vmul.f32 %v718_v63, %v577_v20 }
 0x36a   : > { %4120 = vst.msk [vmem:[%s5846_s27] sm:$0xff] %vm4119_vm6, %v4982_v9  ;;  %v4983_v16 = vadd.f32 %v3423_v13, %v757_v8  ;;  %v4891_v17 = vpop.f32.mrb[35].mxu0  ;;  %v578_v8 = vld [vmem:[%s5837_s11 + $0x70] sm:$0xff] }
 0x36b   : > { %v3464_v21 = vpop.f32.mrb[32].mxu1  ;;  %v770_v17 = vmul.f32 %v722_v7, %v578_v8 }
 0x36c   : > { %4121 = vst.msk [vmem:[%s5846_s27 + $0x8] sm:$0xff] %vm4119_vm6, %v4983_v16  ;;  %v4984_v23 = vadd.f32 %v3464_v21, %v758_v14  ;;  %v4896_v24 = vpop.f32.mrb[33].mxu1  ;;  %v579_v14 = vld [vmem:[%s5837_s11 + $0x78] sm:$0xff]  ;;  %v726_v21 = vpop.permute.xlu0 %725 }
 0x36d   : > { %v3467_v27 = vpop.f32.mrb[34].mxu1  ;;  %v771_v24 = vmul.f32 %v722_v7, %v579_v14 }
 0x36e   : > { %4122 = vst.msk [vmem:[%s5846_s27 + $0x10] sm:$0xff] %vm4119_vm6, %v4984_v23  ;;  %v4985_v29 = vadd.f32 %v3467_v27, %v759_v22  ;;  %v4897_v30 = vpop.f32.mrb[35].mxu1  ;;  %v580_v22 = vld [vmem:[%s5837_s11 + $0x80] sm:$0xff] }
 0x36f   : > { %v3508_v33 = vpop.f32.mrb[36].mxu0  ;;  %v772_v30 = vmul.f32 %v726_v21, %v580_v22 }
 0x370   : > { %4123 = vst.msk [vmem:[%s5846_s27 + $0x18] sm:$0xff] %vm4119_vm6, %v4985_v29  ;;  %v4986_v25 = vadd.f32 %v3508_v33, %v760_v28  ;;  %v4902_v35 = vpop.f32.mrb[37].mxu0  ;;  %v581_v28 = vld [vmem:[%s5837_s11 + $0x88] sm:$0xff]  ;;  %v730_v33 = vpop.permute.xlu1 %729 }
 0x371   : > { %v3511_v37 = vpop.f32.mrb[38].mxu0  ;;  %v773_v35 = vmul.f32 %v726_v21, %v581_v28 }
 0x372   : > { %4124 = vst.msk [vmem:[%s5846_s27 + $0x20] sm:$0xff] %vm4119_vm6, %v4986_v25  ;;  %v4987_v39 = vadd.f32 %v3511_v37, %v761_v34  ;;  %v4903_v40 = vpop.f32.mrb[39].mxu0  ;;  %v582_v34 = vld [vmem:[%s5837_s11 + $0x90] sm:$0xff] }
 0x373   : > { %v3552_v43 = vpop.f32.mrb[36].mxu1  ;;  %v774_v40 = vmul.f32 %v730_v33, %v582_v34 }
 0x374   : > { %4125 = vst.msk [vmem:[%s5846_s27 + $0x28] sm:$0xff] %vm4119_vm6, %v4987_v39  ;;  %v4988_v45 = vadd.f32 %v3552_v43, %v762_v38  ;;  %v4908_v46 = vpop.f32.mrb[37].mxu1  ;;  %v583_v38 = vld [vmem:[%s5837_s11 + $0x98] sm:$0xff]  ;;  %v734_v43 = vpop.permute.xlu0 %733 }
 0x375   : > { %v3555_v48 = vpop.f32.mrb[38].mxu1  ;;  %v775_v46 = vmul.f32 %v730_v33, %v583_v38 }
 0x376   : > { %4126 = vst.msk [vmem:[%s5846_s27 + $0x30] sm:$0xff] %vm4119_vm6, %v4988_v45  ;;  %v4989_v50 = vadd.f32 %v3555_v48, %v763_v44  ;;  %v4909_v51 = vpop.f32.mrb[39].mxu1  ;;  %v584_v44 = vld [vmem:[%s5837_s11 + $0xa0] sm:$0xff] }
 0x377   : > { %v3596_v54 = vpop.f32.mrb[40].mxu0  ;;  %v776_v51 = vmul.f32 %v734_v43, %v584_v44 }
 0x378   : > { %4127 = vst.msk [vmem:[%s5846_s27 + $0x38] sm:$0xff] %vm4119_vm6, %v4989_v50  ;;  %v4990_v55 = vadd.f32 %v3596_v54, %v764_v49  ;;  %v4914_v56 = vpop.f32.mrb[41].mxu0  ;;  %v585_v49 = vld [vmem:[%s5837_s11 + $0xa8] sm:$0xff]  ;;  %v738_v54 = vpop.permute.xlu1 %737 }
 0x379   : > { %v3599_v58 = vpop.f32.mrb[42].mxu0  ;;  %v777_v56 = vmul.f32 %v734_v43, %v585_v49 }
 0x37a   : > { %4128 = vst.msk [vmem:[%s5846_s27 + $0x40] sm:$0xff] %vm4119_vm6, %v4990_v55  ;;  %v4991_v61 = vadd.f32 %v3599_v58, %v765_v12  ;;  %v4915_v62 = vpop.f32.mrb[43].mxu0  ;;  %v586_v12 = vld [vmem:[%s5837_s11 + $0xb0] sm:$0xff] }
 0x37b   : > { %v3640_v1 = vpop.f32.mrb[40].mxu1  ;;  %v778_v62 = vmul.f32 %v738_v54, %v586_v12 }
 0x37c   : > { %4129 = vst.msk [vmem:[%s5846_s27 + $0x48] sm:$0xff] %vm4119_vm6, %v4991_v61  ;;  %v4992_v3 = vadd.f32 %v3640_v1, %v766_v60  ;;  %v4920_v15 = vpop.f32.mrb[41].mxu1  ;;  %v587_v60 = vld [vmem:[%s5837_s11 + $0xb8] sm:$0xff]  ;;  %v742_v1 = vpop.permute.xlu0 %741 }
 0x37d   : > { %v3643_v4 = vpop.f32.mrb[42].mxu1  ;;  %v779_v15 = vmul.f32 %v738_v54, %v587_v60 }
 0x37e   : > { %4130 = vst.msk [vmem:[%s5846_s27 + $0x50] sm:$0xff] %vm4119_vm6, %v4992_v3  ;;  %v4993_v6 = vadd.f32 %v3643_v4, %v767_v2  ;;  %v4921_v59 = vpop.f32.mrb[43].mxu1  ;;  %v588_v2 = vld [vmem:[%s5837_s11 + $0xc0] sm:$0xff] }
 0x37f   : > { %v3684_v9 = vpop.f32.mrb[44].mxu0  ;;  %v780_v59 = vmul.f32 %v742_v1, %v588_v2 }
 0x380   : > { %4131 = vst.msk [vmem:[%s5846_s27 + $0x58] sm:$0xff] %vm4119_vm6, %v4993_v6  ;;  %v4994_v11 = vadd.f32 %v3684_v9, %v768_v5  ;;  %v4926_v13 = vpop.f32.mrb[45].mxu0  ;;  %v589_v5 = vld [vmem:[%s5837_s11 + $0xc8] sm:$0xff]  ;;  %v746_v9 = vpop.permute.xlu1 %745 }
 0x381   : > { %v3687_v16 = vpop.f32.mrb[46].mxu0  ;;  %v781_v13 = vmul.f32 %v742_v1, %v589_v5 }
 0x382   : > { %4132 = vst.msk [vmem:[%s5846_s27 + $0x60] sm:$0xff] %vm4119_vm6, %v4994_v11  ;;  %v4995_v18 = vadd.f32 %v3687_v16, %v769_v10  ;;  %v4927_v19 = vpop.f32.mrb[47].mxu0  ;;  %v590_v10 = vld [vmem:[%s5837_s11 + $0xd0] sm:$0xff] }
 0x383   : > { %v3728_v23 = vpop.f32.mrb[44].mxu1  ;;  %v782_v19 = vmul.f32 %v746_v9, %v590_v10 }
 0x384   : > { %4133 = vst.msk [vmem:[%s5846_s27 + $0x68] sm:$0xff] %vm4119_vm6, %v4995_v18  ;;  %v4996_v26 = vadd.f32 %v3728_v23, %v770_v17  ;;  %v4932_v27 = vpop.f32.mrb[45].mxu1  ;;  %v591_v17 = vld [vmem:[%s5837_s11 + $0xd8] sm:$0xff]  ;;  %v750_v23 = vpop.permute.xlu0 %749 }
 0x385   : > { %v3731_v29 = vpop.f32.mrb[46].mxu1  ;;  %v783_v27 = vmul.f32 %v746_v9, %v591_v17 }
 0x386   : > { %4134 = vst.msk [vmem:[%s5846_s27 + $0x70] sm:$0xff] %vm4119_vm6, %v4996_v26  ;;  %v4997_v31 = vadd.f32 %v3731_v29, %v771_v24  ;;  %v4933_v32 = vpop.f32.mrb[47].mxu1  ;;  %v592_v24 = vld [vmem:[%s5837_s11 + $0xe0] sm:$0xff] }
 0x387   : > { %v3772_v25 = vpop.f32.mrb[48].mxu0  ;;  %v784_v32 = vmul.f32 %v750_v23, %v592_v24 }
 0x388   : > { %4135 = vst.msk [vmem:[%s5846_s27 + $0x78] sm:$0xff] %vm4119_vm6, %v4997_v31  ;;  %v4998_v36 = vadd.f32 %v3772_v25, %v772_v30  ;;  %v4938_v37 = vpop.f32.mrb[49].mxu0  ;;  %v593_v30 = vld [vmem:[%s5837_s11 + $0xe8] sm:$0xff]  ;;  %v754_v25 = vpop.permute.xlu1 %753 }
 0x389   : > { %v3775_v39 = vpop.f32.mrb[50].mxu0  ;;  %v785_v37 = vmul.f32 %v750_v23, %v593_v30 }
 0x38a   : > { %4136 = vst.msk [vmem:[%s5846_s27 + $0x80] sm:$0xff] %vm4119_vm6, %v4998_v36  ;;  %v4999_v41 = vadd.f32 %v3775_v39, %v773_v35  ;;  %v4939_v42 = vpop.f32.mrb[51].mxu0  ;;  %v594_v35 = vld [vmem:[%s5837_s11 + $0xf0] sm:$0xff] }
 0x38b   : > { %v3816_v45 = vpop.f32.mrb[48].mxu1  ;;  %v786_v42 = vmul.f32 %v754_v25, %v594_v35 }
 0x38c   : > { %4137 = vst.msk [vmem:[%s5846_s27 + $0x88] sm:$0xff] %vm4119_vm6, %v4999_v41  ;;  %v5000_v47 = vadd.f32 %v3816_v45, %v774_v40  ;;  %v4944_v48 = vpop.f32.mrb[49].mxu1  ;;  %v595_v40 = vld [vmem:[%s5837_s11 + $0xf8] sm:$0xff]  ;;  %s5227_s11 = smov [#allocation2]  }
 0x38d   : > { %v3819_v50 = vpop.f32.mrb[50].mxu1  ;;  %s5147_s12 = sshll.u32 %s5227_s11, 4  ;;  %s5148_s12 = int_to_ptr.vmem [resolvable:$false] %s5147_s12 }
 0x38e   : > { %4138 = vst.msk [vmem:[%s5846_s27 + $0x90] sm:$0xff] %vm4119_vm6, %v5000_v47  ;;  %v5001_v52 = vadd.f32 %v3819_v50, %v775_v46  ;;  %v4945_v53 = vpop.f32.mrb[51].mxu1  ;;  %v787_v46 = vmul.f32 %v754_v25, %v595_v40  ;;  %s5149_s19 = scalar_lea.vmem %s5148_s12, 8192  ;;  %p5150_p1 = scmp.lt.s32.totalorder %s5943_s20, %s5148_s12 }
 0x38f   : > { %v3860_v55 = vpop.f32.mrb[52].mxu0  ;;  %p5151_p2 = scmp.lt.s32.totalorder %s5149_s19, %s5143_s30 }
 0x390   : > { %4139 = vst.msk [vmem:[%s5846_s27 + $0x98] sm:$0xff] %vm4119_vm6, %v5001_v52  ;;  %v5002_v57 = vadd.f32 %v3860_v55, %v776_v51  ;;  %v4950_v58 = vpop.f32.mrb[53].mxu0 }
 0x391   : > { %v3863_v61 = vpop.f32.mrb[54].mxu0  ;;  %p5152_p3 = por %p5151_p2, %p5150_p1 }
 0x392   : > { %4140 = vst.msk [vmem:[%s5846_s27 + $0xa0] sm:$0xff] %vm4119_vm6, %v5002_v57  ;;  %v5003_v63 = vadd.f32 %v3863_v61, %v777_v56  ;;  %v4951_v0 = vpop.f32.mrb[55].mxu0 }
 0x393   : > { %v3904_v3 = vpop.f32.mrb[52].mxu1  ;;  %p5153_p5 = pnand %p5152_p3, %p5146_p0 }
 0x394   : > { %4141 = vst.msk [vmem:[%s5846_s27 + $0xa8] sm:$0xff] %vm4119_vm6, %v5003_v63  ;;  %v5004_v20 = vadd.f32 %v3904_v3, %v778_v62  ;;  %v4956_v4 = vpop.f32.mrb[53].mxu1 }
 0x395   : > { %v3907_v6 = vpop.f32.mrb[54].mxu1 }
 0x396   : > { %4142 = vst.msk [vmem:[%s5846_s27 + $0xb0] sm:$0xff] %vm4119_vm6, %v5004_v20  ;;  %v5005_v7 = vadd.f32 %v3907_v6, %v779_v15  ;;  %v4957_v8 = vpop.f32.mrb[55].mxu1 }
 0x397   : > { %v3948_v11 = vpop.f32.mrb[56].mxu0 }
 0x398   : > { %4143 = vst.msk [vmem:[%s5846_s27 + $0xb8] sm:$0xff] %vm4119_vm6, %v5005_v7  ;;  %v5006_v14 = vadd.f32 %v3948_v11, %v780_v59  ;;  %v4962_v16 = vpop.f32.mrb[57].mxu0 }
 0x399   : > { %v3951_v18 = vpop.f32.mrb[58].mxu0 }
 0x39a   : > { %4144 = vst.msk [vmem:[%s5846_s27 + $0xc0] sm:$0xff] %vm4119_vm6, %v5006_v14  ;;  %v5007_v21 = vadd.f32 %v3951_v18, %v781_v13  ;;  %v4963_v22 = vpop.f32.mrb[59].mxu0 }
 0x39b   : > { %v3992_v26 = vpop.f32.mrb[56].mxu1 }
 0x39c   : > { %4145 = vst.msk [vmem:[%s5846_s27 + $0xc8] sm:$0xff] %vm4119_vm6, %v5007_v21  ;;  %v5008_v28 = vadd.f32 %v3992_v26, %v782_v19  ;;  %v4968_v29 = vpop.f32.mrb[57].mxu1 }
 0x39d   : > { %v3995_v31 = vpop.f32.mrb[58].mxu1 }
 0x39e   : > { %4146 = vst.msk [vmem:[%s5846_s27 + $0xd0] sm:$0xff] %vm4119_vm6, %v5008_v28  ;;  %v5009_v33 = vadd.f32 %v3995_v31, %v783_v27  ;;  %v4969_v34 = vpop.f32.mrb[59].mxu1 }
 0x39f   : > { %v4036_v36 = vpop.f32.mrb[60].mxu0 }
 0x3a0   : > { %4147 = vst.msk [vmem:[%s5846_s27 + $0xd8] sm:$0xff] %vm4119_vm6, %v5009_v33  ;;  %v5010_v38 = vadd.f32 %v4036_v36, %v784_v32  ;;  %v4974_v39 = vpop.f32.mrb[61].mxu0 }
 0x3a1   : > { %v4039_v41 = vpop.f32.mrb[62].mxu0 }
 0x3a2   : > { %4148 = vst.msk [vmem:[%s5846_s27 + $0xe0] sm:$0xff] %vm4119_vm6, %v5010_v38  ;;  %v5011_v43 = vadd.f32 %v4039_v41, %v785_v37  ;;  %v4975_v44 = vpop.f32.mrb[63].mxu0 }
 0x3a3   : > { %v4080_v45 = vpop.f32.mrb[60].mxu1 }
 0x3a4   : > { %4149 = vst.msk [vmem:[%s5846_s27 + $0xe8] sm:$0xff] %vm4119_vm6, %v5011_v43  ;;  %v5012_v47 = vadd.f32 %v4080_v45, %v786_v42  ;;  %v4980_v48 = vpop.f32.mrb[61].mxu1 }
 0x3a5   : > { %v4083_v49 = vpop.f32.mrb[62].mxu1 }
 0x3a6   : > { %4150 = vst.msk [vmem:[%s5846_s27 + $0xf0] sm:$0xff] %vm4119_vm6, %v5012_v47  ;;  %v5013_v50 = vadd.f32 %v4083_v49, %v787_v46  ;;  %v4981_v51 = vpop.f32.mrb[63].mxu1 }
 0x3a8   : > { %4151 = vst.msk [vmem:[%s5846_s27 + $0xf8] sm:$0xff] %vm4119_vm6, %v5013_v50 }
 0x3a9   : > { %5156 = shalt.err (!%p5153_p5)
}
 0x3aa   : > { %s5157_s28 = scalar_lea.hbm %s5941_s29, 4096  ;;  %s5161_s24 = scalar_lea.hbm %s6007_s10, 8192 }
 0x3ab   : > { %p5158_p6 = scmp.ne.s32.totalorder %s5941_s29, %s5157_s28  ;;  %p5162_p10 = scmp.lt.u32.totalorder %s5941_s29, %s6007_s10 }
 0x3ac   : > { %p5163_p11 = scmp.lt.u32.totalorder %s5161_s24, %s5157_s28  ;;  %p5165_p13 = scmp.lt.u32.totalorder %s5157_s28, %s5941_s29 }
 0x3ad   : > { %p5159_p7 = pnand %p5158_p6, %p5325_p4 }
 0x3ae   : > { %p5164_p12 = por %p5163_p11, %p5162_p10 }
 0x3af   : > { %p5160_p9 = pneg %p5159_p7 }
 0x3b0   : > { %p5166_p0 = por %p5165_p13, %p5164_p12 }
 0x3b2   : > { %p5167_p1 = pnand %p5166_p0, %p5160_p9 }
 0x3b4   : > { %5170 = shalt.err (!%p5167_p1)
}
 0x3b5   : > { %s5228_s30 = smov 128   ;;  %s5229_s19 = smov 8  }
 0x3b6   : > { %5078 = dma.vmem_to_hbm [thread:$0]  (%p5325_p4), %s5943_s20, 4096, %s5941_s29, %s5951_s16, %s5228_s30, %s5228_s30, %s5229_s19  }
 0x3b7 PF: > { %p5084_p2 = scmp.ge.s32.totalorder %s5221_s18, 2  ;;  %s4184_s27 = sand.u32 1, %s5201_s13  }
 0x3b8   : > { %s4185_s28 = scalar_lea.sflag [#allocation3], %s4184_s27 }
 0x3b9   : > { %p5081_p3 = pnand %p5084_p2, %p5332_p8 }
 0x3bb   : > { %5196 = dma.done.wait (!%p5081_p3), %s4185_s28, 4096  }
 0x3bc   : > { %5198 = vsyncadd (!%p5081_p3), %s4185_s28, 4294963200  ;;  %s23_s18 = sadd.s32 1, %s5221_s18   ;;  %s6010_s13 = smov %s5205_s14 }
 0x3bd   : > { %p20_p5 = scmp.ge.s32.totalorder %s23_s18, 4   ;;  %s6011_s14 = smov %s5209_s15 }
 0x3be   : > { %s6012_s15 = smov %s5338_s26  ;;  %s6013_s16 = smov %s5217_s17 }
 0x3bf   : > { %s6014_s17 = smov %s6016_s21  ;;  %22 = sbr.rel (!%p20_p5) target bundleno = 4 (0x4), region = 110 }
 0x3c6   :  { %4190 = vsyncpa [#allocation3], 1 }
 0x3c7   :  { %4192 = vsyncpa [#allocation3 + $0x1], 1 }

</bundles_post_ra>
